<compile_context>
chip_gen: v5e
topology: v5e:2x2
jax: 0.10.0
libtpu: 0.0.40
codegen_flags: <defaults>
</compile_context>

<pallas_src>
import functools

import jax
import jax.numpy as jnp
from jax.experimental import pallas as pl
from jax.experimental.pallas import tpu as pltpu


def _pick_vmem_limit():
    """Per-generation scoped-VMEM budget (<=75% physical, capped at 96 MiB)."""
    try:
        cap = pltpu.get_tpu_info().vmem_capacity_bytes
        return int(min(cap * 3 // 4, 96 * 1024 * 1024))
    except Exception:
        return 48 * 1024 * 1024   # safe on v7x (64 MiB) and v5e/v6e (128 MiB)


_VMEM_LIMIT = _pick_vmem_limit()


# ----------------------------- kernel helpers ------------------------------

def _ln(x, g, b, eps=1e-5):
    """PyTorch-style LayerNorm over the last dim (biased variance, eps=1e-5)."""
    mu = jnp.mean(x, axis=-1, keepdims=True)
    var = jnp.mean((x - mu) ** 2, axis=-1, keepdims=True)
    return (x - mu) * jax.lax.rsqrt(var + eps) * g + b


def _mm(a, b):
    """2-D matmul, f32 accumulation (operands expected bf16)."""
    return jnp.dot(a, b, preferred_element_type=jnp.float32)


def _mm_nt(a, b):
    """a @ b.T (f32 accumulation) without an explicit transpose."""
    return jax.lax.dot_general(
        a, b, dimension_numbers=(((1,), (1,)), ((), ())),
        preferred_element_type=jnp.float32)


# ------------------------------- kernels ------------------------------------

def l1_kernel(z_ref, w_ref, b_ref, pos_ref, o_ref):
    """x = l1(z) + pos_embed (flattened (B, S*E)); single grid step."""
    o_ref[...] = (_mm(z_ref[...].astype(jnp.bfloat16), w_ref[...])
                  + b_ref[...] + pos_ref[...])


def blocks_conv_kernel(x0_ref, ln1g_ref, ln1b_ref, wq_ref, bq_ref, wk_ref,
                       bk_ref, wv_ref, bv_ref, wo_ref, bo_ref, ln2g_ref,
                       ln2b_ref, w1_ref, b1_ref, w2_ref, b2_ref, cw_ref,
                       cb_ref, y_ref, x_scr):
    """One grid step = one Gen_TransformerEncoderBlock layer.

    grid = (depth,). The (B, N, D) activation carry lives in VMEM scratch
    across the depth sweep; the fused 1x1-conv epilogue fires at the last
    layer and writes the (B, C, N) output (seq on the lane dim).
    """
    layer = pl.program_id(0)
    last = pl.num_programs(0) - 1

    @pl.when(layer == 0)
    def _():
        x_scr[...] = x0_ref[...]          # initialize carry from l1(z)+pos

    B, N, D = x_scr.shape
    H = wq_ref.shape[0]
    scale = 1.0 / (float(D) ** 0.5)        # reference scales by emb_size ** 0.5

    ln1g = ln1g_ref[...]; ln1b = ln1b_ref[...]
    ln2g = ln2g_ref[...]; ln2b = ln2b_ref[...]
    bo = bo_ref[...]; b1 = b1_ref[...]; b2 = b2_ref[...]
    w1 = w1_ref[...]; w2 = w2_ref[...]

    # Batch loop inside the kernel: weights stream exactly once per layer.
    for b in range(B):
        xb = x_scr[b]                      # (N, D) f32 carry

        # ---------------- attention sub-block ----------------
        h = _ln(xb, ln1g, ln1b).astype(jnp.bfloat16)
        attn = jnp.zeros((N, D), jnp.float32)
        for hi in range(H):                # head-major weights: no lane slices,
            q = _mm(h, wq_ref[hi]) + bq_ref[hi]        # no concat
            k = _mm(h, wk_ref[hi]) + bk_ref[hi]
            v = _mm(h, wv_ref[hi]) + bv_ref[hi]
            e = _mm_nt(q.astype(jnp.bfloat16), k.astype(jnp.bfloat16)) * scale
            e = e - jnp.max(e, axis=-1, keepdims=True)
            p = jnp.exp(e)
            p = p / jnp.sum(p, axis=-1, keepdims=True)  # exact recip (stability)
            ctx = _mm(p.astype(jnp.bfloat16), v.astype(jnp.bfloat16))
            # accumulate this head's share of the output projection directly
            attn = attn + _mm(ctx.astype(jnp.bfloat16), wo_ref[hi])
        x1 = xb + attn + bo                # ResidualAdd (dropout = identity)

        # ---------------- feed-forward sub-block ----------------
        g = _ln(x1, ln2g, ln2b).astype(jnp.bfloat16)
        hid = _mm(g, w1) + b1
        # TODO(synk): nn.GELU() default is the exact erf form; tanh
        # approximation used since an erf lowering is not guaranteed in Mosaic.
        hid = jax.nn.gelu(hid, approximate=True).astype(jnp.bfloat16)
        ff = _mm(hid, w2) + b2
        x_scr[b] = x1 + ff                 # ResidualAdd; carry stays in VMEM

    # ---------------- fused 1x1 conv epilogue ----------------
    @pl.when(layer == last)
    def _():
        cw = cw_ref[...]                   # (C, D) bf16
        cb = cb_ref[...]                   # (C, 1) f32
        for b in range(B):
            yb = jax.lax.dot_general(
                cw, x_scr[b].astype(jnp.bfloat16),
                dimension_numbers=(((1,), (1,)), ((), ())),
                preferred_element_type=jnp.float32)     # (C, N)
            y_ref[b] = yb + cb


# --------------------------- pallas_call wrappers -----------------------------

def l1_forward(z, w, b, pos):
    B = z.shape[0]
    SE = w.shape[1]
    return pl.pallas_call(
        l1_kernel,
        out_shape=jax.ShapeDtypeStruct((B, SE), jnp.float32),
        compiler_params=pltpu.CompilerParams(vmem_limit_bytes=_VMEM_LIMIT),
    )(z, w, b, pos)


def blocks_conv_forward(x0, blk, conv_w, conv_b):
    B, N, D = x0.shape
    depth, H, _, hd = blk["wq"].shape
    F = blk["w1"].shape[2]
    C = conv_w.shape[0]

    const3 = lambda l: (0, 0, 0)
    const2 = lambda l: (0, 0)
    wl3 = lambda l: (l, 0, 0)       # per-layer 3-D weight block
    wl4 = lambda l: (l, 0, 0, 0)    # per-layer 4-D (head-major) weight block

    in_specs = [
        pl.BlockSpec((B, N, D), const3),         # x0 (DMA'd once; read layer 0)
        pl.BlockSpec((None, 1, D), wl3),         # ln1_g
        pl.BlockSpec((None, 1, D), wl3),         # ln1_b
        pl.BlockSpec((None, H, D, hd), wl4),     # wq
        pl.BlockSpec((None, H, 1, hd), wl4),     # bq
        pl.BlockSpec((None, H, D, hd), wl4),     # wk
        pl.BlockSpec((None, H, 1, hd), wl4),     # bk
        pl.BlockSpec((None, H, D, hd), wl4),     # wv
        pl.BlockSpec((None, H, 1, hd), wl4),     # bv
        pl.BlockSpec((None, H, hd, D), wl4),     # wo
        pl.BlockSpec((None, 1, D), wl3),         # bo
        pl.BlockSpec((None, 1, D), wl3),         # ln2_g
        pl.BlockSpec((None, 1, D), wl3),         # ln2_b
        pl.BlockSpec((None, D, F), wl3),         # w1
        pl.BlockSpec((None, 1, F), wl3),         # b1
        pl.BlockSpec((None, F, D), wl3),         # w2
        pl.BlockSpec((None, 1, D), wl3),         # b2
        pl.BlockSpec((C, D), const2),            # conv_w (resident)
        pl.BlockSpec((C, 1), const2),            # conv_b (resident)
    ]
    return pl.pallas_call(
        blocks_conv_kernel,
        grid=(depth,),
        in_specs=in_specs,
        out_specs=pl.BlockSpec((B, C, N), const3),
        out_shape=jax.ShapeDtypeStruct((B, C, N), jnp.float32),
        scratch_shapes=[pltpu.VMEM((B, N, D), jnp.float32)],
        compiler_params=pltpu.CompilerParams(
            dimension_semantics=("arbitrary",),
            vmem_limit_bytes=_VMEM_LIMIT),
    )(x0,
      blk["ln1_g"], blk["ln1_b"],
      blk["wq"], blk["bq"], blk["wk"], blk["bk"],
      blk["wv"], blk["bv"], blk["wo"], blk["bo"],
      blk["ln2_g"], blk["ln2_b"],
      blk["w1"], blk["b1"], blk["w2"], blk["b2"],
      conv_w, conv_b)


# ------------------------------ model wrapper --------------------------------

def init_params(key, *, latent_dim, seq_len, embed_dim, channels, depth,
                num_heads, expansion=4):
    assert embed_dim % num_heads == 0
    d = embed_dim
    hd = d // num_heads
    f = expansion * d
    se = seq_len * embed_dim
    keys = iter(jax.random.split(key, 8 + 16 * depth))

    def nrm(shape, dtype=jnp.float32, scale=0.05):
        return (scale * jax.random.normal(next(keys), shape)).astype(dtype)

    params = {
        "l1_w": nrm((latent_dim, se), jnp.bfloat16),
        "l1_b": nrm((1, se)),
        # nn.Parameter pos_embed (1, S, E) stored flattened (row-major) to (1, S*E):
        "pos_flat": nrm((1, se)),
        # 1x1 conv weight stored as (C, D) for a seq-minor (lane-dense) output:
        "conv_w": nrm((channels, d), jnp.bfloat16),
        "conv_b": nrm((channels, 1)),
    }

    per_layer = []
    for _ in range(depth):
        per_layer.append({
            "ln1_g": jnp.ones((1, d), jnp.float32),
            "ln1_b": jnp.zeros((1, d), jnp.float32),
            # head-major projections: wq[h] == W_q_full[:, h*hd:(h+1)*hd]
            "wq": nrm((num_heads, d, hd), jnp.bfloat16), "bq": nrm((num_heads, 1, hd)),
            "wk": nrm((num_heads, d, hd), jnp.bfloat16), "bk": nrm((num_heads, 1, hd)),
            "wv": nrm((num_heads, d, hd), jnp.bfloat16), "bv": nrm((num_heads, 1, hd)),
            # head-major output projection: wo[h] == W_o_full[h*hd:(h+1)*hd, :]
            "wo": nrm((num_heads, hd, d), jnp.bfloat16), "bo": nrm((1, d)),
            "ln2_g": jnp.ones((1, d), jnp.float32),
            "ln2_b": jnp.zeros((1, d), jnp.float32),
            "w1": nrm((d, f), jnp.bfloat16), "b1": nrm((1, f)),
            "w2": nrm((f, d), jnp.bfloat16), "b2": nrm((1, d)),
        })
    # Stack per-layer params along a leading depth axis so one pallas_call can
    # stream them with a depth-indexed BlockSpec (weight prefetch per layer).
    params["blocks"] = jax.tree.map(lambda *xs: jnp.stack(xs, axis=0), *per_layer)
    return params


def generator_tts_forward(z, params, *, seq_len, embed_dim, channels):
    B = z.shape[0]

    # l1(z) + pos_embed (flattened); host-side reshape to (B, S, E) is free.
    x_flat = l1_forward(z, params["l1_w"], params["l1_b"], params["pos_flat"])
    x0 = x_flat.reshape(B, seq_len, embed_dim)

    # all encoder blocks + fused 1x1 conv in a single pallas_call
    y = blocks_conv_forward(x0, params["blocks"], params["conv_w"],
                            params["conv_b"])

    # NCHW output identical to PyTorch: (B, channels, H=1, W=seq_len)
    return y.reshape(B, channels, 1, seq_len)


# ----------------------------------- main ------------------------------------

if __name__ == "__main__":
    # Small shapes consistent with the module's constructor args.
    B = 2
    LATENT_DIM = 32
    SEQ_LEN = 16
    EMBED_DIM = 8
    CHANNELS = 4
    NUM_HEADS = 4      # must divide EMBED_DIM
    DEPTH = 2

    key = jax.random.PRNGKey(0)
    kz, kp = jax.random.split(key)
    z = jax.random.normal(kz, (B, LATENT_DIM), dtype=jnp.float32)
    params = init_params(kp, latent_dim=LATENT_DIM, seq_len=SEQ_LEN,
                         embed_dim=EMBED_DIM, channels=CHANNELS, depth=DEPTH,
                         num_heads=NUM_HEADS)

    fwd = jax.jit(functools.partial(
        generator_tts_forward, seq_len=SEQ_LEN, embed_dim=EMBED_DIM,
        channels=CHANNELS))
    out = jax.block_until_ready(fwd(z, params))
    assert out.shape == (B, CHANNELS, 1, SEQ_LEN), out.shape
    assert out.dtype == jnp.float32
    print("KERNEL_OK")
</pallas_src>

<mosaic_0001>
module attributes {stable_mosaic.version = 11 : i64} {
  func.func @l1_kernel(%arg0: memref<2x32xf32, #tpu.memory_space<vmem>>, %arg1: memref<32x128xbf16, #tpu.memory_space<vmem>>, %arg2: memref<1x128xf32, #tpu.memory_space<vmem>>, %arg3: memref<1x128xf32, #tpu.memory_space<vmem>>, %arg4: memref<2x128xf32, #tpu.memory_space<vmem>>) attributes {dimension_semantics = [], scalar_prefetch = 0 : i64, scratch_operands = 0 : i64, tpu.core_type = #tpu.core_type<tc>} {
    %c0 = arith.constant 0 : index
    %c0_0 = arith.constant 0 : index
    %0 = vector.load %arg0[%c0, %c0_0] : memref<2x32xf32, #tpu.memory_space<vmem>>, vector<2x32xf32>
    %1 = arith.truncf %0 : vector<2x32xf32> to vector<2x32xbf16>
    %c0_1 = arith.constant 0 : index
    %c0_2 = arith.constant 0 : index
    %2 = vector.load %arg1[%c0_1, %c0_2] : memref<32x128xbf16, #tpu.memory_space<vmem>>, vector<32x128xbf16>
    %cst = arith.constant dense<0.000000e+00> : vector<2x128xf32>
    %3 = tpu.matmul %1, %2, %cst {dimension_numbers = #tpu.dot_dimension_numbers<[1], [0], [0], [1], [0, 0, 1, 1], [], []>} : vector<2x32xbf16>, vector<32x128xbf16>, vector<2x128xf32> -> vector<2x128xf32>
    %c0_3 = arith.constant 0 : index
    %c0_4 = arith.constant 0 : index
    %4 = vector.load %arg2[%c0_3, %c0_4] : memref<1x128xf32, #tpu.memory_space<vmem>>, vector<1x128xf32>
    %5 = vector.broadcast %4 : vector<1x128xf32> to vector<2x128xf32>
    %6 = arith.addf %3, %5 : vector<2x128xf32>
    %c0_5 = arith.constant 0 : index
    %c0_6 = arith.constant 0 : index
    %7 = vector.load %arg3[%c0_5, %c0_6] : memref<1x128xf32, #tpu.memory_space<vmem>>, vector<1x128xf32>
    %8 = vector.broadcast %7 : vector<1x128xf32> to vector<2x128xf32>
    %9 = arith.addf %6, %8 : vector<2x128xf32>
    %c0_7 = arith.constant 0 : index
    %c0_8 = arith.constant 0 : index
    %10 = vector.load %arg4[%c0_7, %c0_8] : memref<2x128xf32, #tpu.memory_space<vmem>>, vector<2x128xf32>
    tpu.vector_store %arg4[%c0_7, %c0_8], %9 {strides = array<i32>} : memref<2x128xf32, #tpu.memory_space<vmem>>, vector<2x128xf32>,
    return
  }
}

module attributes {stable_mosaic.version = 11 : i64} {
  func.func @blocks_conv_kernel(%arg0: i32, %arg1: memref<2x16x8xf32, #tpu.memory_space<vmem>>, %arg2: memref<1x1x8xf32, #tpu.memory_space<vmem>>, %arg3: memref<1x1x8xf32, #tpu.memory_space<vmem>>, %arg4: memref<1x4x8x2xbf16, #tpu.memory_space<vmem>>, %arg5: memref<1x4x1x2xf32, #tpu.memory_space<vmem>>, %arg6: memref<1x4x8x2xbf16, #tpu.memory_space<vmem>>, %arg7: memref<1x4x1x2xf32, #tpu.memory_space<vmem>>, %arg8: memref<1x4x8x2xbf16, #tpu.memory_space<vmem>>, %arg9: memref<1x4x1x2xf32, #tpu.memory_space<vmem>>, %arg10: memref<1x4x2x8xbf16, #tpu.memory_space<vmem>>, %arg11: memref<1x1x8xf32, #tpu.memory_space<vmem>>, %arg12: memref<1x1x8xf32, #tpu.memory_space<vmem>>, %arg13: memref<1x1x8xf32, #tpu.memory_space<vmem>>, %arg14: memref<1x8x32xbf16, #tpu.memory_space<vmem>>, %arg15: memref<1x1x32xf32, #tpu.memory_space<vmem>>, %arg16: memref<1x32x8xbf16, #tpu.memory_space<vmem>>, %arg17: memref<1x1x8xf32, #tpu.memory_space<vmem>>, %arg18: memref<4x8xbf16, #tpu.memory_space<vmem>>, %arg19: memref<4x1xf32, #tpu.memory_space<vmem>>, %arg20: memref<2x4x16xf32, #tpu.memory_space<vmem>>, %arg21: memref<2x16x8xf32, #tpu.memory_space<vmem>>) attributes {dimension_semantics = [#tpu.dimension_semantics<arbitrary>], iteration_bounds = array<i64: 2>, scalar_prefetch = 0 : i64, scratch_operands = 1 : i64, tpu.core_type = #tpu.core_type<tc>, window_params = [{pipeline_mode = #tpu.pipeline_mode<synchronous>, transform_indices = @transform_0, window_bounds = array<i64: 2, 16, 8>}, {transform_indices = @transform_1, window_bounds = array<i64: 1, 1, 8>}, {transform_indices = @transform_2, window_bounds = array<i64: 1, 1, 8>}, {transform_indices = @transform_3, window_bounds = array<i64: 1, 4, 8, 2>}, {transform_indices = @transform_4, window_bounds = array<i64: 1, 4, 1, 2>}, {transform_indices = @transform_5, window_bounds = array<i64: 1, 4, 8, 2>}, {transform_indices = @transform_6, window_bounds = array<i64: 1, 4, 1, 2>}, {transform_indices = @transform_7, window_bounds = array<i64: 1, 4, 8, 2>}, {transform_indices = @transform_8, window_bounds = array<i64: 1, 4, 1, 2>}, {transform_indices = @transform_9, window_bounds = array<i64: 1, 4, 2, 8>}, {transform_indices = @transform_10, window_bounds = array<i64: 1, 1, 8>}, {transform_indices = @transform_11, window_bounds = array<i64: 1, 1, 8>}, {transform_indices = @transform_12, window_bounds = array<i64: 1, 1, 8>}, {transform_indices = @transform_13, window_bounds = array<i64: 1, 8, 32>}, {transform_indices = @transform_14, window_bounds = array<i64: 1, 1, 32>}, {transform_indices = @transform_15, window_bounds = array<i64: 1, 32, 8>}, {transform_indices = @transform_16, window_bounds = array<i64: 1, 1, 8>}, {pipeline_mode = #tpu.pipeline_mode<synchronous>, transform_indices = @transform_17, window_bounds = array<i64: 4, 8>}, {pipeline_mode = #tpu.pipeline_mode<synchronous>, transform_indices = @transform_18, window_bounds = array<i64: 4, 1>}, {pipeline_mode = #tpu.pipeline_mode<synchronous>, transform_indices = @transform_19, window_bounds = array<i64: 2, 4, 16>}]} {
    %c0_i32 = arith.constant 0 : i32
    %0 = arith.cmpi eq, %arg0, %c0_i32 : i32
    %1 = arith.extui %0 : i1 to i32
    %c0_i32_0 = arith.constant 0 : i32
    %2 = arith.cmpi ne, %1, %c0_i32_0 : i32
    scf.if %2 {
      %c0_366 = arith.constant 0 : index
      %c0_367 = arith.constant 0 : index
      %c0_368 = arith.constant 0 : index
      %520 = vector.load %arg1[%c0_366, %c0_367, %c0_368] : memref<2x16x8xf32, #tpu.memory_space<vmem>>, vector<2x16x8xf32>
      %c0_369 = arith.constant 0 : index
      %c0_370 = arith.constant 0 : index
      %c0_371 = arith.constant 0 : index
      %521 = vector.load %arg21[%c0_369, %c0_370, %c0_371] : memref<2x16x8xf32, #tpu.memory_space<vmem>>, vector<2x16x8xf32>
      tpu.vector_store %arg21[%c0_369, %c0_370, %c0_371], %520 {strides = array<i32>} : memref<2x16x8xf32, #tpu.memory_space<vmem>>, vector<2x16x8xf32>,
    } else {
    }
    %c0 = arith.constant 0 : index
    %c0_1 = arith.constant 0 : index
    %c0_2 = arith.constant 0 : index
    %3 = vector.load %arg2[%c0, %c0_1, %c0_2] : memref<1x1x8xf32, #tpu.memory_space<vmem>>, vector<1x1x8xf32>
    %4 = vector.shape_cast %3 : vector<1x1x8xf32> to vector<1x8xf32>
    %c0_3 = arith.constant 0 : index
    %c0_4 = arith.constant 0 : index
    %c0_5 = arith.constant 0 : index
    %5 = vector.load %arg3[%c0_3, %c0_4, %c0_5] : memref<1x1x8xf32, #tpu.memory_space<vmem>>, vector<1x1x8xf32>
    %6 = vector.shape_cast %5 : vector<1x1x8xf32> to vector<1x8xf32>
    %c0_6 = arith.constant 0 : index
    %c0_7 = arith.constant 0 : index
    %c0_8 = arith.constant 0 : index
    %7 = vector.load %arg12[%c0_6, %c0_7, %c0_8] : memref<1x1x8xf32, #tpu.memory_space<vmem>>, vector<1x1x8xf32>
    %8 = vector.shape_cast %7 : vector<1x1x8xf32> to vector<1x8xf32>
    %c0_9 = arith.constant 0 : index
    %c0_10 = arith.constant 0 : index
    %c0_11 = arith.constant 0 : index
    %9 = vector.load %arg13[%c0_9, %c0_10, %c0_11] : memref<1x1x8xf32, #tpu.memory_space<vmem>>, vector<1x1x8xf32>
    %10 = vector.shape_cast %9 : vector<1x1x8xf32> to vector<1x8xf32>
    %c0_12 = arith.constant 0 : index
    %c0_13 = arith.constant 0 : index
    %c0_14 = arith.constant 0 : index
    %11 = vector.load %arg11[%c0_12, %c0_13, %c0_14] : memref<1x1x8xf32, #tpu.memory_space<vmem>>, vector<1x1x8xf32>
    %12 = vector.shape_cast %11 : vector<1x1x8xf32> to vector<1x8xf32>
    %c0_15 = arith.constant 0 : index
    %c0_16 = arith.constant 0 : index
    %c0_17 = arith.constant 0 : index
    %13 = vector.load %arg15[%c0_15, %c0_16, %c0_17] : memref<1x1x32xf32, #tpu.memory_space<vmem>>, vector<1x1x32xf32>
    %14 = vector.shape_cast %13 : vector<1x1x32xf32> to vector<1x32xf32>
    %c0_18 = arith.constant 0 : index
    %c0_19 = arith.constant 0 : index
    %c0_20 = arith.constant 0 : index
    %15 = vector.load %arg17[%c0_18, %c0_19, %c0_20] : memref<1x1x8xf32, #tpu.memory_space<vmem>>, vector<1x1x8xf32>
    %16 = vector.shape_cast %15 : vector<1x1x8xf32> to vector<1x8xf32>
    %c0_21 = arith.constant 0 : index
    %c0_22 = arith.constant 0 : index
    %c0_23 = arith.constant 0 : index
    %17 = vector.load %arg14[%c0_21, %c0_22, %c0_23] : memref<1x8x32xbf16, #tpu.memory_space<vmem>>, vector<1x8x32xbf16>
    %18 = vector.shape_cast %17 : vector<1x8x32xbf16> to vector<8x32xbf16>
    %c0_24 = arith.constant 0 : index
    %c0_25 = arith.constant 0 : index
    %c0_26 = arith.constant 0 : index
    %19 = vector.load %arg16[%c0_24, %c0_25, %c0_26] : memref<1x32x8xbf16, #tpu.memory_space<vmem>>, vector<1x32x8xbf16>
    %20 = vector.shape_cast %19 : vector<1x32x8xbf16> to vector<32x8xbf16>
    %c0_27 = arith.constant 0 : index
    %c0_28 = arith.constant 0 : index
    %c0_29 = arith.constant 0 : index
    %21 = vector.load %arg21[%c0_27, %c0_28, %c0_29] : memref<2x16x8xf32, #tpu.memory_space<vmem>>, vector<1x16x8xf32>
    %22 = vector.shape_cast %21 : vector<1x16x8xf32> to vector<16x8xf32>
    %cst = arith.constant dense<0.000000e+00> : vector<16xf32>
    %23 = vector.multi_reduction <add>, %22, %cst [1] : vector<16x8xf32> to vector<16xf32>
    %24 = vector.shape_cast %23 : vector<16xf32> to vector<16x1xf32>
    %cst_30 = arith.constant 8.000000e+00 : f32
    %25 = vector.broadcast %cst_30 : f32 to vector<16x1xf32>
    %26 = arith.divf %24, %25 : vector<16x1xf32>
    %27 = vector.broadcast %26 : vector<16x1xf32> to vector<16x8xf32>
    %28 = arith.subf %22, %27 : vector<16x8xf32>
    %29 = arith.mulf %28, %28 : vector<16x8xf32>
    %cst_31 = arith.constant dense<0.000000e+00> : vector<16xf32>
    %30 = vector.multi_reduction <add>, %29, %cst_31 [1] : vector<16x8xf32> to vector<16xf32>
    %31 = vector.shape_cast %30 : vector<16xf32> to vector<16x1xf32>
    %cst_32 = arith.constant 8.000000e+00 : f32
    %32 = vector.broadcast %cst_32 : f32 to vector<16x1xf32>
    %33 = arith.divf %31, %32 : vector<16x1xf32>
    %34 = vector.broadcast %26 : vector<16x1xf32> to vector<16x8xf32>
    %35 = arith.subf %22, %34 : vector<16x8xf32>
    %cst_33 = arith.constant 9.99999974E-6 : f32
    %36 = vector.broadcast %cst_33 : f32 to vector<16x1xf32>
    %37 = arith.addf %33, %36 : vector<16x1xf32>
    %38 = math.rsqrt %37 : vector<16x1xf32>
    %39 = vector.broadcast %38 : vector<16x1xf32> to vector<16x8xf32>
    %40 = arith.mulf %35, %39 : vector<16x8xf32>
    %41 = vector.broadcast %4 : vector<1x8xf32> to vector<16x8xf32>
    %42 = arith.mulf %40, %41 : vector<16x8xf32>
    %43 = vector.broadcast %6 : vector<1x8xf32> to vector<16x8xf32>
    %44 = arith.addf %42, %43 : vector<16x8xf32>
    %45 = arith.truncf %44 : vector<16x8xf32> to vector<16x8xbf16>
    %cst_34 = arith.constant 0.000000e+00 : f32
    %46 = vector.broadcast %cst_34 : f32 to vector<16x8xf32>
    %c0_35 = arith.constant 0 : index
    %c0_36 = arith.constant 0 : index
    %c0_37 = arith.constant 0 : index
    %c0_38 = arith.constant 0 : index
    %47 = vector.load %arg4[%c0_35, %c0_36, %c0_37, %c0_38] : memref<1x4x8x2xbf16, #tpu.memory_space<vmem>>, vector<1x1x8x2xbf16>
    %48 = vector.shape_cast %47 : vector<1x1x8x2xbf16> to vector<8x2xbf16>
    %cst_39 = arith.constant dense<0.000000e+00> : vector<16x2xf32>
    %49 = tpu.matmul %45, %48, %cst_39 {dimension_numbers = #tpu.dot_dimension_numbers<[1], [0], [0], [1], [0, 0, 1, 1], [], []>} : vector<16x8xbf16>, vector<8x2xbf16>, vector<16x2xf32> -> vector<16x2xf32>
    %c0_40 = arith.constant 0 : index
    %c0_41 = arith.constant 0 : index
    %c0_42 = arith.constant 0 : index
    %c0_43 = arith.constant 0 : index
    %50 = vector.load %arg5[%c0_40, %c0_41, %c0_42, %c0_43] : memref<1x4x1x2xf32, #tpu.memory_space<vmem>>, vector<1x1x1x2xf32>
    %51 = vector.shape_cast %50 : vector<1x1x1x2xf32> to vector<1x2xf32>
    %52 = vector.broadcast %51 : vector<1x2xf32> to vector<16x2xf32>
    %53 = arith.addf %49, %52 : vector<16x2xf32>
    %c0_44 = arith.constant 0 : index
    %c0_45 = arith.constant 0 : index
    %c0_46 = arith.constant 0 : index
    %c0_47 = arith.constant 0 : index
    %54 = vector.load %arg6[%c0_44, %c0_45, %c0_46, %c0_47] : memref<1x4x8x2xbf16, #tpu.memory_space<vmem>>, vector<1x1x8x2xbf16>
    %55 = vector.shape_cast %54 : vector<1x1x8x2xbf16> to vector<8x2xbf16>
    %cst_48 = arith.constant dense<0.000000e+00> : vector<16x2xf32>
    %56 = tpu.matmul %45, %55, %cst_48 {dimension_numbers = #tpu.dot_dimension_numbers<[1], [0], [0], [1], [0, 0, 1, 1], [], []>} : vector<16x8xbf16>, vector<8x2xbf16>, vector<16x2xf32> -> vector<16x2xf32>
    %c0_49 = arith.constant 0 : index
    %c0_50 = arith.constant 0 : index
    %c0_51 = arith.constant 0 : index
    %c0_52 = arith.constant 0 : index
    %57 = vector.load %arg7[%c0_49, %c0_50, %c0_51, %c0_52] : memref<1x4x1x2xf32, #tpu.memory_space<vmem>>, vector<1x1x1x2xf32>
    %58 = vector.shape_cast %57 : vector<1x1x1x2xf32> to vector<1x2xf32>
    %59 = vector.broadcast %58 : vector<1x2xf32> to vector<16x2xf32>
    %60 = arith.addf %56, %59 : vector<16x2xf32>
    %c0_53 = arith.constant 0 : index
    %c0_54 = arith.constant 0 : index
    %c0_55 = arith.constant 0 : index
    %c0_56 = arith.constant 0 : index
    %61 = vector.load %arg8[%c0_53, %c0_54, %c0_55, %c0_56] : memref<1x4x8x2xbf16, #tpu.memory_space<vmem>>, vector<1x1x8x2xbf16>
    %62 = vector.shape_cast %61 : vector<1x1x8x2xbf16> to vector<8x2xbf16>
    %cst_57 = arith.constant dense<0.000000e+00> : vector<16x2xf32>
    %63 = tpu.matmul %45, %62, %cst_57 {dimension_numbers = #tpu.dot_dimension_numbers<[1], [0], [0], [1], [0, 0, 1, 1], [], []>} : vector<16x8xbf16>, vector<8x2xbf16>, vector<16x2xf32> -> vector<16x2xf32>
    %c0_58 = arith.constant 0 : index
    %c0_59 = arith.constant 0 : index
    %c0_60 = arith.constant 0 : index
    %c0_61 = arith.constant 0 : index
    %64 = vector.load %arg9[%c0_58, %c0_59, %c0_60, %c0_61] : memref<1x4x1x2xf32, #tpu.memory_space<vmem>>, vector<1x1x1x2xf32>
    %65 = vector.shape_cast %64 : vector<1x1x1x2xf32> to vector<1x2xf32>
    %66 = vector.broadcast %65 : vector<1x2xf32> to vector<16x2xf32>
    %67 = arith.addf %63, %66 : vector<16x2xf32>
    %68 = arith.truncf %53 : vector<16x2xf32> to vector<16x2xbf16>
    %69 = arith.truncf %60 : vector<16x2xf32> to vector<16x2xbf16>
    %cst_62 = arith.constant dense<0.000000e+00> : vector<16x16xf32>
    %70 = tpu.matmul %68, %69, %cst_62 {dimension_numbers = #tpu.dot_dimension_numbers<[1], [1], [0], [0], [0, 0, 1, 0], [], []>} : vector<16x2xbf16>, vector<16x2xbf16>, vector<16x16xf32> -> vector<16x16xf32>
    %cst_63 = arith.constant 0.353553385 : f32
    %71 = vector.broadcast %cst_63 : f32 to vector<16x16xf32>
    %72 = arith.mulf %70, %71 : vector<16x16xf32>
    %cst_64 = arith.constant dense<0xFF800000> : vector<16xf32>
    %73 = vector.multi_reduction <maximumf>, %72, %cst_64 [1] : vector<16x16xf32> to vector<16xf32>
    %74 = vector.shape_cast %73 : vector<16xf32> to vector<16x1xf32>
    %75 = vector.broadcast %74 : vector<16x1xf32> to vector<16x16xf32>
    %76 = arith.subf %72, %75 : vector<16x16xf32>
    %77 = math.exp %76 : vector<16x16xf32>
    %cst_65 = arith.constant dense<0.000000e+00> : vector<16xf32>
    %78 = vector.multi_reduction <add>, %77, %cst_65 [1] : vector<16x16xf32> to vector<16xf32>
    %79 = vector.shape_cast %78 : vector<16xf32> to vector<16x1xf32>
    %80 = vector.broadcast %79 : vector<16x1xf32> to vector<16x16xf32>
    %81 = arith.divf %77, %80 : vector<16x16xf32>
    %82 = arith.truncf %81 : vector<16x16xf32> to vector<16x16xbf16>
    %83 = arith.truncf %67 : vector<16x2xf32> to vector<16x2xbf16>
    %cst_66 = arith.constant dense<0.000000e+00> : vector<16x2xf32>
    %84 = tpu.matmul %82, %83, %cst_66 {dimension_numbers = #tpu.dot_dimension_numbers<[1], [0], [0], [1], [0, 0, 1, 1], [], []>} : vector<16x16xbf16>, vector<16x2xbf16>, vector<16x2xf32> -> vector<16x2xf32>
    %85 = arith.truncf %84 : vector<16x2xf32> to vector<16x2xbf16>
    %c0_67 = arith.constant 0 : index
    %c0_68 = arith.constant 0 : index
    %c0_69 = arith.constant 0 : index
    %c0_70 = arith.constant 0 : index
    %86 = vector.load %arg10[%c0_67, %c0_68, %c0_69, %c0_70] : memref<1x4x2x8xbf16, #tpu.memory_space<vmem>>, vector<1x1x2x8xbf16>
    %87 = vector.shape_cast %86 : vector<1x1x2x8xbf16> to vector<2x8xbf16>
    %cst_71 = arith.constant dense<0.000000e+00> : vector<16x8xf32>
    %88 = tpu.matmul %85, %87, %cst_71 {dimension_numbers = #tpu.dot_dimension_numbers<[1], [0], [0], [1], [0, 0, 1, 1], [], []>} : vector<16x2xbf16>, vector<2x8xbf16>, vector<16x8xf32> -> vector<16x8xf32>
    %89 = arith.addf %46, %88 : vector<16x8xf32>
    %c0_72 = arith.constant 0 : index
    %c1 = arith.constant 1 : index
    %c0_73 = arith.constant 0 : index
    %c0_74 = arith.constant 0 : index
    %90 = vector.load %arg4[%c0_72, %c1, %c0_73, %c0_74] : memref<1x4x8x2xbf16, #tpu.memory_space<vmem>>, vector<1x1x8x2xbf16>
    %91 = vector.shape_cast %90 : vector<1x1x8x2xbf16> to vector<8x2xbf16>
    %cst_75 = arith.constant dense<0.000000e+00> : vector<16x2xf32>
    %92 = tpu.matmul %45, %91, %cst_75 {dimension_numbers = #tpu.dot_dimension_numbers<[1], [0], [0], [1], [0, 0, 1, 1], [], []>} : vector<16x8xbf16>, vector<8x2xbf16>, vector<16x2xf32> -> vector<16x2xf32>
    %c0_76 = arith.constant 0 : index
    %c1_77 = arith.constant 1 : index
    %c0_78 = arith.constant 0 : index
    %c0_79 = arith.constant 0 : index
    %93 = vector.load %arg5[%c0_76, %c1_77, %c0_78, %c0_79] : memref<1x4x1x2xf32, #tpu.memory_space<vmem>>, vector<1x1x1x2xf32>
    %94 = vector.shape_cast %93 : vector<1x1x1x2xf32> to vector<1x2xf32>
    %95 = vector.broadcast %94 : vector<1x2xf32> to vector<16x2xf32>
    %96 = arith.addf %92, %95 : vector<16x2xf32>
    %c0_80 = arith.constant 0 : index
    %c1_81 = arith.constant 1 : index
    %c0_82 = arith.constant 0 : index
    %c0_83 = arith.constant 0 : index
    %97 = vector.load %arg6[%c0_80, %c1_81, %c0_82, %c0_83] : memref<1x4x8x2xbf16, #tpu.memory_space<vmem>>, vector<1x1x8x2xbf16>
    %98 = vector.shape_cast %97 : vector<1x1x8x2xbf16> to vector<8x2xbf16>
    %cst_84 = arith.constant dense<0.000000e+00> : vector<16x2xf32>
    %99 = tpu.matmul %45, %98, %cst_84 {dimension_numbers = #tpu.dot_dimension_numbers<[1], [0], [0], [1], [0, 0, 1, 1], [], []>} : vector<16x8xbf16>, vector<8x2xbf16>, vector<16x2xf32> -> vector<16x2xf32>
    %c0_85 = arith.constant 0 : index
    %c1_86 = arith.constant 1 : index
    %c0_87 = arith.constant 0 : index
    %c0_88 = arith.constant 0 : index
    %100 = vector.load %arg7[%c0_85, %c1_86, %c0_87, %c0_88] : memref<1x4x1x2xf32, #tpu.memory_space<vmem>>, vector<1x1x1x2xf32>
    %101 = vector.shape_cast %100 : vector<1x1x1x2xf32> to vector<1x2xf32>
    %102 = vector.broadcast %101 : vector<1x2xf32> to vector<16x2xf32>
    %103 = arith.addf %99, %102 : vector<16x2xf32>
    %c0_89 = arith.constant 0 : index
    %c1_90 = arith.constant 1 : index
    %c0_91 = arith.constant 0 : index
    %c0_92 = arith.constant 0 : index
    %104 = vector.load %arg8[%c0_89, %c1_90, %c0_91, %c0_92] : memref<1x4x8x2xbf16, #tpu.memory_space<vmem>>, vector<1x1x8x2xbf16>
    %105 = vector.shape_cast %104 : vector<1x1x8x2xbf16> to vector<8x2xbf16>
    %cst_93 = arith.constant dense<0.000000e+00> : vector<16x2xf32>
    %106 = tpu.matmul %45, %105, %cst_93 {dimension_numbers = #tpu.dot_dimension_numbers<[1], [0], [0], [1], [0, 0, 1, 1], [], []>} : vector<16x8xbf16>, vector<8x2xbf16>, vector<16x2xf32> -> vector<16x2xf32>
    %c0_94 = arith.constant 0 : index
    %c1_95 = arith.constant 1 : index
    %c0_96 = arith.constant 0 : index
    %c0_97 = arith.constant 0 : index
    %107 = vector.load %arg9[%c0_94, %c1_95, %c0_96, %c0_97] : memref<1x4x1x2xf32, #tpu.memory_space<vmem>>, vector<1x1x1x2xf32>
    %108 = vector.shape_cast %107 : vector<1x1x1x2xf32> to vector<1x2xf32>
    %109 = vector.broadcast %108 : vector<1x2xf32> to vector<16x2xf32>
    %110 = arith.addf %106, %109 : vector<16x2xf32>
    %111 = arith.truncf %96 : vector<16x2xf32> to vector<16x2xbf16>
    %112 = arith.truncf %103 : vector<16x2xf32> to vector<16x2xbf16>
    %cst_98 = arith.constant dense<0.000000e+00> : vector<16x16xf32>
    %113 = tpu.matmul %111, %112, %cst_98 {dimension_numbers = #tpu.dot_dimension_numbers<[1], [1], [0], [0], [0, 0, 1, 0], [], []>} : vector<16x2xbf16>, vector<16x2xbf16>, vector<16x16xf32> -> vector<16x16xf32>
    %cst_99 = arith.constant 0.353553385 : f32
    %114 = vector.broadcast %cst_99 : f32 to vector<16x16xf32>
    %115 = arith.mulf %113, %114 : vector<16x16xf32>
    %cst_100 = arith.constant dense<0xFF800000> : vector<16xf32>
    %116 = vector.multi_reduction <maximumf>, %115, %cst_100 [1] : vector<16x16xf32> to vector<16xf32>
    %117 = vector.shape_cast %116 : vector<16xf32> to vector<16x1xf32>
    %118 = vector.broadcast %117 : vector<16x1xf32> to vector<16x16xf32>
    %119 = arith.subf %115, %118 : vector<16x16xf32>
    %120 = math.exp %119 : vector<16x16xf32>
    %cst_101 = arith.constant dense<0.000000e+00> : vector<16xf32>
    %121 = vector.multi_reduction <add>, %120, %cst_101 [1] : vector<16x16xf32> to vector<16xf32>
    %122 = vector.shape_cast %121 : vector<16xf32> to vector<16x1xf32>
    %123 = vector.broadcast %122 : vector<16x1xf32> to vector<16x16xf32>
    %124 = arith.divf %120, %123 : vector<16x16xf32>
    %125 = arith.truncf %124 : vector<16x16xf32> to vector<16x16xbf16>
    %126 = arith.truncf %110 : vector<16x2xf32> to vector<16x2xbf16>
    %cst_102 = arith.constant dense<0.000000e+00> : vector<16x2xf32>
    %127 = tpu.matmul %125, %126, %cst_102 {dimension_numbers = #tpu.dot_dimension_numbers<[1], [0], [0], [1], [0, 0, 1, 1], [], []>} : vector<16x16xbf16>, vector<16x2xbf16>, vector<16x2xf32> -> vector<16x2xf32>
    %128 = arith.truncf %127 : vector<16x2xf32> to vector<16x2xbf16>
    %c0_103 = arith.constant 0 : index
    %c1_104 = arith.constant 1 : index
    %c0_105 = arith.constant 0 : index
    %c0_106 = arith.constant 0 : index
    %129 = vector.load %arg10[%c0_103, %c1_104, %c0_105, %c0_106] : memref<1x4x2x8xbf16, #tpu.memory_space<vmem>>, vector<1x1x2x8xbf16>
    %130 = vector.shape_cast %129 : vector<1x1x2x8xbf16> to vector<2x8xbf16>
    %cst_107 = arith.constant dense<0.000000e+00> : vector<16x8xf32>
    %131 = tpu.matmul %128, %130, %cst_107 {dimension_numbers = #tpu.dot_dimension_numbers<[1], [0], [0], [1], [0, 0, 1, 1], [], []>} : vector<16x2xbf16>, vector<2x8xbf16>, vector<16x8xf32> -> vector<16x8xf32>
    %132 = arith.addf %89, %131 : vector<16x8xf32>
    %c0_108 = arith.constant 0 : index
    %c2 = arith.constant 2 : index
    %c0_109 = arith.constant 0 : index
    %c0_110 = arith.constant 0 : index
    %133 = vector.load %arg4[%c0_108, %c2, %c0_109, %c0_110] : memref<1x4x8x2xbf16, #tpu.memory_space<vmem>>, vector<1x1x8x2xbf16>
    %134 = vector.shape_cast %133 : vector<1x1x8x2xbf16> to vector<8x2xbf16>
    %cst_111 = arith.constant dense<0.000000e+00> : vector<16x2xf32>
    %135 = tpu.matmul %45, %134, %cst_111 {dimension_numbers = #tpu.dot_dimension_numbers<[1], [0], [0], [1], [0, 0, 1, 1], [], []>} : vector<16x8xbf16>, vector<8x2xbf16>, vector<16x2xf32> -> vector<16x2xf32>
    %c0_112 = arith.constant 0 : index
    %c2_113 = arith.constant 2 : index
    %c0_114 = arith.constant 0 : index
    %c0_115 = arith.constant 0 : index
    %136 = vector.load %arg5[%c0_112, %c2_113, %c0_114, %c0_115] : memref<1x4x1x2xf32, #tpu.memory_space<vmem>>, vector<1x1x1x2xf32>
    %137 = vector.shape_cast %136 : vector<1x1x1x2xf32> to vector<1x2xf32>
    %138 = vector.broadcast %137 : vector<1x2xf32> to vector<16x2xf32>
    %139 = arith.addf %135, %138 : vector<16x2xf32>
    %c0_116 = arith.constant 0 : index
    %c2_117 = arith.constant 2 : index
    %c0_118 = arith.constant 0 : index
    %c0_119 = arith.constant 0 : index
    %140 = vector.load %arg6[%c0_116, %c2_117, %c0_118, %c0_119] : memref<1x4x8x2xbf16, #tpu.memory_space<vmem>>, vector<1x1x8x2xbf16>
    %141 = vector.shape_cast %140 : vector<1x1x8x2xbf16> to vector<8x2xbf16>
    %cst_120 = arith.constant dense<0.000000e+00> : vector<16x2xf32>
    %142 = tpu.matmul %45, %141, %cst_120 {dimension_numbers = #tpu.dot_dimension_numbers<[1], [0], [0], [1], [0, 0, 1, 1], [], []>} : vector<16x8xbf16>, vector<8x2xbf16>, vector<16x2xf32> -> vector<16x2xf32>
    %c0_121 = arith.constant 0 : index
    %c2_122 = arith.constant 2 : index
    %c0_123 = arith.constant 0 : index
    %c0_124 = arith.constant 0 : index
    %143 = vector.load %arg7[%c0_121, %c2_122, %c0_123, %c0_124] : memref<1x4x1x2xf32, #tpu.memory_space<vmem>>, vector<1x1x1x2xf32>
    %144 = vector.shape_cast %143 : vector<1x1x1x2xf32> to vector<1x2xf32>
    %145 = vector.broadcast %144 : vector<1x2xf32> to vector<16x2xf32>
    %146 = arith.addf %142, %145 : vector<16x2xf32>
    %c0_125 = arith.constant 0 : index
    %c2_126 = arith.constant 2 : index
    %c0_127 = arith.constant 0 : index
    %c0_128 = arith.constant 0 : index
    %147 = vector.load %arg8[%c0_125, %c2_126, %c0_127, %c0_128] : memref<1x4x8x2xbf16, #tpu.memory_space<vmem>>, vector<1x1x8x2xbf16>
    %148 = vector.shape_cast %147 : vector<1x1x8x2xbf16> to vector<8x2xbf16>
    %cst_129 = arith.constant dense<0.000000e+00> : vector<16x2xf32>
    %149 = tpu.matmul %45, %148, %cst_129 {dimension_numbers = #tpu.dot_dimension_numbers<[1], [0], [0], [1], [0, 0, 1, 1], [], []>} : vector<16x8xbf16>, vector<8x2xbf16>, vector<16x2xf32> -> vector<16x2xf32>
    %c0_130 = arith.constant 0 : index
    %c2_131 = arith.constant 2 : index
    %c0_132 = arith.constant 0 : index
    %c0_133 = arith.constant 0 : index
    %150 = vector.load %arg9[%c0_130, %c2_131, %c0_132, %c0_133] : memref<1x4x1x2xf32, #tpu.memory_space<vmem>>, vector<1x1x1x2xf32>
    %151 = vector.shape_cast %150 : vector<1x1x1x2xf32> to vector<1x2xf32>
    %152 = vector.broadcast %151 : vector<1x2xf32> to vector<16x2xf32>
    %153 = arith.addf %149, %152 : vector<16x2xf32>
    %154 = arith.truncf %139 : vector<16x2xf32> to vector<16x2xbf16>
    %155 = arith.truncf %146 : vector<16x2xf32> to vector<16x2xbf16>
    %cst_134 = arith.constant dense<0.000000e+00> : vector<16x16xf32>
    %156 = tpu.matmul %154, %155, %cst_134 {dimension_numbers = #tpu.dot_dimension_numbers<[1], [1], [0], [0], [0, 0, 1, 0], [], []>} : vector<16x2xbf16>, vector<16x2xbf16>, vector<16x16xf32> -> vector<16x16xf32>
    %cst_135 = arith.constant 0.353553385 : f32
    %157 = vector.broadcast %cst_135 : f32 to vector<16x16xf32>
    %158 = arith.mulf %156, %157 : vector<16x16xf32>
    %cst_136 = arith.constant dense<0xFF800000> : vector<16xf32>
    %159 = vector.multi_reduction <maximumf>, %158, %cst_136 [1] : vector<16x16xf32> to vector<16xf32>
    %160 = vector.shape_cast %159 : vector<16xf32> to vector<16x1xf32>
    %161 = vector.broadcast %160 : vector<16x1xf32> to vector<16x16xf32>
    %162 = arith.subf %158, %161 : vector<16x16xf32>
    %163 = math.exp %162 : vector<16x16xf32>
    %cst_137 = arith.constant dense<0.000000e+00> : vector<16xf32>
    %164 = vector.multi_reduction <add>, %163, %cst_137 [1] : vector<16x16xf32> to vector<16xf32>
    %165 = vector.shape_cast %164 : vector<16xf32> to vector<16x1xf32>
    %166 = vector.broadcast %165 : vector<16x1xf32> to vector<16x16xf32>
    %167 = arith.divf %163, %166 : vector<16x16xf32>
    %168 = arith.truncf %167 : vector<16x16xf32> to vector<16x16xbf16>
    %169 = arith.truncf %153 : vector<16x2xf32> to vector<16x2xbf16>
    %cst_138 = arith.constant dense<0.000000e+00> : vector<16x2xf32>
    %170 = tpu.matmul %168, %169, %cst_138 {dimension_numbers = #tpu.dot_dimension_numbers<[1], [0], [0], [1], [0, 0, 1, 1], [], []>} : vector<16x16xbf16>, vector<16x2xbf16>, vector<16x2xf32> -> vector<16x2xf32>
    %171 = arith.truncf %170 : vector<16x2xf32> to vector<16x2xbf16>
    %c0_139 = arith.constant 0 : index
    %c2_140 = arith.constant 2 : index
    %c0_141 = arith.constant 0 : index
    %c0_142 = arith.constant 0 : index
    %172 = vector.load %arg10[%c0_139, %c2_140, %c0_141, %c0_142] : memref<1x4x2x8xbf16, #tpu.memory_space<vmem>>, vector<1x1x2x8xbf16>
    %173 = vector.shape_cast %172 : vector<1x1x2x8xbf16> to vector<2x8xbf16>
    %cst_143 = arith.constant dense<0.000000e+00> : vector<16x8xf32>
    %174 = tpu.matmul %171, %173, %cst_143 {dimension_numbers = #tpu.dot_dimension_numbers<[1], [0], [0], [1], [0, 0, 1, 1], [], []>} : vector<16x2xbf16>, vector<2x8xbf16>, vector<16x8xf32> -> vector<16x8xf32>
    %175 = arith.addf %132, %174 : vector<16x8xf32>
    %c0_144 = arith.constant 0 : index
    %c3 = arith.constant 3 : index
    %c0_145 = arith.constant 0 : index
    %c0_146 = arith.constant 0 : index
    %176 = vector.load %arg4[%c0_144, %c3, %c0_145, %c0_146] : memref<1x4x8x2xbf16, #tpu.memory_space<vmem>>, vector<1x1x8x2xbf16>
    %177 = vector.shape_cast %176 : vector<1x1x8x2xbf16> to vector<8x2xbf16>
    %cst_147 = arith.constant dense<0.000000e+00> : vector<16x2xf32>
    %178 = tpu.matmul %45, %177, %cst_147 {dimension_numbers = #tpu.dot_dimension_numbers<[1], [0], [0], [1], [0, 0, 1, 1], [], []>} : vector<16x8xbf16>, vector<8x2xbf16>, vector<16x2xf32> -> vector<16x2xf32>
    %c0_148 = arith.constant 0 : index
    %c3_149 = arith.constant 3 : index
    %c0_150 = arith.constant 0 : index
    %c0_151 = arith.constant 0 : index
    %179 = vector.load %arg5[%c0_148, %c3_149, %c0_150, %c0_151] : memref<1x4x1x2xf32, #tpu.memory_space<vmem>>, vector<1x1x1x2xf32>
    %180 = vector.shape_cast %179 : vector<1x1x1x2xf32> to vector<1x2xf32>
    %181 = vector.broadcast %180 : vector<1x2xf32> to vector<16x2xf32>
    %182 = arith.addf %178, %181 : vector<16x2xf32>
    %c0_152 = arith.constant 0 : index
    %c3_153 = arith.constant 3 : index
    %c0_154 = arith.constant 0 : index
    %c0_155 = arith.constant 0 : index
    %183 = vector.load %arg6[%c0_152, %c3_153, %c0_154, %c0_155] : memref<1x4x8x2xbf16, #tpu.memory_space<vmem>>, vector<1x1x8x2xbf16>
    %184 = vector.shape_cast %183 : vector<1x1x8x2xbf16> to vector<8x2xbf16>
    %cst_156 = arith.constant dense<0.000000e+00> : vector<16x2xf32>
    %185 = tpu.matmul %45, %184, %cst_156 {dimension_numbers = #tpu.dot_dimension_numbers<[1], [0], [0], [1], [0, 0, 1, 1], [], []>} : vector<16x8xbf16>, vector<8x2xbf16>, vector<16x2xf32> -> vector<16x2xf32>
    %c0_157 = arith.constant 0 : index
    %c3_158 = arith.constant 3 : index
    %c0_159 = arith.constant 0 : index
    %c0_160 = arith.constant 0 : index
    %186 = vector.load %arg7[%c0_157, %c3_158, %c0_159, %c0_160] : memref<1x4x1x2xf32, #tpu.memory_space<vmem>>, vector<1x1x1x2xf32>
    %187 = vector.shape_cast %186 : vector<1x1x1x2xf32> to vector<1x2xf32>
    %188 = vector.broadcast %187 : vector<1x2xf32> to vector<16x2xf32>
    %189 = arith.addf %185, %188 : vector<16x2xf32>
    %c0_161 = arith.constant 0 : index
    %c3_162 = arith.constant 3 : index
    %c0_163 = arith.constant 0 : index
    %c0_164 = arith.constant 0 : index
    %190 = vector.load %arg8[%c0_161, %c3_162, %c0_163, %c0_164] : memref<1x4x8x2xbf16, #tpu.memory_space<vmem>>, vector<1x1x8x2xbf16>
    %191 = vector.shape_cast %190 : vector<1x1x8x2xbf16> to vector<8x2xbf16>
    %cst_165 = arith.constant dense<0.000000e+00> : vector<16x2xf32>
    %192 = tpu.matmul %45, %191, %cst_165 {dimension_numbers = #tpu.dot_dimension_numbers<[1], [0], [0], [1], [0, 0, 1, 1], [], []>} : vector<16x8xbf16>, vector<8x2xbf16>, vector<16x2xf32> -> vector<16x2xf32>
    %c0_166 = arith.constant 0 : index
    %c3_167 = arith.constant 3 : index
    %c0_168 = arith.constant 0 : index
    %c0_169 = arith.constant 0 : index
    %193 = vector.load %arg9[%c0_166, %c3_167, %c0_168, %c0_169] : memref<1x4x1x2xf32, #tpu.memory_space<vmem>>, vector<1x1x1x2xf32>
    %194 = vector.shape_cast %193 : vector<1x1x1x2xf32> to vector<1x2xf32>
    %195 = vector.broadcast %194 : vector<1x2xf32> to vector<16x2xf32>
    %196 = arith.addf %192, %195 : vector<16x2xf32>
    %197 = arith.truncf %182 : vector<16x2xf32> to vector<16x2xbf16>
    %198 = arith.truncf %189 : vector<16x2xf32> to vector<16x2xbf16>
    %cst_170 = arith.constant dense<0.000000e+00> : vector<16x16xf32>
    %199 = tpu.matmul %197, %198, %cst_170 {dimension_numbers = #tpu.dot_dimension_numbers<[1], [1], [0], [0], [0, 0, 1, 0], [], []>} : vector<16x2xbf16>, vector<16x2xbf16>, vector<16x16xf32> -> vector<16x16xf32>
    %cst_171 = arith.constant 0.353553385 : f32
    %200 = vector.broadcast %cst_171 : f32 to vector<16x16xf32>
    %201 = arith.mulf %199, %200 : vector<16x16xf32>
    %cst_172 = arith.constant dense<0xFF800000> : vector<16xf32>
    %202 = vector.multi_reduction <maximumf>, %201, %cst_172 [1] : vector<16x16xf32> to vector<16xf32>
    %203 = vector.shape_cast %202 : vector<16xf32> to vector<16x1xf32>
    %204 = vector.broadcast %203 : vector<16x1xf32> to vector<16x16xf32>
    %205 = arith.subf %201, %204 : vector<16x16xf32>
    %206 = math.exp %205 : vector<16x16xf32>
    %cst_173 = arith.constant dense<0.000000e+00> : vector<16xf32>
    %207 = vector.multi_reduction <add>, %206, %cst_173 [1] : vector<16x16xf32> to vector<16xf32>
    %208 = vector.shape_cast %207 : vector<16xf32> to vector<16x1xf32>
    %209 = vector.broadcast %208 : vector<16x1xf32> to vector<16x16xf32>
    %210 = arith.divf %206, %209 : vector<16x16xf32>
    %211 = arith.truncf %210 : vector<16x16xf32> to vector<16x16xbf16>
    %212 = arith.truncf %196 : vector<16x2xf32> to vector<16x2xbf16>
    %cst_174 = arith.constant dense<0.000000e+00> : vector<16x2xf32>
    %213 = tpu.matmul %211, %212, %cst_174 {dimension_numbers = #tpu.dot_dimension_numbers<[1], [0], [0], [1], [0, 0, 1, 1], [], []>} : vector<16x16xbf16>, vector<16x2xbf16>, vector<16x2xf32> -> vector<16x2xf32>
    %214 = arith.truncf %213 : vector<16x2xf32> to vector<16x2xbf16>
    %c0_175 = arith.constant 0 : index
    %c3_176 = arith.constant 3 : index
    %c0_177 = arith.constant 0 : index
    %c0_178 = arith.constant 0 : index
    %215 = vector.load %arg10[%c0_175, %c3_176, %c0_177, %c0_178] : memref<1x4x2x8xbf16, #tpu.memory_space<vmem>>, vector<1x1x2x8xbf16>
    %216 = vector.shape_cast %215 : vector<1x1x2x8xbf16> to vector<2x8xbf16>
    %cst_179 = arith.constant dense<0.000000e+00> : vector<16x8xf32>
    %217 = tpu.matmul %214, %216, %cst_179 {dimension_numbers = #tpu.dot_dimension_numbers<[1], [0], [0], [1], [0, 0, 1, 1], [], []>} : vector<16x2xbf16>, vector<2x8xbf16>, vector<16x8xf32> -> vector<16x8xf32>
    %218 = arith.addf %175, %217 : vector<16x8xf32>
    %219 = arith.addf %22, %218 : vector<16x8xf32>
    %220 = vector.broadcast %12 : vector<1x8xf32> to vector<16x8xf32>
    %221 = arith.addf %219, %220 : vector<16x8xf32>
    %cst_180 = arith.constant dense<0.000000e+00> : vector<16xf32>
    %222 = vector.multi_reduction <add>, %221, %cst_180 [1] : vector<16x8xf32> to vector<16xf32>
    %223 = vector.shape_cast %222 : vector<16xf32> to vector<16x1xf32>
    %cst_181 = arith.constant 8.000000e+00 : f32
    %224 = vector.broadcast %cst_181 : f32 to vector<16x1xf32>
    %225 = arith.divf %223, %224 : vector<16x1xf32>
    %226 = vector.broadcast %225 : vector<16x1xf32> to vector<16x8xf32>
    %227 = arith.subf %221, %226 : vector<16x8xf32>
    %228 = arith.mulf %227, %227 : vector<16x8xf32>
    %cst_182 = arith.constant dense<0.000000e+00> : vector<16xf32>
    %229 = vector.multi_reduction <add>, %228, %cst_182 [1] : vector<16x8xf32> to vector<16xf32>
    %230 = vector.shape_cast %229 : vector<16xf32> to vector<16x1xf32>
    %cst_183 = arith.constant 8.000000e+00 : f32
    %231 = vector.broadcast %cst_183 : f32 to vector<16x1xf32>
    %232 = arith.divf %230, %231 : vector<16x1xf32>
    %233 = vector.broadcast %225 : vector<16x1xf32> to vector<16x8xf32>
    %234 = arith.subf %221, %233 : vector<16x8xf32>
    %cst_184 = arith.constant 9.99999974E-6 : f32
    %235 = vector.broadcast %cst_184 : f32 to vector<16x1xf32>
    %236 = arith.addf %232, %235 : vector<16x1xf32>
    %237 = math.rsqrt %236 : vector<16x1xf32>
    %238 = vector.broadcast %237 : vector<16x1xf32> to vector<16x8xf32>
    %239 = arith.mulf %234, %238 : vector<16x8xf32>
    %240 = vector.broadcast %8 : vector<1x8xf32> to vector<16x8xf32>
    %241 = arith.mulf %239, %240 : vector<16x8xf32>
    %242 = vector.broadcast %10 : vector<1x8xf32> to vector<16x8xf32>
    %243 = arith.addf %241, %242 : vector<16x8xf32>
    %244 = arith.truncf %243 : vector<16x8xf32> to vector<16x8xbf16>
    %cst_185 = arith.constant dense<0.000000e+00> : vector<16x32xf32>
    %245 = tpu.matmul %244, %18, %cst_185 {dimension_numbers = #tpu.dot_dimension_numbers<[1], [0], [0], [1], [0, 0, 1, 1], [], []>} : vector<16x8xbf16>, vector<8x32xbf16>, vector<16x32xf32> -> vector<16x32xf32>
    %246 = vector.broadcast %14 : vector<1x32xf32> to vector<16x32xf32>
    %247 = arith.addf %245, %246 : vector<16x32xf32>
    %248 = arith.mulf %247, %247 : vector<16x32xf32>
    %249 = arith.mulf %247, %248 : vector<16x32xf32>
    %cst_186 = arith.constant 4.471500e-02 : f32
    %250 = vector.broadcast %cst_186 : f32 to vector<16x32xf32>
    %251 = arith.mulf %250, %249 : vector<16x32xf32>
    %252 = arith.addf %247, %251 : vector<16x32xf32>
    %cst_187 = arith.constant 0.797884583 : f32
    %253 = vector.broadcast %cst_187 : f32 to vector<16x32xf32>
    %254 = arith.mulf %253, %252 : vector<16x32xf32>
    %255 = math.tanh %254 : vector<16x32xf32>
    %cst_188 = arith.constant 1.000000e+00 : f32
    %256 = vector.broadcast %cst_188 : f32 to vector<16x32xf32>
    %257 = arith.addf %256, %255 : vector<16x32xf32>
    %cst_189 = arith.constant 5.000000e-01 : f32
    %258 = vector.broadcast %cst_189 : f32 to vector<16x32xf32>
    %259 = arith.mulf %258, %257 : vector<16x32xf32>
    %260 = arith.mulf %247, %259 : vector<16x32xf32>
    %261 = arith.truncf %260 : vector<16x32xf32> to vector<16x32xbf16>
    %cst_190 = arith.constant dense<0.000000e+00> : vector<16x8xf32>
    %262 = tpu.matmul %261, %20, %cst_190 {dimension_numbers = #tpu.dot_dimension_numbers<[1], [0], [0], [1], [0, 0, 1, 1], [], []>} : vector<16x32xbf16>, vector<32x8xbf16>, vector<16x8xf32> -> vector<16x8xf32>
    %263 = vector.broadcast %16 : vector<1x8xf32> to vector<16x8xf32>
    %264 = arith.addf %262, %263 : vector<16x8xf32>
    %265 = arith.addf %221, %264 : vector<16x8xf32>
    %c0_191 = arith.constant 0 : index
    %c0_192 = arith.constant 0 : index
    %c0_193 = arith.constant 0 : index
    %266 = vector.load %arg21[%c0_191, %c0_192, %c0_193] : memref<2x16x8xf32, #tpu.memory_space<vmem>>, vector<1x16x8xf32>
    %267 = vector.shape_cast %266 : vector<1x16x8xf32> to vector<16x8xf32>
    %268 = vector.shape_cast %265 : vector<16x8xf32> to vector<1x16x8xf32>
    tpu.vector_store %arg21[%c0_191, %c0_192, %c0_193], %268 {strides = array<i32>} : memref<2x16x8xf32, #tpu.memory_space<vmem>>, vector<1x16x8xf32>,
    %c1_194 = arith.constant 1 : index
    %c0_195 = arith.constant 0 : index
    %c0_196 = arith.constant 0 : index
    %269 = vector.load %arg21[%c1_194, %c0_195, %c0_196] : memref<2x16x8xf32, #tpu.memory_space<vmem>>, vector<1x16x8xf32>
    %270 = vector.shape_cast %269 : vector<1x16x8xf32> to vector<16x8xf32>
    %cst_197 = arith.constant dense<0.000000e+00> : vector<16xf32>
    %271 = vector.multi_reduction <add>, %270, %cst_197 [1] : vector<16x8xf32> to vector<16xf32>
    %272 = vector.shape_cast %271 : vector<16xf32> to vector<16x1xf32>
    %cst_198 = arith.constant 8.000000e+00 : f32
    %273 = vector.broadcast %cst_198 : f32 to vector<16x1xf32>
    %274 = arith.divf %272, %273 : vector<16x1xf32>
    %275 = vector.broadcast %274 : vector<16x1xf32> to vector<16x8xf32>
    %276 = arith.subf %270, %275 : vector<16x8xf32>
    %277 = arith.mulf %276, %276 : vector<16x8xf32>
    %cst_199 = arith.constant dense<0.000000e+00> : vector<16xf32>
    %278 = vector.multi_reduction <add>, %277, %cst_199 [1] : vector<16x8xf32> to vector<16xf32>
    %279 = vector.shape_cast %278 : vector<16xf32> to vector<16x1xf32>
    %cst_200 = arith.constant 8.000000e+00 : f32
    %280 = vector.broadcast %cst_200 : f32 to vector<16x1xf32>
    %281 = arith.divf %279, %280 : vector<16x1xf32>
    %282 = vector.broadcast %274 : vector<16x1xf32> to vector<16x8xf32>
    %283 = arith.subf %270, %282 : vector<16x8xf32>
    %cst_201 = arith.constant 9.99999974E-6 : f32
    %284 = vector.broadcast %cst_201 : f32 to vector<16x1xf32>
    %285 = arith.addf %281, %284 : vector<16x1xf32>
    %286 = math.rsqrt %285 : vector<16x1xf32>
    %287 = vector.broadcast %286 : vector<16x1xf32> to vector<16x8xf32>
    %288 = arith.mulf %283, %287 : vector<16x8xf32>
    %289 = vector.broadcast %4 : vector<1x8xf32> to vector<16x8xf32>
    %290 = arith.mulf %288, %289 : vector<16x8xf32>
    %291 = vector.broadcast %6 : vector<1x8xf32> to vector<16x8xf32>
    %292 = arith.addf %290, %291 : vector<16x8xf32>
    %293 = arith.truncf %292 : vector<16x8xf32> to vector<16x8xbf16>
    %cst_202 = arith.constant 0.000000e+00 : f32
    %294 = vector.broadcast %cst_202 : f32 to vector<16x8xf32>
    %c0_203 = arith.constant 0 : index
    %c0_204 = arith.constant 0 : index
    %c0_205 = arith.constant 0 : index
    %c0_206 = arith.constant 0 : index
    %295 = vector.load %arg4[%c0_203, %c0_204, %c0_205, %c0_206] : memref<1x4x8x2xbf16, #tpu.memory_space<vmem>>, vector<1x1x8x2xbf16>
    %296 = vector.shape_cast %295 : vector<1x1x8x2xbf16> to vector<8x2xbf16>
    %cst_207 = arith.constant dense<0.000000e+00> : vector<16x2xf32>
    %297 = tpu.matmul %293, %296, %cst_207 {dimension_numbers = #tpu.dot_dimension_numbers<[1], [0], [0], [1], [0, 0, 1, 1], [], []>} : vector<16x8xbf16>, vector<8x2xbf16>, vector<16x2xf32> -> vector<16x2xf32>
    %c0_208 = arith.constant 0 : index
    %c0_209 = arith.constant 0 : index
    %c0_210 = arith.constant 0 : index
    %c0_211 = arith.constant 0 : index
    %298 = vector.load %arg5[%c0_208, %c0_209, %c0_210, %c0_211] : memref<1x4x1x2xf32, #tpu.memory_space<vmem>>, vector<1x1x1x2xf32>
    %299 = vector.shape_cast %298 : vector<1x1x1x2xf32> to vector<1x2xf32>
    %300 = vector.broadcast %299 : vector<1x2xf32> to vector<16x2xf32>
    %301 = arith.addf %297, %300 : vector<16x2xf32>
    %c0_212 = arith.constant 0 : index
    %c0_213 = arith.constant 0 : index
    %c0_214 = arith.constant 0 : index
    %c0_215 = arith.constant 0 : index
    %302 = vector.load %arg6[%c0_212, %c0_213, %c0_214, %c0_215] : memref<1x4x8x2xbf16, #tpu.memory_space<vmem>>, vector<1x1x8x2xbf16>
    %303 = vector.shape_cast %302 : vector<1x1x8x2xbf16> to vector<8x2xbf16>
    %cst_216 = arith.constant dense<0.000000e+00> : vector<16x2xf32>
    %304 = tpu.matmul %293, %303, %cst_216 {dimension_numbers = #tpu.dot_dimension_numbers<[1], [0], [0], [1], [0, 0, 1, 1], [], []>} : vector<16x8xbf16>, vector<8x2xbf16>, vector<16x2xf32> -> vector<16x2xf32>
    %c0_217 = arith.constant 0 : index
    %c0_218 = arith.constant 0 : index
    %c0_219 = arith.constant 0 : index
    %c0_220 = arith.constant 0 : index
    %305 = vector.load %arg7[%c0_217, %c0_218, %c0_219, %c0_220] : memref<1x4x1x2xf32, #tpu.memory_space<vmem>>, vector<1x1x1x2xf32>
    %306 = vector.shape_cast %305 : vector<1x1x1x2xf32> to vector<1x2xf32>
    %307 = vector.broadcast %306 : vector<1x2xf32> to vector<16x2xf32>
    %308 = arith.addf %304, %307 : vector<16x2xf32>
    %c0_221 = arith.constant 0 : index
    %c0_222 = arith.constant 0 : index
    %c0_223 = arith.constant 0 : index
    %c0_224 = arith.constant 0 : index
    %309 = vector.load %arg8[%c0_221, %c0_222, %c0_223, %c0_224] : memref<1x4x8x2xbf16, #tpu.memory_space<vmem>>, vector<1x1x8x2xbf16>
    %310 = vector.shape_cast %309 : vector<1x1x8x2xbf16> to vector<8x2xbf16>
    %cst_225 = arith.constant dense<0.000000e+00> : vector<16x2xf32>
    %311 = tpu.matmul %293, %310, %cst_225 {dimension_numbers = #tpu.dot_dimension_numbers<[1], [0], [0], [1], [0, 0, 1, 1], [], []>} : vector<16x8xbf16>, vector<8x2xbf16>, vector<16x2xf32> -> vector<16x2xf32>
    %c0_226 = arith.constant 0 : index
    %c0_227 = arith.constant 0 : index
    %c0_228 = arith.constant 0 : index
    %c0_229 = arith.constant 0 : index
    %312 = vector.load %arg9[%c0_226, %c0_227, %c0_228, %c0_229] : memref<1x4x1x2xf32, #tpu.memory_space<vmem>>, vector<1x1x1x2xf32>
    %313 = vector.shape_cast %312 : vector<1x1x1x2xf32> to vector<1x2xf32>
    %314 = vector.broadcast %313 : vector<1x2xf32> to vector<16x2xf32>
    %315 = arith.addf %311, %314 : vector<16x2xf32>
    %316 = arith.truncf %301 : vector<16x2xf32> to vector<16x2xbf16>
    %317 = arith.truncf %308 : vector<16x2xf32> to vector<16x2xbf16>
    %cst_230 = arith.constant dense<0.000000e+00> : vector<16x16xf32>
    %318 = tpu.matmul %316, %317, %cst_230 {dimension_numbers = #tpu.dot_dimension_numbers<[1], [1], [0], [0], [0, 0, 1, 0], [], []>} : vector<16x2xbf16>, vector<16x2xbf16>, vector<16x16xf32> -> vector<16x16xf32>
    %cst_231 = arith.constant 0.353553385 : f32
    %319 = vector.broadcast %cst_231 : f32 to vector<16x16xf32>
    %320 = arith.mulf %318, %319 : vector<16x16xf32>
    %cst_232 = arith.constant dense<0xFF800000> : vector<16xf32>
    %321 = vector.multi_reduction <maximumf>, %320, %cst_232 [1] : vector<16x16xf32> to vector<16xf32>
    %322 = vector.shape_cast %321 : vector<16xf32> to vector<16x1xf32>
    %323 = vector.broadcast %322 : vector<16x1xf32> to vector<16x16xf32>
    %324 = arith.subf %320, %323 : vector<16x16xf32>
    %325 = math.exp %324 : vector<16x16xf32>
    %cst_233 = arith.constant dense<0.000000e+00> : vector<16xf32>
    %326 = vector.multi_reduction <add>, %325, %cst_233 [1] : vector<16x16xf32> to vector<16xf32>
    %327 = vector.shape_cast %326 : vector<16xf32> to vector<16x1xf32>
    %328 = vector.broadcast %327 : vector<16x1xf32> to vector<16x16xf32>
    %329 = arith.divf %325, %328 : vector<16x16xf32>
    %330 = arith.truncf %329 : vector<16x16xf32> to vector<16x16xbf16>
    %331 = arith.truncf %315 : vector<16x2xf32> to vector<16x2xbf16>
    %cst_234 = arith.constant dense<0.000000e+00> : vector<16x2xf32>
    %332 = tpu.matmul %330, %331, %cst_234 {dimension_numbers = #tpu.dot_dimension_numbers<[1], [0], [0], [1], [0, 0, 1, 1], [], []>} : vector<16x16xbf16>, vector<16x2xbf16>, vector<16x2xf32> -> vector<16x2xf32>
    %333 = arith.truncf %332 : vector<16x2xf32> to vector<16x2xbf16>
    %c0_235 = arith.constant 0 : index
    %c0_236 = arith.constant 0 : index
    %c0_237 = arith.constant 0 : index
    %c0_238 = arith.constant 0 : index
    %334 = vector.load %arg10[%c0_235, %c0_236, %c0_237, %c0_238] : memref<1x4x2x8xbf16, #tpu.memory_space<vmem>>, vector<1x1x2x8xbf16>
    %335 = vector.shape_cast %334 : vector<1x1x2x8xbf16> to vector<2x8xbf16>
    %cst_239 = arith.constant dense<0.000000e+00> : vector<16x8xf32>
    %336 = tpu.matmul %333, %335, %cst_239 {dimension_numbers = #tpu.dot_dimension_numbers<[1], [0], [0], [1], [0, 0, 1, 1], [], []>} : vector<16x2xbf16>, vector<2x8xbf16>, vector<16x8xf32> -> vector<16x8xf32>
    %337 = arith.addf %294, %336 : vector<16x8xf32>
    %c0_240 = arith.constant 0 : index
    %c1_241 = arith.constant 1 : index
    %c0_242 = arith.constant 0 : index
    %c0_243 = arith.constant 0 : index
    %338 = vector.load %arg4[%c0_240, %c1_241, %c0_242, %c0_243] : memref<1x4x8x2xbf16, #tpu.memory_space<vmem>>, vector<1x1x8x2xbf16>
    %339 = vector.shape_cast %338 : vector<1x1x8x2xbf16> to vector<8x2xbf16>
    %cst_244 = arith.constant dense<0.000000e+00> : vector<16x2xf32>
    %340 = tpu.matmul %293, %339, %cst_244 {dimension_numbers = #tpu.dot_dimension_numbers<[1], [0], [0], [1], [0, 0, 1, 1], [], []>} : vector<16x8xbf16>, vector<8x2xbf16>, vector<16x2xf32> -> vector<16x2xf32>
    %c0_245 = arith.constant 0 : index
    %c1_246 = arith.constant 1 : index
    %c0_247 = arith.constant 0 : index
    %c0_248 = arith.constant 0 : index
    %341 = vector.load %arg5[%c0_245, %c1_246, %c0_247, %c0_248] : memref<1x4x1x2xf32, #tpu.memory_space<vmem>>, vector<1x1x1x2xf32>
    %342 = vector.shape_cast %341 : vector<1x1x1x2xf32> to vector<1x2xf32>
    %343 = vector.broadcast %342 : vector<1x2xf32> to vector<16x2xf32>
    %344 = arith.addf %340, %343 : vector<16x2xf32>
    %c0_249 = arith.constant 0 : index
    %c1_250 = arith.constant 1 : index
    %c0_251 = arith.constant 0 : index
    %c0_252 = arith.constant 0 : index
    %345 = vector.load %arg6[%c0_249, %c1_250, %c0_251, %c0_252] : memref<1x4x8x2xbf16, #tpu.memory_space<vmem>>, vector<1x1x8x2xbf16>
    %346 = vector.shape_cast %345 : vector<1x1x8x2xbf16> to vector<8x2xbf16>
    %cst_253 = arith.constant dense<0.000000e+00> : vector<16x2xf32>
    %347 = tpu.matmul %293, %346, %cst_253 {dimension_numbers = #tpu.dot_dimension_numbers<[1], [0], [0], [1], [0, 0, 1, 1], [], []>} : vector<16x8xbf16>, vector<8x2xbf16>, vector<16x2xf32> -> vector<16x2xf32>
    %c0_254 = arith.constant 0 : index
    %c1_255 = arith.constant 1 : index
    %c0_256 = arith.constant 0 : index
    %c0_257 = arith.constant 0 : index
    %348 = vector.load %arg7[%c0_254, %c1_255, %c0_256, %c0_257] : memref<1x4x1x2xf32, #tpu.memory_space<vmem>>, vector<1x1x1x2xf32>
    %349 = vector.shape_cast %348 : vector<1x1x1x2xf32> to vector<1x2xf32>
    %350 = vector.broadcast %349 : vector<1x2xf32> to vector<16x2xf32>
    %351 = arith.addf %347, %350 : vector<16x2xf32>
    %c0_258 = arith.constant 0 : index
    %c1_259 = arith.constant 1 : index
    %c0_260 = arith.constant 0 : index
    %c0_261 = arith.constant 0 : index
    %352 = vector.load %arg8[%c0_258, %c1_259, %c0_260, %c0_261] : memref<1x4x8x2xbf16, #tpu.memory_space<vmem>>, vector<1x1x8x2xbf16>
    %353 = vector.shape_cast %352 : vector<1x1x8x2xbf16> to vector<8x2xbf16>
    %cst_262 = arith.constant dense<0.000000e+00> : vector<16x2xf32>
    %354 = tpu.matmul %293, %353, %cst_262 {dimension_numbers = #tpu.dot_dimension_numbers<[1], [0], [0], [1], [0, 0, 1, 1], [], []>} : vector<16x8xbf16>, vector<8x2xbf16>, vector<16x2xf32> -> vector<16x2xf32>
    %c0_263 = arith.constant 0 : index
    %c1_264 = arith.constant 1 : index
    %c0_265 = arith.constant 0 : index
    %c0_266 = arith.constant 0 : index
    %355 = vector.load %arg9[%c0_263, %c1_264, %c0_265, %c0_266] : memref<1x4x1x2xf32, #tpu.memory_space<vmem>>, vector<1x1x1x2xf32>
    %356 = vector.shape_cast %355 : vector<1x1x1x2xf32> to vector<1x2xf32>
    %357 = vector.broadcast %356 : vector<1x2xf32> to vector<16x2xf32>
    %358 = arith.addf %354, %357 : vector<16x2xf32>
    %359 = arith.truncf %344 : vector<16x2xf32> to vector<16x2xbf16>
    %360 = arith.truncf %351 : vector<16x2xf32> to vector<16x2xbf16>
    %cst_267 = arith.constant dense<0.000000e+00> : vector<16x16xf32>
    %361 = tpu.matmul %359, %360, %cst_267 {dimension_numbers = #tpu.dot_dimension_numbers<[1], [1], [0], [0], [0, 0, 1, 0], [], []>} : vector<16x2xbf16>, vector<16x2xbf16>, vector<16x16xf32> -> vector<16x16xf32>
    %cst_268 = arith.constant 0.353553385 : f32
    %362 = vector.broadcast %cst_268 : f32 to vector<16x16xf32>
    %363 = arith.mulf %361, %362 : vector<16x16xf32>
    %cst_269 = arith.constant dense<0xFF800000> : vector<16xf32>
    %364 = vector.multi_reduction <maximumf>, %363, %cst_269 [1] : vector<16x16xf32> to vector<16xf32>
    %365 = vector.shape_cast %364 : vector<16xf32> to vector<16x1xf32>
    %366 = vector.broadcast %365 : vector<16x1xf32> to vector<16x16xf32>
    %367 = arith.subf %363, %366 : vector<16x16xf32>
    %368 = math.exp %367 : vector<16x16xf32>
    %cst_270 = arith.constant dense<0.000000e+00> : vector<16xf32>
    %369 = vector.multi_reduction <add>, %368, %cst_270 [1] : vector<16x16xf32> to vector<16xf32>
    %370 = vector.shape_cast %369 : vector<16xf32> to vector<16x1xf32>
    %371 = vector.broadcast %370 : vector<16x1xf32> to vector<16x16xf32>
    %372 = arith.divf %368, %371 : vector<16x16xf32>
    %373 = arith.truncf %372 : vector<16x16xf32> to vector<16x16xbf16>
    %374 = arith.truncf %358 : vector<16x2xf32> to vector<16x2xbf16>
    %cst_271 = arith.constant dense<0.000000e+00> : vector<16x2xf32>
    %375 = tpu.matmul %373, %374, %cst_271 {dimension_numbers = #tpu.dot_dimension_numbers<[1], [0], [0], [1], [0, 0, 1, 1], [], []>} : vector<16x16xbf16>, vector<16x2xbf16>, vector<16x2xf32> -> vector<16x2xf32>
    %376 = arith.truncf %375 : vector<16x2xf32> to vector<16x2xbf16>
    %c0_272 = arith.constant 0 : index
    %c1_273 = arith.constant 1 : index
    %c0_274 = arith.constant 0 : index
    %c0_275 = arith.constant 0 : index
    %377 = vector.load %arg10[%c0_272, %c1_273, %c0_274, %c0_275] : memref<1x4x2x8xbf16, #tpu.memory_space<vmem>>, vector<1x1x2x8xbf16>
    %378 = vector.shape_cast %377 : vector<1x1x2x8xbf16> to vector<2x8xbf16>
    %cst_276 = arith.constant dense<0.000000e+00> : vector<16x8xf32>
    %379 = tpu.matmul %376, %378, %cst_276 {dimension_numbers = #tpu.dot_dimension_numbers<[1], [0], [0], [1], [0, 0, 1, 1], [], []>} : vector<16x2xbf16>, vector<2x8xbf16>, vector<16x8xf32> -> vector<16x8xf32>
    %380 = arith.addf %337, %379 : vector<16x8xf32>
    %c0_277 = arith.constant 0 : index
    %c2_278 = arith.constant 2 : index
    %c0_279 = arith.constant 0 : index
    %c0_280 = arith.constant 0 : index
    %381 = vector.load %arg4[%c0_277, %c2_278, %c0_279, %c0_280] : memref<1x4x8x2xbf16, #tpu.memory_space<vmem>>, vector<1x1x8x2xbf16>
    %382 = vector.shape_cast %381 : vector<1x1x8x2xbf16> to vector<8x2xbf16>
    %cst_281 = arith.constant dense<0.000000e+00> : vector<16x2xf32>
    %383 = tpu.matmul %293, %382, %cst_281 {dimension_numbers = #tpu.dot_dimension_numbers<[1], [0], [0], [1], [0, 0, 1, 1], [], []>} : vector<16x8xbf16>, vector<8x2xbf16>, vector<16x2xf32> -> vector<16x2xf32>
    %c0_282 = arith.constant 0 : index
    %c2_283 = arith.constant 2 : index
    %c0_284 = arith.constant 0 : index
    %c0_285 = arith.constant 0 : index
    %384 = vector.load %arg5[%c0_282, %c2_283, %c0_284, %c0_285] : memref<1x4x1x2xf32, #tpu.memory_space<vmem>>, vector<1x1x1x2xf32>
    %385 = vector.shape_cast %384 : vector<1x1x1x2xf32> to vector<1x2xf32>
    %386 = vector.broadcast %385 : vector<1x2xf32> to vector<16x2xf32>
    %387 = arith.addf %383, %386 : vector<16x2xf32>
    %c0_286 = arith.constant 0 : index
    %c2_287 = arith.constant 2 : index
    %c0_288 = arith.constant 0 : index
    %c0_289 = arith.constant 0 : index
    %388 = vector.load %arg6[%c0_286, %c2_287, %c0_288, %c0_289] : memref<1x4x8x2xbf16, #tpu.memory_space<vmem>>, vector<1x1x8x2xbf16>
    %389 = vector.shape_cast %388 : vector<1x1x8x2xbf16> to vector<8x2xbf16>
    %cst_290 = arith.constant dense<0.000000e+00> : vector<16x2xf32>
    %390 = tpu.matmul %293, %389, %cst_290 {dimension_numbers = #tpu.dot_dimension_numbers<[1], [0], [0], [1], [0, 0, 1, 1], [], []>} : vector<16x8xbf16>, vector<8x2xbf16>, vector<16x2xf32> -> vector<16x2xf32>
    %c0_291 = arith.constant 0 : index
    %c2_292 = arith.constant 2 : index
    %c0_293 = arith.constant 0 : index
    %c0_294 = arith.constant 0 : index
    %391 = vector.load %arg7[%c0_291, %c2_292, %c0_293, %c0_294] : memref<1x4x1x2xf32, #tpu.memory_space<vmem>>, vector<1x1x1x2xf32>
    %392 = vector.shape_cast %391 : vector<1x1x1x2xf32> to vector<1x2xf32>
    %393 = vector.broadcast %392 : vector<1x2xf32> to vector<16x2xf32>
    %394 = arith.addf %390, %393 : vector<16x2xf32>
    %c0_295 = arith.constant 0 : index
    %c2_296 = arith.constant 2 : index
    %c0_297 = arith.constant 0 : index
    %c0_298 = arith.constant 0 : index
    %395 = vector.load %arg8[%c0_295, %c2_296, %c0_297, %c0_298] : memref<1x4x8x2xbf16, #tpu.memory_space<vmem>>, vector<1x1x8x2xbf16>
    %396 = vector.shape_cast %395 : vector<1x1x8x2xbf16> to vector<8x2xbf16>
    %cst_299 = arith.constant dense<0.000000e+00> : vector<16x2xf32>
    %397 = tpu.matmul %293, %396, %cst_299 {dimension_numbers = #tpu.dot_dimension_numbers<[1], [0], [0], [1], [0, 0, 1, 1], [], []>} : vector<16x8xbf16>, vector<8x2xbf16>, vector<16x2xf32> -> vector<16x2xf32>
    %c0_300 = arith.constant 0 : index
    %c2_301 = arith.constant 2 : index
    %c0_302 = arith.constant 0 : index
    %c0_303 = arith.constant 0 : index
    %398 = vector.load %arg9[%c0_300, %c2_301, %c0_302, %c0_303] : memref<1x4x1x2xf32, #tpu.memory_space<vmem>>, vector<1x1x1x2xf32>
    %399 = vector.shape_cast %398 : vector<1x1x1x2xf32> to vector<1x2xf32>
    %400 = vector.broadcast %399 : vector<1x2xf32> to vector<16x2xf32>
    %401 = arith.addf %397, %400 : vector<16x2xf32>
    %402 = arith.truncf %387 : vector<16x2xf32> to vector<16x2xbf16>
    %403 = arith.truncf %394 : vector<16x2xf32> to vector<16x2xbf16>
    %cst_304 = arith.constant dense<0.000000e+00> : vector<16x16xf32>
    %404 = tpu.matmul %402, %403, %cst_304 {dimension_numbers = #tpu.dot_dimension_numbers<[1], [1], [0], [0], [0, 0, 1, 0], [], []>} : vector<16x2xbf16>, vector<16x2xbf16>, vector<16x16xf32> -> vector<16x16xf32>
    %cst_305 = arith.constant 0.353553385 : f32
    %405 = vector.broadcast %cst_305 : f32 to vector<16x16xf32>
    %406 = arith.mulf %404, %405 : vector<16x16xf32>
    %cst_306 = arith.constant dense<0xFF800000> : vector<16xf32>
    %407 = vector.multi_reduction <maximumf>, %406, %cst_306 [1] : vector<16x16xf32> to vector<16xf32>
    %408 = vector.shape_cast %407 : vector<16xf32> to vector<16x1xf32>
    %409 = vector.broadcast %408 : vector<16x1xf32> to vector<16x16xf32>
    %410 = arith.subf %406, %409 : vector<16x16xf32>
    %411 = math.exp %410 : vector<16x16xf32>
    %cst_307 = arith.constant dense<0.000000e+00> : vector<16xf32>
    %412 = vector.multi_reduction <add>, %411, %cst_307 [1] : vector<16x16xf32> to vector<16xf32>
    %413 = vector.shape_cast %412 : vector<16xf32> to vector<16x1xf32>
    %414 = vector.broadcast %413 : vector<16x1xf32> to vector<16x16xf32>
    %415 = arith.divf %411, %414 : vector<16x16xf32>
    %416 = arith.truncf %415 : vector<16x16xf32> to vector<16x16xbf16>
    %417 = arith.truncf %401 : vector<16x2xf32> to vector<16x2xbf16>
    %cst_308 = arith.constant dense<0.000000e+00> : vector<16x2xf32>
    %418 = tpu.matmul %416, %417, %cst_308 {dimension_numbers = #tpu.dot_dimension_numbers<[1], [0], [0], [1], [0, 0, 1, 1], [], []>} : vector<16x16xbf16>, vector<16x2xbf16>, vector<16x2xf32> -> vector<16x2xf32>
    %419 = arith.truncf %418 : vector<16x2xf32> to vector<16x2xbf16>
    %c0_309 = arith.constant 0 : index
    %c2_310 = arith.constant 2 : index
    %c0_311 = arith.constant 0 : index
    %c0_312 = arith.constant 0 : index
    %420 = vector.load %arg10[%c0_309, %c2_310, %c0_311, %c0_312] : memref<1x4x2x8xbf16, #tpu.memory_space<vmem>>, vector<1x1x2x8xbf16>
    %421 = vector.shape_cast %420 : vector<1x1x2x8xbf16> to vector<2x8xbf16>
    %cst_313 = arith.constant dense<0.000000e+00> : vector<16x8xf32>
    %422 = tpu.matmul %419, %421, %cst_313 {dimension_numbers = #tpu.dot_dimension_numbers<[1], [0], [0], [1], [0, 0, 1, 1], [], []>} : vector<16x2xbf16>, vector<2x8xbf16>, vector<16x8xf32> -> vector<16x8xf32>
    %423 = arith.addf %380, %422 : vector<16x8xf32>
    %c0_314 = arith.constant 0 : index
    %c3_315 = arith.constant 3 : index
    %c0_316 = arith.constant 0 : index
    %c0_317 = arith.constant 0 : index
    %424 = vector.load %arg4[%c0_314, %c3_315, %c0_316, %c0_317] : memref<1x4x8x2xbf16, #tpu.memory_space<vmem>>, vector<1x1x8x2xbf16>
    %425 = vector.shape_cast %424 : vector<1x1x8x2xbf16> to vector<8x2xbf16>
    %cst_318 = arith.constant dense<0.000000e+00> : vector<16x2xf32>
    %426 = tpu.matmul %293, %425, %cst_318 {dimension_numbers = #tpu.dot_dimension_numbers<[1], [0], [0], [1], [0, 0, 1, 1], [], []>} : vector<16x8xbf16>, vector<8x2xbf16>, vector<16x2xf32> -> vector<16x2xf32>
    %c0_319 = arith.constant 0 : index
    %c3_320 = arith.constant 3 : index
    %c0_321 = arith.constant 0 : index
    %c0_322 = arith.constant 0 : index
    %427 = vector.load %arg5[%c0_319, %c3_320, %c0_321, %c0_322] : memref<1x4x1x2xf32, #tpu.memory_space<vmem>>, vector<1x1x1x2xf32>
    %428 = vector.shape_cast %427 : vector<1x1x1x2xf32> to vector<1x2xf32>
    %429 = vector.broadcast %428 : vector<1x2xf32> to vector<16x2xf32>
    %430 = arith.addf %426, %429 : vector<16x2xf32>
    %c0_323 = arith.constant 0 : index
    %c3_324 = arith.constant 3 : index
    %c0_325 = arith.constant 0 : index
    %c0_326 = arith.constant 0 : index
    %431 = vector.load %arg6[%c0_323, %c3_324, %c0_325, %c0_326] : memref<1x4x8x2xbf16, #tpu.memory_space<vmem>>, vector<1x1x8x2xbf16>
    %432 = vector.shape_cast %431 : vector<1x1x8x2xbf16> to vector<8x2xbf16>
    %cst_327 = arith.constant dense<0.000000e+00> : vector<16x2xf32>
    %433 = tpu.matmul %293, %432, %cst_327 {dimension_numbers = #tpu.dot_dimension_numbers<[1], [0], [0], [1], [0, 0, 1, 1], [], []>} : vector<16x8xbf16>, vector<8x2xbf16>, vector<16x2xf32> -> vector<16x2xf32>
    %c0_328 = arith.constant 0 : index
    %c3_329 = arith.constant 3 : index
    %c0_330 = arith.constant 0 : index
    %c0_331 = arith.constant 0 : index
    %434 = vector.load %arg7[%c0_328, %c3_329, %c0_330, %c0_331] : memref<1x4x1x2xf32, #tpu.memory_space<vmem>>, vector<1x1x1x2xf32>
    %435 = vector.shape_cast %434 : vector<1x1x1x2xf32> to vector<1x2xf32>
    %436 = vector.broadcast %435 : vector<1x2xf32> to vector<16x2xf32>
    %437 = arith.addf %433, %436 : vector<16x2xf32>
    %c0_332 = arith.constant 0 : index
    %c3_333 = arith.constant 3 : index
    %c0_334 = arith.constant 0 : index
    %c0_335 = arith.constant 0 : index
    %438 = vector.load %arg8[%c0_332, %c3_333, %c0_334, %c0_335] : memref<1x4x8x2xbf16, #tpu.memory_space<vmem>>, vector<1x1x8x2xbf16>
    %439 = vector.shape_cast %438 : vector<1x1x8x2xbf16> to vector<8x2xbf16>
    %cst_336 = arith.constant dense<0.000000e+00> : vector<16x2xf32>
    %440 = tpu.matmul %293, %439, %cst_336 {dimension_numbers = #tpu.dot_dimension_numbers<[1], [0], [0], [1], [0, 0, 1, 1], [], []>} : vector<16x8xbf16>, vector<8x2xbf16>, vector<16x2xf32> -> vector<16x2xf32>
    %c0_337 = arith.constant 0 : index
    %c3_338 = arith.constant 3 : index
    %c0_339 = arith.constant 0 : index
    %c0_340 = arith.constant 0 : index
    %441 = vector.load %arg9[%c0_337, %c3_338, %c0_339, %c0_340] : memref<1x4x1x2xf32, #tpu.memory_space<vmem>>, vector<1x1x1x2xf32>
    %442 = vector.shape_cast %441 : vector<1x1x1x2xf32> to vector<1x2xf32>
    %443 = vector.broadcast %442 : vector<1x2xf32> to vector<16x2xf32>
    %444 = arith.addf %440, %443 : vector<16x2xf32>
    %445 = arith.truncf %430 : vector<16x2xf32> to vector<16x2xbf16>
    %446 = arith.truncf %437 : vector<16x2xf32> to vector<16x2xbf16>
    %cst_341 = arith.constant dense<0.000000e+00> : vector<16x16xf32>
    %447 = tpu.matmul %445, %446, %cst_341 {dimension_numbers = #tpu.dot_dimension_numbers<[1], [1], [0], [0], [0, 0, 1, 0], [], []>} : vector<16x2xbf16>, vector<16x2xbf16>, vector<16x16xf32> -> vector<16x16xf32>
    %cst_342 = arith.constant 0.353553385 : f32
    %448 = vector.broadcast %cst_342 : f32 to vector<16x16xf32>
    %449 = arith.mulf %447, %448 : vector<16x16xf32>
    %cst_343 = arith.constant dense<0xFF800000> : vector<16xf32>
    %450 = vector.multi_reduction <maximumf>, %449, %cst_343 [1] : vector<16x16xf32> to vector<16xf32>
    %451 = vector.shape_cast %450 : vector<16xf32> to vector<16x1xf32>
    %452 = vector.broadcast %451 : vector<16x1xf32> to vector<16x16xf32>
    %453 = arith.subf %449, %452 : vector<16x16xf32>
    %454 = math.exp %453 : vector<16x16xf32>
    %cst_344 = arith.constant dense<0.000000e+00> : vector<16xf32>
    %455 = vector.multi_reduction <add>, %454, %cst_344 [1] : vector<16x16xf32> to vector<16xf32>
    %456 = vector.shape_cast %455 : vector<16xf32> to vector<16x1xf32>
    %457 = vector.broadcast %456 : vector<16x1xf32> to vector<16x16xf32>
    %458 = arith.divf %454, %457 : vector<16x16xf32>
    %459 = arith.truncf %458 : vector<16x16xf32> to vector<16x16xbf16>
    %460 = arith.truncf %444 : vector<16x2xf32> to vector<16x2xbf16>
    %cst_345 = arith.constant dense<0.000000e+00> : vector<16x2xf32>
    %461 = tpu.matmul %459, %460, %cst_345 {dimension_numbers = #tpu.dot_dimension_numbers<[1], [0], [0], [1], [0, 0, 1, 1], [], []>} : vector<16x16xbf16>, vector<16x2xbf16>, vector<16x2xf32> -> vector<16x2xf32>
    %462 = arith.truncf %461 : vector<16x2xf32> to vector<16x2xbf16>
    %c0_346 = arith.constant 0 : index
    %c3_347 = arith.constant 3 : index
    %c0_348 = arith.constant 0 : index
    %c0_349 = arith.constant 0 : index
    %463 = vector.load %arg10[%c0_346, %c3_347, %c0_348, %c0_349] : memref<1x4x2x8xbf16, #tpu.memory_space<vmem>>, vector<1x1x2x8xbf16>
    %464 = vector.shape_cast %463 : vector<1x1x2x8xbf16> to vector<2x8xbf16>
    %cst_350 = arith.constant dense<0.000000e+00> : vector<16x8xf32>
    %465 = tpu.matmul %462, %464, %cst_350 {dimension_numbers = #tpu.dot_dimension_numbers<[1], [0], [0], [1], [0, 0, 1, 1], [], []>} : vector<16x2xbf16>, vector<2x8xbf16>, vector<16x8xf32> -> vector<16x8xf32>
    %466 = arith.addf %423, %465 : vector<16x8xf32>
    %467 = arith.addf %270, %466 : vector<16x8xf32>
    %468 = vector.broadcast %12 : vector<1x8xf32> to vector<16x8xf32>
    %469 = arith.addf %467, %468 : vector<16x8xf32>
    %cst_351 = arith.constant dense<0.000000e+00> : vector<16xf32>
    %470 = vector.multi_reduction <add>, %469, %cst_351 [1] : vector<16x8xf32> to vector<16xf32>
    %471 = vector.shape_cast %470 : vector<16xf32> to vector<16x1xf32>
    %cst_352 = arith.constant 8.000000e+00 : f32
    %472 = vector.broadcast %cst_352 : f32 to vector<16x1xf32>
    %473 = arith.divf %471, %472 : vector<16x1xf32>
    %474 = vector.broadcast %473 : vector<16x1xf32> to vector<16x8xf32>
    %475 = arith.subf %469, %474 : vector<16x8xf32>
    %476 = arith.mulf %475, %475 : vector<16x8xf32>
    %cst_353 = arith.constant dense<0.000000e+00> : vector<16xf32>
    %477 = vector.multi_reduction <add>, %476, %cst_353 [1] : vector<16x8xf32> to vector<16xf32>
    %478 = vector.shape_cast %477 : vector<16xf32> to vector<16x1xf32>
    %cst_354 = arith.constant 8.000000e+00 : f32
    %479 = vector.broadcast %cst_354 : f32 to vector<16x1xf32>
    %480 = arith.divf %478, %479 : vector<16x1xf32>
    %481 = vector.broadcast %473 : vector<16x1xf32> to vector<16x8xf32>
    %482 = arith.subf %469, %481 : vector<16x8xf32>
    %cst_355 = arith.constant 9.99999974E-6 : f32
    %483 = vector.broadcast %cst_355 : f32 to vector<16x1xf32>
    %484 = arith.addf %480, %483 : vector<16x1xf32>
    %485 = math.rsqrt %484 : vector<16x1xf32>
    %486 = vector.broadcast %485 : vector<16x1xf32> to vector<16x8xf32>
    %487 = arith.mulf %482, %486 : vector<16x8xf32>
    %488 = vector.broadcast %8 : vector<1x8xf32> to vector<16x8xf32>
    %489 = arith.mulf %487, %488 : vector<16x8xf32>
    %490 = vector.broadcast %10 : vector<1x8xf32> to vector<16x8xf32>
    %491 = arith.addf %489, %490 : vector<16x8xf32>
    %492 = arith.truncf %491 : vector<16x8xf32> to vector<16x8xbf16>
    %cst_356 = arith.constant dense<0.000000e+00> : vector<16x32xf32>
    %493 = tpu.matmul %492, %18, %cst_356 {dimension_numbers = #tpu.dot_dimension_numbers<[1], [0], [0], [1], [0, 0, 1, 1], [], []>} : vector<16x8xbf16>, vector<8x32xbf16>, vector<16x32xf32> -> vector<16x32xf32>
    %494 = vector.broadcast %14 : vector<1x32xf32> to vector<16x32xf32>
    %495 = arith.addf %493, %494 : vector<16x32xf32>
    %496 = arith.mulf %495, %495 : vector<16x32xf32>
    %497 = arith.mulf %495, %496 : vector<16x32xf32>
    %cst_357 = arith.constant 4.471500e-02 : f32
    %498 = vector.broadcast %cst_357 : f32 to vector<16x32xf32>
    %499 = arith.mulf %498, %497 : vector<16x32xf32>
    %500 = arith.addf %495, %499 : vector<16x32xf32>
    %cst_358 = arith.constant 0.797884583 : f32
    %501 = vector.broadcast %cst_358 : f32 to vector<16x32xf32>
    %502 = arith.mulf %501, %500 : vector<16x32xf32>
    %503 = math.tanh %502 : vector<16x32xf32>
    %cst_359 = arith.constant 1.000000e+00 : f32
    %504 = vector.broadcast %cst_359 : f32 to vector<16x32xf32>
    %505 = arith.addf %504, %503 : vector<16x32xf32>
    %cst_360 = arith.constant 5.000000e-01 : f32
    %506 = vector.broadcast %cst_360 : f32 to vector<16x32xf32>
    %507 = arith.mulf %506, %505 : vector<16x32xf32>
    %508 = arith.mulf %495, %507 : vector<16x32xf32>
    %509 = arith.truncf %508 : vector<16x32xf32> to vector<16x32xbf16>
    %cst_361 = arith.constant dense<0.000000e+00> : vector<16x8xf32>
    %510 = tpu.matmul %509, %20, %cst_361 {dimension_numbers = #tpu.dot_dimension_numbers<[1], [0], [0], [1], [0, 0, 1, 1], [], []>} : vector<16x32xbf16>, vector<32x8xbf16>, vector<16x8xf32> -> vector<16x8xf32>
    %511 = vector.broadcast %16 : vector<1x8xf32> to vector<16x8xf32>
    %512 = arith.addf %510, %511 : vector<16x8xf32>
    %513 = arith.addf %469, %512 : vector<16x8xf32>
    %c1_362 = arith.constant 1 : index
    %c0_363 = arith.constant 0 : index
    %c0_364 = arith.constant 0 : index
    %514 = vector.load %arg21[%c1_362, %c0_363, %c0_364] : memref<2x16x8xf32, #tpu.memory_space<vmem>>, vector<1x16x8xf32>
    %515 = vector.shape_cast %514 : vector<1x16x8xf32> to vector<16x8xf32>
    %516 = vector.shape_cast %513 : vector<16x8xf32> to vector<1x16x8xf32>
    tpu.vector_store %arg21[%c1_362, %c0_363, %c0_364], %516 {strides = array<i32>} : memref<2x16x8xf32, #tpu.memory_space<vmem>>, vector<1x16x8xf32>,
    %c1_i32 = arith.constant 1 : i32
    %517 = arith.cmpi eq, %arg0, %c1_i32 : i32
    %518 = arith.extui %517 : i1 to i32
    %c0_i32_365 = arith.constant 0 : i32
    %519 = arith.cmpi ne, %518, %c0_i32_365 : i32
    scf.if %519 {
      %c0_366 = arith.constant 0 : index
      %c0_367 = arith.constant 0 : index
      %520 = vector.load %arg18[%c0_366, %c0_367] : memref<4x8xbf16, #tpu.memory_space<vmem>>, vector<4x8xbf16>
      %c0_368 = arith.constant 0 : index
      %c0_369 = arith.constant 0 : index
      %521 = vector.load %arg19[%c0_368, %c0_369] : memref<4x1xf32, #tpu.memory_space<vmem>>, vector<4x1xf32>
      %c0_370 = arith.constant 0 : index
      %c0_371 = arith.constant 0 : index
      %c0_372 = arith.constant 0 : index
      %522 = vector.load %arg21[%c0_370, %c0_371, %c0_372] : memref<2x16x8xf32, #tpu.memory_space<vmem>>, vector<1x16x8xf32>
      %523 = vector.shape_cast %522 : vector<1x16x8xf32> to vector<16x8xf32>
      %524 = arith.truncf %523 : vector<16x8xf32> to vector<16x8xbf16>
      %cst_373 = arith.constant dense<0.000000e+00> : vector<4x16xf32>
      %525 = tpu.matmul %520, %524, %cst_373 {dimension_numbers = #tpu.dot_dimension_numbers<[1], [1], [0], [0], [0, 0, 1, 0], [], []>} : vector<4x8xbf16>, vector<16x8xbf16>, vector<4x16xf32> -> vector<4x16xf32>
      %526 = vector.broadcast %521 : vector<4x1xf32> to vector<4x16xf32>
      %527 = arith.addf %525, %526 : vector<4x16xf32>
      %c0_374 = arith.constant 0 : index
      %c0_375 = arith.constant 0 : index
      %c0_376 = arith.constant 0 : index
      %528 = vector.load %arg20[%c0_374, %c0_375, %c0_376] : memref<2x4x16xf32, #tpu.memory_space<vmem>>, vector<1x4x16xf32>
      %529 = vector.shape_cast %528 : vector<1x4x16xf32> to vector<4x16xf32>
      %530 = vector.shape_cast %527 : vector<4x16xf32> to vector<1x4x16xf32>
      tpu.vector_store %arg20[%c0_374, %c0_375, %c0_376], %530 {strides = array<i32>} : memref<2x4x16xf32, #tpu.memory_space<vmem>>, vector<1x4x16xf32>,
      %c1_377 = arith.constant 1 : index
      %c0_378 = arith.constant 0 : index
      %c0_379 = arith.constant 0 : index
      %531 = vector.load %arg21[%c1_377, %c0_378, %c0_379] : memref<2x16x8xf32, #tpu.memory_space<vmem>>, vector<1x16x8xf32>
      %532 = vector.shape_cast %531 : vector<1x16x8xf32> to vector<16x8xf32>
      %533 = arith.truncf %532 : vector<16x8xf32> to vector<16x8xbf16>
      %cst_380 = arith.constant dense<0.000000e+00> : vector<4x16xf32>
      %534 = tpu.matmul %520, %533, %cst_380 {dimension_numbers = #tpu.dot_dimension_numbers<[1], [1], [0], [0], [0, 0, 1, 0], [], []>} : vector<4x8xbf16>, vector<16x8xbf16>, vector<4x16xf32> -> vector<4x16xf32>
      %535 = vector.broadcast %521 : vector<4x1xf32> to vector<4x16xf32>
      %536 = arith.addf %534, %535 : vector<4x16xf32>
      %c1_381 = arith.constant 1 : index
      %c0_382 = arith.constant 0 : index
      %c0_383 = arith.constant 0 : index
      %537 = vector.load %arg20[%c1_381, %c0_382, %c0_383] : memref<2x4x16xf32, #tpu.memory_space<vmem>>, vector<1x4x16xf32>
      %538 = vector.shape_cast %537 : vector<1x4x16xf32> to vector<4x16xf32>
      %539 = vector.shape_cast %536 : vector<4x16xf32> to vector<1x4x16xf32>
      tpu.vector_store %arg20[%c1_381, %c0_382, %c0_383], %539 {strides = array<i32>} : memref<2x4x16xf32, #tpu.memory_space<vmem>>, vector<1x4x16xf32>,
    } else {
    }
    return
  }
  func.func @transform_0(%arg0: i32) -> (i32, i32, i32) {
    %c0_i32 = arith.constant 0 : i32
    %c0_i32_0 = arith.constant 0 : i32
    %c0_i32_1 = arith.constant 0 : i32
    %c0_i32_2 = arith.constant 0 : i32
    return %c0_i32, %c0_i32_0, %c0_i32_1 : i32, i32, i32
  }
  func.func @transform_1(%arg0: i32) -> (i32, i32, i32) {
    %c0_i32 = arith.constant 0 : i32
    %c0_i32_0 = arith.constant 0 : i32
    %c0_i32_1 = arith.constant 0 : i32
    return %arg0, %c0_i32, %c0_i32_0 : i32, i32, i32
  }
  func.func @transform_2(%arg0: i32) -> (i32, i32, i32) {
    %c0_i32 = arith.constant 0 : i32
    %c0_i32_0 = arith.constant 0 : i32
    %c0_i32_1 = arith.constant 0 : i32
    return %arg0, %c0_i32, %c0_i32_0 : i32, i32, i32
  }
  func.func @transform_3(%arg0: i32) -> (i32, i32, i32, i32) {
    %c0_i32 = arith.constant 0 : i32
    %c0_i32_0 = arith.constant 0 : i32
    %c0_i32_1 = arith.constant 0 : i32
    %c0_i32_2 = arith.constant 0 : i32
    return %arg0, %c0_i32, %c0_i32_0, %c0_i32_1 : i32, i32, i32, i32
  }
  func.func @transform_4(%arg0: i32) -> (i32, i32, i32, i32) {
    %c0_i32 = arith.constant 0 : i32
    %c0_i32_0 = arith.constant 0 : i32
    %c0_i32_1 = arith.constant 0 : i32
    %c0_i32_2 = arith.constant 0 : i32
    return %arg0, %c0_i32, %c0_i32_0, %c0_i32_1 : i32, i32, i32, i32
  }
  func.func @transform_5(%arg0: i32) -> (i32, i32, i32, i32) {
    %c0_i32 = arith.constant 0 : i32
    %c0_i32_0 = arith.constant 0 : i32
    %c0_i32_1 = arith.constant 0 : i32
    %c0_i32_2 = arith.constant 0 : i32
    return %arg0, %c0_i32, %c0_i32_0, %c0_i32_1 : i32, i32, i32, i32
  }
  func.func @transform_6(%arg0: i32) -> (i32, i32, i32, i32) {
    %c0_i32 = arith.constant 0 : i32
    %c0_i32_0 = arith.constant 0 : i32
    %c0_i32_1 = arith.constant 0 : i32
    %c0_i32_2 = arith.constant 0 : i32
    return %arg0, %c0_i32, %c0_i32_0, %c0_i32_1 : i32, i32, i32, i32
  }
  func.func @transform_7(%arg0: i32) -> (i32, i32, i32, i32) {
    %c0_i32 = arith.constant 0 : i32
    %c0_i32_0 = arith.constant 0 : i32
    %c0_i32_1 = arith.constant 0 : i32
    %c0_i32_2 = arith.constant 0 : i32
    return %arg0, %c0_i32, %c0_i32_0, %c0_i32_1 : i32, i32, i32, i32
  }
  func.func @transform_8(%arg0: i32) -> (i32, i32, i32, i32) {
    %c0_i32 = arith.constant 0 : i32
    %c0_i32_0 = arith.constant 0 : i32
    %c0_i32_1 = arith.constant 0 : i32
    %c0_i32_2 = arith.constant 0 : i32
    return %arg0, %c0_i32, %c0_i32_0, %c0_i32_1 : i32, i32, i32, i32
  }
  func.func @transform_9(%arg0: i32) -> (i32, i32, i32, i32) {
    %c0_i32 = arith.constant 0 : i32
    %c0_i32_0 = arith.constant 0 : i32
    %c0_i32_1 = arith.constant 0 : i32
    %c0_i32_2 = arith.constant 0 : i32
    return %arg0, %c0_i32, %c0_i32_0, %c0_i32_1 : i32, i32, i32, i32
  }
  func.func @transform_10(%arg0: i32) -> (i32, i32, i32) {
    %c0_i32 = arith.constant 0 : i32
    %c0_i32_0 = arith.constant 0 : i32
    %c0_i32_1 = arith.constant 0 : i32
    return %arg0, %c0_i32, %c0_i32_0 : i32, i32, i32
  }
  func.func @transform_11(%arg0: i32) -> (i32, i32, i32) {
    %c0_i32 = arith.constant 0 : i32
    %c0_i32_0 = arith.constant 0 : i32
    %c0_i32_1 = arith.constant 0 : i32
    return %arg0, %c0_i32, %c0_i32_0 : i32, i32, i32
  }
  func.func @transform_12(%arg0: i32) -> (i32, i32, i32) {
    %c0_i32 = arith.constant 0 : i32
    %c0_i32_0 = arith.constant 0 : i32
    %c0_i32_1 = arith.constant 0 : i32
    return %arg0, %c0_i32, %c0_i32_0 : i32, i32, i32
  }
  func.func @transform_13(%arg0: i32) -> (i32, i32, i32) {
    %c0_i32 = arith.constant 0 : i32
    %c0_i32_0 = arith.constant 0 : i32
    %c0_i32_1 = arith.constant 0 : i32
    return %arg0, %c0_i32, %c0_i32_0 : i32, i32, i32
  }
  func.func @transform_14(%arg0: i32) -> (i32, i32, i32) {
    %c0_i32 = arith.constant 0 : i32
    %c0_i32_0 = arith.constant 0 : i32
    %c0_i32_1 = arith.constant 0 : i32
    return %arg0, %c0_i32, %c0_i32_0 : i32, i32, i32
  }
  func.func @transform_15(%arg0: i32) -> (i32, i32, i32) {
    %c0_i32 = arith.constant 0 : i32
    %c0_i32_0 = arith.constant 0 : i32
    %c0_i32_1 = arith.constant 0 : i32
    return %arg0, %c0_i32, %c0_i32_0 : i32, i32, i32
  }
  func.func @transform_16(%arg0: i32) -> (i32, i32, i32) {
    %c0_i32 = arith.constant 0 : i32
    %c0_i32_0 = arith.constant 0 : i32
    %c0_i32_1 = arith.constant 0 : i32
    return %arg0, %c0_i32, %c0_i32_0 : i32, i32, i32
  }
  func.func @transform_17(%arg0: i32) -> (i32, i32) {
    %c0_i32 = arith.constant 0 : i32
    %c0_i32_0 = arith.constant 0 : i32
    %c0_i32_1 = arith.constant 0 : i32
    return %c0_i32, %c0_i32_0 : i32, i32
  }
  func.func @transform_18(%arg0: i32) -> (i32, i32) {
    %c0_i32 = arith.constant 0 : i32
    %c0_i32_0 = arith.constant 0 : i32
    %c0_i32_1 = arith.constant 0 : i32
    return %c0_i32, %c0_i32_0 : i32, i32
  }
  func.func @transform_19(%arg0: i32) -> (i32, i32, i32) {
    %c0_i32 = arith.constant 0 : i32
    %c0_i32_0 = arith.constant 0 : i32
    %c0_i32_1 = arith.constant 0 : i32
    %c0_i32_2 = arith.constant 0 : i32
    return %c0_i32, %c0_i32_0, %c0_i32_1 : i32, i32, i32
  }
}

</mosaic_0001>

<bundles_post_ra>
// kernel: generator_tts_forward.2
= control target key start
LH: loop header
LB: loop body
LE: loop exit
PB: predicated region body
PF: predicated region fallthrough
CT: control target
= control target key end

     0   :  { %9 = vsyncpa [#allocation3], 0  ;;  %s122_s18 = smov [#allocation2]   ;;  %s166_s0 = inlined_call_operand.hbm [shape: f32[2,32], index: 0, kind: input, shape index: {}]   ;;  %s167_s1 = inlined_call_operand.vmem [shape: bf16[32,128], index: 1, kind: input, shape index: {}]   ;;  %s168_s2 = inlined_call_operand.vmem [shape: f32[1,128], index: 2, kind: input, shape index: {}]   ;;  %s169_s3 = inlined_call_operand.vmem [shape: f32[1,128], index: 3, kind: input, shape index: {}]   ;;  %s170_s4 = inlined_call_operand.vmem [shape: f32[2,128], index: 4, kind: output, shape index: {}]  }
   0x1   :  { %s15_s17 = sshll.u32 %s166_s0, 4  ;;  %s17_s19 = sshll.u32 %s122_s18, 4  ;;  %s16_s17 = int_to_ptr.hbm [resolvable:$true] %s15_s17  ;;  %s18_s19 = int_to_ptr.vmem [resolvable:$true] %s17_s19 }
   0x2   :  { %20 = dma.hbm_to_vmem [thread:$0]  %s16_s17, 32, %s18_s19, [#allocation3]  }
   0x3   :  { %120 = dma.done.wait [#allocation3], 32  }
   0x4   :  { %121 = vsyncadd [#allocation3], 4294967264  ;;  %v92_v0 = vld [vmem:[%s167_s1 + $0x8] sm:$0xff]  ;;  %v91_v1 = vld [vmem:[%s167_s1] sm:$0xff]  ;;  %vm54_vm0 = vcmask 261120  }
   0x5   :  { %64 = vmatpush.bf16.msra.mxu0 %v92_v0  ;;  %v32_v2 = vld [vmem:[#allocation2] sm:$0x3]  ;;  %v94_v4 = vld [vmem:[%s168_s2] ss:$0 sm:$0xff] }
   0x6   :  { %v33_v3 = vpack.c.bf16 %v32_v2, %v32_v2  ;;  %v95_v5 = vld [vmem:[%s169_s3] ss:$0 sm:$0xff] }
   0x9   :  { %65 = vmatpush.bf16.msra.mxu0 %v91_v1 }
   0xc   :  { %90 = vmatmul.msk.bf16.vlgmr.msra.gmra.mxu0 %vm54_vm0, %v33_v3 }
  0x89   :  { %v67_v6 = vpop.f32.mrf.mxu0 }
  0x8a   :  { %v68_v7 = vadd.f32 %v94_v4, %v67_v6 }
  0x8c   :  { %v75_v8 = vadd.f32 %v95_v5, %v68_v7 }
  0x8e   :  { %76 = vst [vmem:[%s170_s4] sm:$0x3] %v75_v8 }
  0x91   :  { %v69_v9 = vpop.f32.mrf.mxu0 }
  0x92   :  { %81 = vsyncpa [#allocation3], 1 }

// kernel: generator_tts_forward.3
= control target key start
LH: loop header
LB: loop body
LE: loop exit
PB: predicated region body
PF: predicated region fallthrough
CT: control target
= control target key end

     0   :  { %s3905_s0 = inlined_call_operand.vmem [shape: f32[2,16,8], index: 0, kind: input, shape index: {}]   ;;  %s3906_s1 = inlined_call_operand.vmem [shape: f32[2,1,8], index: 1, kind: input, shape index: {}]   ;;  %s3907_s2 = inlined_call_operand.vmem [shape: f32[2,1,8], index: 2, kind: input, shape index: {}]   ;;  %s3908_s3 = inlined_call_operand.vmem [shape: bf16[2,4,8,2], index: 3, kind: input, shape index: {}]   ;;  %s3909_s4 = inlined_call_operand.vmem [shape: f32[2,4,1,2], index: 4, kind: input, shape index: {}]   ;;  %s3910_s5 = inlined_call_operand.vmem [shape: bf16[2,4,8,2], index: 5, kind: input, shape index: {}]   ;;  %s3911_s6 = inlined_call_operand.vmem [shape: f32[2,4,1,2], index: 6, kind: input, shape index: {}]   ;;  %s3912_s7 = inlined_call_operand.vmem [shape: bf16[2,4,8,2], index: 7, kind: input, shape index: {}]   ;;  %s3913_s8 = inlined_call_operand.vmem [shape: f32[2,4,1,2], index: 8, kind: input, shape index: {}]   ;;  %s3914_s9 = inlined_call_operand.vmem [shape: bf16[2,4,2,8], index: 9, kind: input, shape index: {}]   ;;  %s3915_s10 = inlined_call_operand.vmem [shape: f32[2,1,8], index: 10, kind: input, shape index: {}]   ;;  %s3916_s11 = inlined_call_operand.vmem [shape: f32[2,1,8], index: 11, kind: input, shape index: {}]   ;;  %s3917_s12 = inlined_call_operand.vmem [shape: f32[2,1,8], index: 12, kind: input, shape index: {}]   ;;  %s3918_s13 = inlined_call_operand.vmem [shape: bf16[2,8,32], index: 13, kind: input, shape index: {}]   ;;  %s3919_s14 = inlined_call_operand.vmem [shape: f32[2,1,32], index: 14, kind: input, shape index: {}]   ;;  %s3920_s15 = inlined_call_operand.vmem [shape: bf16[2,32,8], index: 15, kind: input, shape index: {}]   ;;  %s3921_s16 = inlined_call_operand.vmem [shape: f32[2,1,8], index: 16, kind: input, shape index: {}]   ;;  %s3922_s17 = inlined_call_operand.vmem [shape: bf16[4,8], index: 17, kind: input, shape index: {}]   ;;  %s3923_s18 = inlined_call_operand.vmem [shape: f32[4,1], index: 18, kind: input, shape index: {}]   ;;  %s3924_s19 = inlined_call_operand.hbm [shape: f32[2,4,16], index: 19, kind: output, shape index: {}]  }
   0x1   :  { %3931 = sst [smem:[#allocation11_spill]] %s3905_s0 }
   0x2   :  { %3932 = sst [smem:[#allocation12_spill]] %s3906_s1 }
   0x3   :  { %3933 = sst [smem:[#allocation13_spill]] %s3907_s2 }
   0x4   :  { %3934 = sst [smem:[#allocation14_spill]] %s3908_s3 }
   0x5   :  { %3935 = sst [smem:[#allocation15_spill]] %s3909_s4 }
   0x6   :  { %3936 = sst [smem:[#allocation16_spill]] %s3910_s5 }
   0x7   :  { %3937 = sst [smem:[#allocation17_spill]] %s3911_s6 }
   0x8   :  { %3938 = sst [smem:[#allocation18_spill]] %s3912_s7 }
   0x9   :  { %3939 = sst [smem:[#allocation19_spill]] %s3913_s8 }
   0xa   :  { %3940 = sst [smem:[#allocation20_spill]] %s3914_s9 }
   0xb   :  { %3941 = sst [smem:[#allocation21_spill]] %s3915_s10 }
   0xc   :  { %3942 = sst [smem:[#allocation22_spill]] %s3916_s11 }
   0xd   :  { %3943 = sst [smem:[#allocation23_spill]] %s3922_s17 }
   0xe   :  { %3944 = sst [smem:[#allocation24_spill]] %s3923_s18 }
   0xf   :  { %3945 = sst [smem:[#allocation25_spill]] %s3924_s19 }
  0x10   :  { %24 = vsyncpa [#allocation4], 0  ;;  %s3389_s0 = smov 0  }
  0x11 LB: > { %3946 = sst [smem:[#allocation6_spill]] %s3282_s0  ;;  %s3395_s30 = sadd.s32 4294967295, %s3282_s0   ;;  %s3282_s0 = sphi %s3389_s0, %s30_s0  }
  0x12   : > { %p2965_p0 = scmp.ge.s32.totalorder %s3282_s0, 1  ;;  %p664_p1 = scmp.lt.s32.totalorder %s3282_s0, 3 }
  0x14   : > { %p665_p2 = pnand %p2965_p0, %p664_p1 }
  0x16   : > { %668 = sbr.rel (%p665_p2) target bundleno = 6152 (0x1808), region = 96 }
  0x1b   : > { %p771_p3 = scmp.lt.s32.totalorder %s3395_s30, 1  ;;  %s3947_s22 = sld [smem:[#allocation12_spill]] }
  0x1c   : > { %s3949_s25 = sld [smem:[#allocation13_spill]]  ;;  %p2979_p4 = scmp.ne.s32.totalorder %s3395_s30, 0 }
  0x1d   : > { %s3401_s20 = scalar_select %p771_p3, %s3395_s30, 1 }
  0x1e   : > { %s3951_s21 = sld [smem:[#allocation14_spill]] }
  0x1f   : > { %s3089_s26 = sshll.u32 %s3401_s20, 4  ;;  %s3417_s27 = sshll.u32 %s3401_s20, 2 }
  0x20   : > { %s3953_s4 = sld [smem:[#allocation15_spill]] }
  0x21   : > { %s3407_s2 = scalar_lea.vmem %s3947_s22, %s3401_s20  ;;  %s3954_s5 = sld [smem:[#allocation16_spill]] }
  0x22   : > { %3948 = sst [smem:[#allocation7_spill]] %s3407_s2  ;;  %s3413_s3 = scalar_lea.vmem %s3949_s25, %s3401_s20 }
  0x23   : > { %3950 = sst [smem:[#allocation8_spill]] %s3413_s3  ;;  %s816_s2 = scalar_lea.vmem %s3917_s12, %s3401_s20 }
  0x24   : > { %s3422_s1 = scalar_lea.vmem %s3951_s21, %s3089_s26  ;;  %s3955_s6 = sld [smem:[#allocation17_spill]] }
  0x25   : > { %3952 = sst [smem:[#allocation9_spill]] %s3422_s1 }
  0x26   : > { %s3428_s23 = scalar_lea.vmem %s3953_s4, %s3417_s27  ;;  %s3956_s7 = sld [smem:[#allocation18_spill]] }
  0x27   : > { %s3433_s19 = scalar_lea.vmem %s3954_s5, %s3089_s26  ;;  %s3957_s8 = sld [smem:[#allocation19_spill]] }
  0x28   : > { %s3958_s9 = sld [smem:[#allocation20_spill]]  ;;  %s820_s4 = scalar_lea.vmem %s3918_s13, %s3417_s27 }
  0x29   : > { %s3960_s10 = sld [smem:[#allocation21_spill]] }
  0x2a   : > { %s3439_s28 = scalar_lea.vmem %s3955_s6, %s3417_s27  ;;  %s3961_s11 = sld [smem:[#allocation22_spill]] }
  0x2c   : > { %s3444_s21 = scalar_lea.vmem %s3956_s7, %s3089_s26 }
  0x2d   : > { %s3450_s0 = scalar_lea.vmem %s3957_s8, %s3417_s27  ;;  %836 = sbr.rel (%p2979_p4) target bundleno = 57 (0x39), region = 100 }
  0x2e   : > { %s3456_s24 = scalar_lea.vmem %s3958_s9, %s3417_s27  ;;  %s3962_s8 = sld [smem:[#allocation11_spill]] (!%p2979_p4) }
  0x2f   : > { %3959 = sst [smem:[#allocation10_spill]] %s3456_s24  ;;  %s3462_s17 = scalar_lea.vmem %s3960_s10, %s3401_s20 }
  0x30   : > { %s3468_s3 = scalar_lea.vmem %s3961_s11, %s3401_s20  ;;  %s823_s24 = scalar_lea.vmem %s3919_s14, %s3401_s20 }
  0x31   : > { %s3485_s10 = scalar_lea.vmem %s3920_s15, %s3089_s26  ;;  %s831_s11 = scalar_lea.vmem %s3921_s16, %s3401_s20 }
  0x32   : > { %vm841_vm0 = vcmask 64512  }
  0x34   : > { %v837_v0 = vld [vmem:[%s3962_s8] sm:$0xff]  ;;  %v838_v1 = vld [vmem:[%s3962_s8 + $0x8] sm:$0xff]  ;;  %v839_v2 = vld [vmem:[%s3962_s8 + $0x10] sm:$0xff] }
  0x35   : > { %842 = vst.msk [vmem:[#allocation2] sm:$0xff] %vm841_vm0, %v837_v0  ;;  %v840_v3 = vld [vmem:[%s3962_s8 + $0x18] sm:$0xff] }
  0x36   : > { %843 = vst.msk [vmem:[#allocation2 + $0x8] sm:$0xff] %vm841_vm0, %v838_v1 }
  0x37   : > { %844 = vst.msk [vmem:[#allocation2 + $0x10] sm:$0xff] %vm841_vm0, %v839_v2 }
  0x38   : > { %845 = vst.msk [vmem:[#allocation2 + $0x18] sm:$0xff] %vm841_vm0, %v840_v3 }
  0x39 PF: > { %vm860_vm1 = vcmask 64512   ;;  %v3284_v8 = vmov 8.0   ;;  %s3963_s6 = sld [smem:[#allocation9_spill]]  ;;  %vm931_vm3 = vcmask 1043456   ;;  %v949_v28 = vld [vmem:[%s3433_s19] sm:$0xf] }
  0x3a   : > { %3145 = vrcp.f32 %v3284_v8  ;;  %v955_v31 = vsel %vm931_vm3, %v949_v28, 0  ;;  %v971_v32 = vld [vmem:[%s3444_s21] sm:$0xf]  ;;  %v2988_v36 = vld [vmem:[%s3433_s19 + $0x4] sm:$0xf]  ;;  %s3964_s18 = sld [smem:[#allocation7_spill]] }
  0x3b   : > { %964 = vmatpush.bf16.msra.mxu1 %v955_v31  ;;  %v977_v33 = vsel %vm931_vm3, %v971_v32, 0  ;;  %v1120_v39 = vsel %vm931_vm3, %v2988_v36, 0  ;;  %s3965_s7 = sld [smem:[#allocation8_spill]]  ;;  %v3117_v2 = vld [vmem:[%s3439_s28] ss:$0 sm:$0xff]  ;;  %vm995_vm10 = vcmask 15360  }
  0x3c   : > { %v858_v4 = vld [vmem:[#allocation2] sm:$0xff]  ;;  %986 = vmatpush.bf16.msra.mxu2 %v977_v33  ;;  %vm1018_vm11 = vcmask 130048   ;;  %v3121_v36 = vld [vmem:[%s3450_s0 + $0x1] ss:$0 sm:$0xff]  ;;  %s3966_s29 = sld [smem:[#allocation10_spill]]  ;;  %p3082_p5 = scmp.ne.s32.totalorder %s3395_s30, 1 }
  0x3d   : > { %v859_v5 = vld [vmem:[#allocation2 + $0x8] sm:$0xff]  ;;  %v861_v6 = vsel %vm860_vm1, %v858_v4, 0.0  ;;  %s3969_s20 = sld [smem:[#allocation24_spill]] (!%p3082_p5) }
  0x3e   : > { %v864_v7 = vsel %vm860_vm1, %v859_v5, 0.0  ;;  %862 = vadd.xlane.f32.xlu0 %v861_v6 }
  0x3f   : > { %v923_v27 = vld [vmem:[%s3963_s6] sm:$0xf]  ;;  %v2985_v35 = vld [vmem:[%s3963_s6 + $0x4] sm:$0xf] }
  0x40   : > { %v3146_v9 = vpop.eup %3145  ;;  %v933_v30 = vsel %vm931_vm3, %v923_v27, 0  ;;  %v1096_v38 = vsel %vm931_vm3, %v2985_v35, 0  ;;  %1129 = vmatpush.bf16.msrb.mxu2 %v1120_v39  ;;  %v3114_v54 = vld [vmem:[%s3964_s18] ss:$0 sm:$0xff] }
  0x41   : > { %v868_v10 = vmul.f32 8.0, %v3146_v9  ;;  %vm872_vm2 = vweird.f32 %v3146_v9  ;;  %942 = vmatpush.bf16.msra.mxu0 %v933_v30  ;;  %1105 = vmatpush.bf16.msrb.mxu1 %v1096_v38  ;;  %v3115_v58 = vld [vmem:[%s3965_s7] ss:$0 sm:$0xff] }
  0x43   : > { %v869_v11 = vsub.f32 1.0, %v868_v10 }
  0x45   : > { %v870_v12 = vmul.f32 %v3146_v9, %v869_v11 }
  0x46   : > { %865 = vadd.xlane.f32.xlu0 %v864_v7  ;;  %v2991_v7 = vld [vmem:[%s3444_s21 + $0x4] sm:$0xf] }
  0x47   : > { %v871_v13 = vadd.f32 %v3146_v9, %v870_v12  ;;  %v1144_v11 = vsel %vm931_vm3, %v2991_v7, 0  ;;  %v3116_v12 = vld [vmem:[%s3428_s23] ss:$0 sm:$0xff] }
  0x49   : > { %v3506_v14 = vsel %vm872_vm2, %v3146_v9, %v871_v13  ;;  %v3118_v9 = vld [vmem:[%s3450_s0] ss:$0 sm:$0xff] }
  0xb1   : > { %v863_v15 = vpop.xlane.xlu0 %862 }
  0xb2   : > { %v874_v16 = vmul.f32 %v3506_v14, %v863_v15 }
  0xb4   : > { %v876_v17 = vsub.f32 %v858_v4, %v874_v16 }
  0xb6   : > { %v878_v18 = vmul.f32 %v876_v17, %v876_v17 }
  0xb8   : > { %v880_v19 = vsel %vm860_vm1, %v878_v18, 0.0 }
  0xb9   : > { %881 = vadd.xlane.f32.xlu1 %v880_v19  ;;  %v866_v20 = vpop.xlane.xlu0 %865 }
  0xba   : > { %v875_v21 = vmul.f32 %v3506_v14, %v866_v20 }
  0xbc   : > { %v877_v22 = vsub.f32 %v859_v5, %v875_v21 }
  0xbe   : > { %v879_v23 = vmul.f32 %v877_v22, %v877_v22 }
  0xc0   : > { %v883_v24 = vsel %vm860_vm1, %v879_v23, 0.0  ;;  %v3120_v23 = vld [vmem:[%s3439_s28 + $0x1] ss:$0 sm:$0xff] }
  0xc1   : > { %884 = vadd.xlane.f32.xlu1 %v883_v24 }
 0x12c   : > { %v882_v25 = vpop.xlane.xlu1 %881 }
 0x12d   : > { %v886_v26 = vmul.f32 %v882_v25, %v3506_v14 }
 0x12f   : > { %v888_v29 = vadd.f32 1e-05, %v886_v26 }
 0x131   : > { %3147 = vrsqrt.f32 %v888_v29  ;;  %vm896_vm5 = vweird.f32 %v888_v29 }
 0x134   : > { %v885_v34 = vpop.xlane.xlu1 %884 }
 0x135   : > { %v887_v37 = vmul.f32 %v885_v34, %v3506_v14 }
 0x137   : > { %v3148_v40 = vpop.eup %3147  ;;  %v889_v41 = vadd.f32 1e-05, %v887_v37 }
 0x138   : > { %v891_v42 = vmul.f32 %v3148_v40, %v888_v29  ;;  %vm897_vm4 = vweird.f32 %v3148_v40 }
 0x139   : > { %3149 = vrsqrt.f32 %v889_v41  ;;  %vm898_vm6 = vmor %vm896_vm5, %vm897_vm4  ;;  %vm906_vm8 = vweird.f32 %v889_v41 }
 0x13a   : > { %v892_v43 = vmul.f32 %v3148_v40, %v891_v42 }
 0x13c   : > { %v893_v44 = vmul.f32 0.5, %v892_v43 }
 0x13e   : > { %v894_v45 = vsub.f32 1.5, %v893_v44 }
 0x13f   : > { %v3150_v46 = vpop.eup %3149 }
 0x140   : > { %v895_v47 = vmul.f32 %v3148_v40, %v894_v45  ;;  %v901_v48 = vmul.f32 %v3150_v46, %v889_v41  ;;  %vm907_vm7 = vweird.f32 %v3150_v46 }
 0x141   : > { %vm908_vm9 = vmor %vm906_vm8, %vm907_vm7 }
 0x142   : > { %v902_v49 = vmul.f32 %v3150_v46, %v901_v48  ;;  %v899_v50 = vsel %vm898_vm6, %v3148_v40, %v895_v47  ;;  %vm1257_vm6 = vcmask 1040384  }
 0x143   : > { %v910_v53 = vmul.f32 %v899_v50, %v876_v17 }
 0x144   : > { %v903_v51 = vmul.f32 0.5, %v902_v49 }
 0x145   : > { %v915_v57 = vmul.f32 %v3114_v54, %v910_v53 }
 0x146   : > { %v904_v52 = vsub.f32 1.5, %v903_v51 }
 0x147   : > { %v920_v61 = vadd.f32 %v3115_v58, %v915_v57 }
 0x148   : > { %v905_v55 = vmul.f32 %v3150_v46, %v904_v52 }
 0x14a   : > { %v909_v56 = vsel %vm908_vm9, %v3150_v46, %v905_v55 }
 0x14b   : > { %v911_v59 = vmul.f32 %v909_v56, %v877_v22 }
 0x14d   : > { %v916_v60 = vmul.f32 %v3114_v54, %v911_v59 }
 0x14f   : > { %v921_v62 = vadd.f32 %v3115_v58, %v916_v60 }
 0x151   : > { %v3526_v63 = vpack.c.bf16 %v921_v62, %v920_v61 }
 0x153   : > { %2980 = vmatmul.msk.bf16.vlgmr.msra.gmra.mxu0 %vm860_vm1, %v3526_v63  ;;  %2981 = vmatmul.msk.bf16.vlgmr.msra.gmra.mxu1 %vm860_vm1, %v3526_v63 }
 0x154   : > { %2982 = vmatmul.msk.bf16.vlgmr.msra.gmra.mxu2 %vm860_vm1, %v3526_v63 }
 0x163   : > { %2987 = vmatmul.msk.bf16.vlgmr.msrb.gmra.mxu1 %vm860_vm1, %v3526_v63 }
 0x164   : > { %2990 = vmatmul.msk.bf16.vlgmr.msrb.gmra.mxu2 %vm860_vm1, %v3526_v63 }
 0x1d0   : > { %v966_v0 = vpop.f32.mrf.mxu1  ;;  %v944_v1 = vpop.f32.mrf.mxu0 }
 0x1d1   : > { %v967_v5 = vadd.f32 %v3117_v2, %v966_v0  ;;  %v945_v19 = vadd.f32 %v3116_v12, %v944_v1 }
 0x1d7   : > { %v988_v3 = vpop.f32.mrf.mxu2 }
 0x1d8   : > { %v968_v4 = vpop.f32.mrf.mxu1  ;;  %v946_v10 = vpop.f32.mrf.mxu0  ;;  %v989_v17 = vadd.f32 %v3118_v9, %v988_v3 }
 0x1d9   : > { %v969_v6 = vadd.f32 %v3117_v2, %v968_v4  ;;  %v947_v15 = vadd.f32 %v3116_v12, %v946_v10  ;;  %v2999_v10 = vld [vmem:[%s3963_s6 + $0x8] sm:$0xf] }
 0x1db   : > { %v994_v8 = vpack.c.bf16 %v969_v6, %v967_v5  ;;  %v993_v21 = vpack.c.bf16 %v947_v15, %v945_v19 }
 0x1dd   : > { %v1000_v13 = vsel %vm995_vm10, %v994_v8, 0 }
 0x1de   : > { %1009 = vmatpush.bf16.xpose.msra.mxu3 %v1000_v13 }
 0x1df   : > { %v990_v16 = vpop.f32.mrf.mxu2 }
 0x1e0   : > { %v991_v18 = vadd.f32 %v3118_v9, %v990_v16  ;;  %v1107_v13 = vpop.f32.mrf.mxu1  ;;  %v1303_v16 = vsel %vm931_vm3, %v2999_v10, 0 }
 0x1e2   : > { %v1068_v20 = vpack.c.bf16 %v991_v18, %v989_v17  ;;  %v3119_v18 = vld [vmem:[%s3428_s23 + $0x1] ss:$0 sm:$0xff] }
 0x1e4   : > { %1079 = vmatpush.bf16.msrb.mxu0 %v1068_v20  ;;  %v1108_v20 = vadd.f32 %v3119_v18, %v1107_v13 }
 0x1e5   : > { %2983 = vmatmul.msk.bf16.vlgmr.msra.gmra.mxu3 %vm995_vm10, %v993_v21 }
 0x1e6   : > { %1153 = vmatpush.bf16.msrb.mxu3 %v1144_v11 }
 0x1e7   : > { %v1131_v22 = vpop.f32.mrf.mxu2 }
 0x1e8   : > { %v1132_v25 = vadd.f32 %v3120_v23, %v1131_v22  ;;  %v1109_v17 = vpop.f32.mrf.mxu1  ;;  %v1087_v22 = vld [vmem:[%s3966_s29] sm:$0x1] }
 0x1e9   : > { %v1110_v19 = vadd.f32 %v3119_v18, %v1109_v17 }
 0x1eb   : > { %v1160_v21 = vpack.c.bf16 %v1110_v19, %v1108_v20  ;;  %v3123_v19 = vld [vmem:[%s3439_s28 + $0x2] ss:$0 sm:$0xff] }
 0x1ef   : > { %v1133_v24 = vpop.f32.mrf.mxu2 }
 0x1f0   : > { %v1134_v26 = vadd.f32 %v3120_v23, %v1133_v24  ;;  %v1279_v23 = vsel %vm1257_vm6, %v1087_v22, 0 }
 0x1f1   : > { %1288 = vmatpush.bf16.msra.mxu3 %v1279_v23  ;;  %v3015_v23 = vld [vmem:[%s3433_s19 + $0xc] sm:$0xf] }
 0x1f2   : > { %v1161_v27 = vpack.c.bf16 %v1134_v26, %v1132_v25 }
 0x1f4   : > { %v1166_v28 = vsel %vm995_vm10, %v1161_v27, 0 }
 0x1f5   : > { %1175 = vmatpush.bf16.xpose.msra.mxu0 %v1166_v28  ;;  %2993 = vmatmul.msk.bf16.vlgmr.msrb.gmra.mxu3 %vm860_vm1, %v3526_v63 }
 0x268   : > { %v1011_v29 = vpop.f32.mrf.mxu3 }
 0x269   : > { %v1016_v30 = vmul.f32 0.35355338, %v1011_v29 }
 0x26b   : > { %v1019_v31 = vsel %vm1018_vm11, %v1016_v30, -inf }
 0x26c   : > { %1020 = vmax.xlane.f32.xlu2 %v1019_v31 }
 0x270   : > { %v1013_v32 = vpop.f32.mrf.mxu3 }
 0x271   : > { %v1017_v33 = vmul.f32 0.35355338, %v1013_v32 }
 0x273   : > { %v1022_v34 = vsel %vm1018_vm11, %v1017_v33, -inf }
 0x274   : > { %1023 = vmax.xlane.f32.xlu2 %v1022_v34 }
 0x278   : > { %v1155_v35 = vpop.f32.mrf.mxu3 }
 0x279   : > { %v1156_v38 = vadd.f32 %v3121_v36, %v1155_v35 }
 0x280   : > { %v1157_v37 = vpop.f32.mrf.mxu3 }
 0x281   : > { %v1158_v39 = vadd.f32 %v3121_v36, %v1157_v37 }
 0x283   : > { %v1233_v40 = vpack.c.bf16 %v1158_v39, %v1156_v38 }
 0x285   : > { %1244 = vmatpush.bf16.msra.mxu1 %v1233_v40 }
 0x2df   : > { %v1021_v41 = vpop.xlane.xlu2 %1020 }
 0x2e0   : > { %v1025_v42 = vsub.f32 %v1016_v30, %v1021_v41 }
 0x2e2   : > { %v1027_v43 = vmul.f32 1.442695, %v1025_v42 }
 0x2e4   : > { %3151 = vpow2.f32 %v1027_v43  ;;  %v3002_v43 = vld [vmem:[%s3433_s19 + $0x8] sm:$0xf] }
 0x2e7   : > { %v1024_v44 = vpop.xlane.xlu2 %1023 }
 0x2e8   : > { %v1026_v45 = vsub.f32 %v1017_v33, %v1024_v44  ;;  %v1327_v44 = vsel %vm931_vm3, %v3002_v43, 0 }
 0x2e9   : > { %1336 = vmatpush.bf16.msrb.mxu1 %v1327_v44 }
 0x2ea   : > { %v3152_v46 = vpop.eup %3151  ;;  %v1029_v47 = vmul.f32 1.442695, %v1026_v45 }
 0x2eb   : > { %v1031_v48 = vsel %vm1018_vm11, %v3152_v46, 0.0 }
 0x2ec   : > { %3153 = vpow2.f32 %v1029_v47  ;;  %1032 = vadd.xlane.f32.xlu0 %v1031_v48 }
 0x2f2   : > { %v3154_v49 = vpop.eup %3153 }
 0x2f3   : > { %v1034_v50 = vsel %vm1018_vm11, %v3154_v49, 0.0 }
 0x2f4   : > { %1035 = vadd.xlane.f32.xlu1 %v1034_v50 }
 0x35f   : > { %v1033_v51 = vpop.xlane.xlu0 %1032 }
 0x360   : > { %3155 = vrcp.f32 %v1033_v51  ;;  %v1048_v60 = vand.u32 2147483648, %v1033_v51  ;;  %vm1042_vm13 = vweird.f32 %v1033_v51  ;;  %v1046_v61 = vand.u32 2147483647, %v1033_v51 }
 0x362   : > { %v1049_v4 = vor.u32 1.1754944e-38, %v1048_v60  ;;  %vm1047_vm0 = vcmp.eq.f32.partialorder %v1046_v61, 8.507059e+37 }
 0x366   : > { %v3156_v52 = vpop.eup %3155 }
 0x367   : > { %v1038_v53 = vmul.f32 %v3156_v52, %v1033_v51  ;;  %v1036_v54 = vpop.xlane.xlu1 %1035  ;;  %vm1043_vm12 = vweird.f32 %v3156_v52 }
 0x368   : > { %3157 = vrcp.f32 %v1036_v54  ;;  %vm1044_vm14 = vmor %vm1042_vm13, %vm1043_vm12  ;;  %v1063_v0 = vand.u32 2147483648, %v1036_v54  ;;  %v1061_v3 = vand.u32 2147483647, %v1036_v54  ;;  %vm1057_vm2 = vweird.f32 %v1036_v54 }
 0x369   : > { %v1039_v55 = vsub.f32 1.0, %v1038_v53 }
 0x36a   : > { %v1064_v6 = vor.u32 1.1754944e-38, %v1063_v0  ;;  %vm1062_vm5 = vcmp.eq.f32.partialorder %v1061_v3, 8.507059e+37 }
 0x36b   : > { %v1040_v56 = vmul.f32 %v3156_v52, %v1039_v55 }
 0x36d   : > { %v1041_v58 = vadd.f32 %v3156_v52, %v1040_v56 }
 0x36e   : > { %v3158_v57 = vpop.eup %3157 }
 0x36f   : > { %v1053_v59 = vmul.f32 %v3158_v57, %v1036_v54  ;;  %v1045_v1 = vsel %vm1044_vm14, %v3156_v52, %v1041_v58  ;;  %vm1058_vm15 = vweird.f32 %v3158_v57 }
 0x370   : > { %vm1059_vm4 = vmor %vm1057_vm2, %vm1058_vm15  ;;  %v1050_v7 = vsel %vm1047_vm0, %v1049_v4, %v1045_v1 }
 0x371   : > { %v1054_v62 = vsub.f32 1.0, %v1053_v59  ;;  %v1051_v11 = vmul.f32 %v3152_v46, %v1050_v7  ;;  %v2996_v7 = vld [vmem:[%s3966_s29 + $0x1] sm:$0x1] }
 0x373   : > { %v1055_v2 = vmul.f32 %v3158_v57, %v1054_v62 }
 0x375   : > { %v1056_v5 = vadd.f32 %v3158_v57, %v1055_v2 }
 0x377   : > { %v1060_v8 = vsel %vm1059_vm4, %v3158_v57, %v1056_v5 }
 0x378   : > { %v1065_v9 = vsel %vm1062_vm5, %v1064_v6, %v1060_v8  ;;  %v1259_v8 = vsel %vm1257_vm6, %v2996_v7, 0 }
 0x379   : > { %v1066_v12 = vmul.f32 %v3154_v49, %v1065_v9  ;;  %1268 = vmatpush.bf16.msra.mxu2 %v1259_v8  ;;  %v3005_v9 = vld [vmem:[%s3444_s21 + $0x8] sm:$0xf] }
 0x37a   : > { %v1351_v10 = vsel %vm931_vm3, %v3005_v9, 0 }
 0x37b   : > { %v1067_v15 = vpack.c.bf16 %v1066_v12, %v1051_v11  ;;  %v3012_v12 = vld [vmem:[%s3963_s6 + $0xc] sm:$0xf] }
 0x37d   : > { %2984 = vmatmul.msk.bf16.vlgmr.msrb.gmra.mxu0 %vm1018_vm11, %v1067_v15  ;;  %1360 = vmatpush.bf16.msrb.mxu2 %v1351_v10 }
 0x37e   : > { %1312 = vmatpush.bf16.msrb.mxu0 %v1303_v16  ;;  %v1491_v16 = vsel %vm931_vm3, %v3012_v12, 0 }
 0x38d   : > { %2994 = vmatmul.msk.bf16.vlgmr.msra.gmra.mxu0 %vm995_vm10, %v1160_v21 }
 0x39d   : > { %3001 = vmatmul.msk.bf16.vlgmr.msrb.gmra.mxu0 %vm860_vm1, %v3526_v63 }
 0x3fa   : > { %v1081_v24 = vpop.f32.mrf.mxu0 }
 0x402   : > { %v1083_v25 = vpop.f32.mrf.mxu0 }
 0x403   : > { %v1086_v26 = vpack.c.bf16 %v1083_v25, %v1081_v24 }
 0x405   : > { %2998 = vmatmul.msk.bf16.vlgmr.msra.gmra.mxu3 %vm995_vm10, %v1086_v26  ;;  %v1515_v26 = vsel %vm931_vm3, %v3015_v23, 0 }
 0x40a   : > { %v1177_v27 = vpop.f32.mrf.mxu0 }
 0x40b   : > { %v1182_v28 = vmul.f32 0.35355338, %v1177_v27  ;;  %v3122_v27 = vld [vmem:[%s3428_s23 + $0x2] ss:$0 sm:$0xff] }
 0x40d   : > { %v1184_v29 = vsel %vm1018_vm11, %v1182_v28, -inf }
 0x40e   : > { %1185 = vmax.xlane.f32.xlu2 %v1184_v29 }
 0x412   : > { %v1179_v30 = vpop.f32.mrf.mxu0 }
 0x413   : > { %v1183_v31 = vmul.f32 0.35355338, %v1179_v30 }
 0x415   : > { %v1187_v32 = vsel %vm1018_vm11, %v1183_v31, -inf }
 0x416   : > { %1188 = vmax.xlane.f32.xlu0 %v1187_v32 }
 0x41a   : > { %v1314_v18 = vpop.f32.mrf.mxu0 }
 0x41b   : > { %v1315_v30 = vadd.f32 %v3122_v27, %v1314_v18 }
 0x422   : > { %v1316_v25 = vpop.f32.mrf.mxu0 }
 0x423   : > { %v1317_v29 = vadd.f32 %v3122_v27, %v1316_v25 }
 0x481   : > { %v1186_v33 = vpop.xlane.xlu2 %1185 }
 0x482   : > { %v1190_v34 = vsub.f32 %v1182_v28, %v1186_v33 }
 0x484   : > { %v1192_v35 = vmul.f32 1.442695, %v1190_v34 }
 0x486   : > { %3159 = vpow2.f32 %v1192_v35 }
 0x488   : > { %v3592_v32 = vpop.f32.mrf.mxu3 }
 0x489   : > { %v1189_v36 = vpop.xlane.xlu0 %1188 }
 0x48a   : > { %v1191_v37 = vsub.f32 %v1183_v31, %v1189_v36  ;;  %v1367_v31 = vpack.c.bf16 %v1317_v29, %v1315_v30 }
 0x48c   : > { %v3160_v38 = vpop.eup %3159  ;;  %v1194_v39 = vmul.f32 1.442695, %v1191_v37 }
 0x48d   : > { %v1196_v40 = vsel %vm1018_vm11, %v3160_v38, 0.0 }
 0x48e   : > { %3161 = vpow2.f32 %v1194_v39  ;;  %1197 = vadd.xlane.f32.xlu1 %v1196_v40  ;;  %v3010_v39 = vld [vmem:[%s3966_s29 + $0x2] sm:$0x1] }
 0x48f   : > { %v1465_v40 = vsel %vm1257_vm6, %v3010_v39, 0 }
 0x490   : > { %v1292_v34 = vpop.f32.mrf.mxu3 }
 0x494   : > { %v3162_v41 = vpop.eup %3161 }
 0x495   : > { %v1199_v42 = vsel %vm1018_vm11, %v3162_v41, 0.0 }
 0x496   : > { %1200 = vadd.xlane.f32.xlu2 %v1199_v42 }
 0x501   : > { %v1198_v45 = vpop.xlane.xlu1 %1197 }
 0x502   : > { %3163 = vrcp.f32 %v1198_v45  ;;  %v1213_v54 = vand.u32 2147483648, %v1198_v45  ;;  %vm1207_vm8 = vweird.f32 %v1198_v45  ;;  %v1211_v55 = vand.u32 2147483647, %v1198_v45 }
 0x504   : > { %v1214_v61 = vor.u32 1.1754944e-38, %v1213_v54  ;;  %vm1212_vm13 = vcmp.eq.f32.partialorder %v1211_v55, 8.507059e+37 }
 0x508   : > { %v3164_v46 = vpop.eup %3163 }
 0x509   : > { %v1203_v47 = vmul.f32 %v3164_v46, %v1198_v45  ;;  %v1201_v48 = vpop.xlane.xlu2 %1200  ;;  %vm1208_vm7 = vweird.f32 %v3164_v46 }
 0x50a   : > { %3165 = vrcp.f32 %v1201_v48  ;;  %vm1209_vm9 = vmor %vm1207_vm8, %vm1208_vm7  ;;  %v1228_v57 = vand.u32 2147483648, %v1201_v48  ;;  %v1226_v60 = vand.u32 2147483647, %v1201_v48  ;;  %vm1222_vm14 = vweird.f32 %v1201_v48 }
 0x50b   : > { %v1204_v49 = vsub.f32 1.0, %v1203_v47 }
 0x50c   : > { %v1229_v1 = vor.u32 1.1754944e-38, %v1228_v57  ;;  %vm1227_vm0 = vcmp.eq.f32.partialorder %v1226_v60, 8.507059e+37 }
 0x50d   : > { %v1205_v50 = vmul.f32 %v3164_v46, %v1204_v49 }
 0x50f   : > { %v1206_v52 = vadd.f32 %v3164_v46, %v1205_v50 }
 0x510   : > { %v3166_v51 = vpop.eup %3165 }
 0x511   : > { %v1218_v53 = vmul.f32 %v3166_v51, %v1201_v48  ;;  %v1210_v58 = vsel %vm1209_vm9, %v3164_v46, %v1206_v52  ;;  %vm1223_vm12 = vweird.f32 %v3166_v51  ;;  %v3126_v52 = vld [vmem:[%s3439_s28 + $0x3] ss:$0 sm:$0xff] }
 0x512   : > { %v1215_v0 = vsel %vm1212_vm13, %v1214_v61, %v1210_v58  ;;  %vm1224_vm15 = vmor %vm1222_vm14, %vm1223_vm12 }
 0x513   : > { %v1219_v56 = vsub.f32 1.0, %v1218_v53  ;;  %v1216_v4 = vmul.f32 %v3160_v38, %v1215_v0  ;;  %v3124_v38 = vld [vmem:[%s3450_s0 + $0x2] ss:$0 sm:$0xff] }
 0x515   : > { %v1220_v59 = vmul.f32 %v3166_v51, %v1219_v56 }
 0x517   : > { %v1221_v62 = vadd.f32 %v3166_v51, %v1220_v59 }
 0x519   : > { %v1225_v2 = vsel %vm1224_vm15, %v3166_v51, %v1221_v62 }
 0x51a   : > { %v1230_v3 = vsel %vm1227_vm0, %v1229_v1, %v1225_v2 }
 0x51b   : > { %v1231_v5 = vmul.f32 %v3162_v41, %v1230_v3 }
 0x51d   : > { %v1232_v6 = vpack.c.bf16 %v1231_v5, %v1216_v4  ;;  %v3018_v5 = vld [vmem:[%s3444_s21 + $0xc] sm:$0xf] }
 0x51f   : > { %2995 = vmatmul.msk.bf16.vlgmr.msra.gmra.mxu1 %vm1018_vm11, %v1232_v6  ;;  %v1539_v6 = vsel %vm931_vm3, %v3018_v5, 0 }
 0x520   : > { %1474 = vmatpush.bf16.msra.mxu1 %v1465_v40 }
 0x52f   : > { %3004 = vmatmul.msk.bf16.vlgmr.msrb.gmra.mxu1 %vm860_vm1, %v3526_v63 }
 0x59c   : > { %v1246_v11 = vpop.f32.mrf.mxu1 }
 0x5a4   : > { %v1248_v13 = vpop.f32.mrf.mxu1 }
 0x5a5   : > { %v1251_v15 = vpack.c.bf16 %v1248_v13, %v1246_v11 }
 0x5a7   : > { %2997 = vmatmul.msk.bf16.vlgmr.msra.gmra.mxu2 %vm995_vm10, %v1251_v15 }
 0x5a8   : > { %1500 = vmatpush.bf16.msra.mxu2 %v1491_v16 }
 0x5ac   : > { %v1338_v17 = vpop.f32.mrf.mxu1 }
 0x5ad   : > { %v1339_v21 = vadd.f32 %v3123_v19, %v1338_v17 }
 0x5b4   : > { %v1340_v20 = vpop.f32.mrf.mxu1 }
 0x5b5   : > { %v1341_v22 = vadd.f32 %v3123_v19, %v1340_v20 }
 0x5b7   : > { %v1368_v24 = vpack.c.bf16 %v1341_v22, %v1339_v21  ;;  %3007 = vmatmul.msk.bf16.vlgmr.msrb.gmra.mxu2 %vm860_vm1, %v3526_v63 }
 0x5b9   : > { %v1373_v28 = vsel %vm995_vm10, %v1368_v24, 0 }
 0x5ba   : > { %1382 = vmatpush.bf16.xpose.msrb.mxu3 %v1373_v28 }
 0x5c1   : > { %3008 = vmatmul.msk.bf16.vlgmr.msrb.gmra.mxu3 %vm995_vm10, %v1367_v31 }
 0x5c2   : > { %1524 = vmatpush.bf16.msra.mxu3 %v1515_v26 }
 0x5c7   : > { %3014 = vmatmul.msk.bf16.vlgmr.msra.gmra.mxu2 %vm860_vm1, %v3526_v63 }
 0x5d1   : > { %3017 = vmatmul.msk.bf16.vlgmr.msra.gmra.mxu3 %vm860_vm1, %v3526_v63 }
 0x62a   : > { %v3594_v33 = vpop.f32.mrf.mxu2 }
 0x632   : > { %v1272_v35 = vpop.f32.mrf.mxu2 }
 0x633   : > { %v3596_v36 = vadd.f32 %v1292_v34, %v1272_v35 }
 0x63a   : > { %v1362_v37 = vpop.f32.mrf.mxu2 }
 0x63b   : > { %v1363_v42 = vadd.f32 %v3124_v38, %v1362_v37 }
 0x642   : > { %v1364_v41 = vpop.f32.mrf.mxu2 }
 0x643   : > { %v1365_v43 = vadd.f32 %v3124_v38, %v1364_v41 }
 0x644   : > { %v1384_v44 = vpop.f32.mrf.mxu3 }
 0x645   : > { %v1440_v45 = vpack.c.bf16 %v1365_v43, %v1363_v42  ;;  %v1389_v46 = vmul.f32 0.35355338, %v1384_v44  ;;  %v3125_v42 = vld [vmem:[%s3428_s23 + $0x3] ss:$0 sm:$0xff] }
 0x646   : > { %v3127_v44 = vld [vmem:[%s3450_s0 + $0x3] ss:$0 sm:$0xff] }
 0x647   : > { %1451 = vmatpush.bf16.msra.mxu0 %v1440_v45  ;;  %v1391_v47 = vsel %vm1018_vm11, %v1389_v46, -inf }
 0x648   : > { %1392 = vmax.xlane.f32.xlu0 %v1391_v47 }
 0x64a   : > { %v1502_v37 = vpop.f32.mrf.mxu2 }
 0x64b   : > { %1548 = vmatpush.bf16.msrb.mxu0 %v1539_v6  ;;  %v1503_v45 = vadd.f32 %v3125_v42, %v1502_v37 }
 0x64c   : > { %v1386_v48 = vpop.f32.mrf.mxu3 }
 0x64d   : > { %v1390_v49 = vmul.f32 0.35355338, %v1386_v48 }
 0x64f   : > { %v1394_v50 = vsel %vm1018_vm11, %v1390_v49, -inf }
 0x650   : > { %1395 = vmax.xlane.f32.xlu1 %v1394_v50 }
 0x652   : > { %v1504_v41 = vpop.f32.mrf.mxu2 }
 0x653   : > { %v1505_v43 = vadd.f32 %v3125_v42, %v1504_v41 }
 0x654   : > { %v1526_v51 = vpop.f32.mrf.mxu3 }
 0x655   : > { %v1527_v54 = vadd.f32 %v3126_v52, %v1526_v51  ;;  %v1555_v47 = vpack.c.bf16 %v1505_v43, %v1503_v45  ;;  %v3128_v43 = vld [vmem:[%s3462_s17] ss:$0 sm:$0xff] }
 0x65c   : > { %v1528_v53 = vpop.f32.mrf.mxu3 }
 0x65d   : > { %v1529_v55 = vadd.f32 %v3126_v52, %v1528_v53 }
 0x65f   : > { %v1556_v56 = vpack.c.bf16 %v1529_v55, %v1527_v54 }
 0x661   : > { %v1561_v57 = vsel %vm995_vm10, %v1556_v56, 0 }
 0x662   : > { %1570 = vmatpush.bf16.xpose.msrb.mxu1 %v1561_v57 }
 0x6bb   : > { %v1393_v58 = vpop.xlane.xlu0 %1392 }
 0x6bc   : > { %v1397_v59 = vsub.f32 %v1389_v46, %v1393_v58 }
 0x6be   : > { %v1399_v60 = vmul.f32 1.442695, %v1397_v59 }
 0x6c0   : > { %3167 = vpow2.f32 %v1399_v60 }
 0x6c3   : > { %v1396_v61 = vpop.xlane.xlu1 %1395 }
 0x6c4   : > { %v1398_v62 = vsub.f32 %v1390_v49, %v1396_v61 }
 0x6c6   : > { %v3168_v0 = vpop.eup %3167  ;;  %v1401_v1 = vmul.f32 1.442695, %v1398_v62 }
 0x6c7   : > { %v1403_v2 = vsel %vm1018_vm11, %v3168_v0, 0.0 }
 0x6c8   : > { %3169 = vpow2.f32 %v1401_v1  ;;  %1404 = vadd.xlane.f32.xlu2 %v1403_v2 }
 0x6ce   : > { %v3170_v3 = vpop.eup %3169 }
 0x6cf   : > { %v1406_v4 = vsel %vm1018_vm11, %v3170_v3, 0.0 }
 0x6d0   : > { %1407 = vadd.xlane.f32.xlu0 %v1406_v4 }
 0x73b   : > { %v1405_v7 = vpop.xlane.xlu2 %1404 }
 0x73c   : > { %3171 = vrcp.f32 %v1405_v7  ;;  %v1420_v17 = vand.u32 2147483648, %v1405_v7  ;;  %vm1414_vm4 = vweird.f32 %v1405_v7  ;;  %v1418_v18 = vand.u32 2147483647, %v1405_v7 }
 0x73e   : > { %v1421_v24 = vor.u32 1.1754944e-38, %v1420_v17  ;;  %vm1419_vm8 = vcmp.eq.f32.partialorder %v1418_v18, 8.507059e+37 }
 0x742   : > { %v3172_v8 = vpop.eup %3171 }
 0x743   : > { %v1410_v9 = vmul.f32 %v3172_v8, %v1405_v7  ;;  %v1408_v10 = vpop.xlane.xlu0 %1407  ;;  %vm1415_vm2 = vweird.f32 %v3172_v8 }
 0x744   : > { %3173 = vrcp.f32 %v1408_v10  ;;  %vm1416_vm5 = vmor %vm1414_vm4, %vm1415_vm2  ;;  %v1435_v20 = vand.u32 2147483648, %v1408_v10  ;;  %v1433_v23 = vand.u32 2147483647, %v1408_v10  ;;  %vm1429_vm9 = vweird.f32 %v1408_v10 }
 0x745   : > { %v1411_v11 = vsub.f32 1.0, %v1410_v9 }
 0x746   : > { %v1436_v27 = vor.u32 1.1754944e-38, %v1435_v20  ;;  %vm1434_vm13 = vcmp.eq.f32.partialorder %v1433_v23, 8.507059e+37 }
 0x747   : > { %v1412_v12 = vmul.f32 %v3172_v8, %v1411_v11 }
 0x749   : > { %v1413_v15 = vadd.f32 %v3172_v8, %v1412_v12 }
 0x74a   : > { %v3174_v13 = vpop.eup %3173 }
 0x74b   : > { %v1425_v16 = vmul.f32 %v3174_v13, %v1408_v10  ;;  %v1417_v21 = vsel %vm1416_vm5, %v3172_v8, %v1413_v15  ;;  %vm1430_vm7 = vweird.f32 %v3174_v13 }
 0x74c   : > { %v1422_v26 = vsel %vm1419_vm8, %v1421_v24, %v1417_v21  ;;  %vm1431_vm12 = vmor %vm1429_vm9, %vm1430_vm7 }
 0x74d   : > { %v1426_v19 = vsub.f32 1.0, %v1425_v16  ;;  %v1423_v30 = vmul.f32 %v3168_v0, %v1422_v26 }
 0x74f   : > { %v1427_v22 = vmul.f32 %v3174_v13, %v1426_v19 }
 0x751   : > { %v1428_v25 = vadd.f32 %v3174_v13, %v1427_v22 }
 0x753   : > { %v1432_v28 = vsel %vm1431_vm12, %v3174_v13, %v1428_v25 }
 0x754   : > { %v1437_v29 = vsel %vm1434_vm13, %v1436_v27, %v1432_v28 }
 0x755   : > { %v1438_v31 = vmul.f32 %v3170_v3, %v1437_v29 }
 0x757   : > { %v1439_v34 = vpack.c.bf16 %v1438_v31, %v1423_v30  ;;  %v3023_v31 = vld [vmem:[%s3966_s29 + $0x3] sm:$0x1] }
 0x759   : > { %3009 = vmatmul.msk.bf16.vlgmr.msra.gmra.mxu0 %vm1018_vm11, %v1439_v34  ;;  %v1653_v34 = vsel %vm1257_vm6, %v3023_v31, 0 }
 0x75a   : > { %1662 = vmatpush.bf16.msrb.mxu3 %v1653_v34 }
 0x769   : > { %3020 = vmatmul.msk.bf16.vlgmr.msrb.gmra.mxu0 %vm860_vm1, %v3526_v63  ;;  %v1291_v63 = vadd.f32 %v3592_v32, %v3594_v33 }
 0x7d6   : > { %v1453_v35 = vpop.f32.mrf.mxu0 }
 0x7de   : > { %v1455_v38 = vpop.f32.mrf.mxu0 }
 0x7df   : > { %v1458_v39 = vpack.c.bf16 %v1455_v38, %v1453_v35  ;;  %v1813_v35 = vld [vmem:[#allocation2 + $0x10] sm:$0xff] }
 0x7e0   : > { %v1815_v37 = vsel %vm860_vm1, %v1813_v35, 0.0 }
 0x7e1   : > { %3011 = vmatmul.msk.bf16.vlgmr.msra.gmra.mxu1 %vm995_vm10, %v1458_v39 }
 0x7e6   : > { %v1550_v40 = vpop.f32.mrf.mxu0 }
 0x7e7   : > { %v1551_v48 = vadd.f32 %v3127_v44, %v1550_v40 }
 0x7ee   : > { %v1552_v46 = vpop.f32.mrf.mxu0 }
 0x7ef   : > { %v1553_v49 = vadd.f32 %v3127_v44, %v1552_v46  ;;  %v3235_v44 = vld [vmem:[#allocation2] sm:$0xff] }
 0x7f1   : > { %v1628_v50 = vpack.c.bf16 %v1553_v49, %v1551_v48  ;;  %3021 = vmatmul.msk.bf16.vlgmr.msrb.gmra.mxu1 %vm995_vm10, %v1555_v47 }
 0x7f3   : > { %1639 = vmatpush.bf16.msrb.mxu2 %v1628_v50 }
 0x85e   : > { %v1476_v51 = vpop.f32.mrf.mxu1 }
 0x85f   : > { %v3618_v52 = vadd.f32 %v1476_v51, %v1291_v63  ;;  %v1814_v51 = vld [vmem:[#allocation2 + $0x18] sm:$0xff] }
 0x866   : > { %v1478_v53 = vpop.f32.mrf.mxu1 }
 0x867   : > { %v3621_v54 = vadd.f32 %v1478_v53, %v3596_v36  ;;  %v3236_v53 = vld [vmem:[#allocation2 + $0x8] sm:$0xff] }
 0x86e   : > { %v1572_v55 = vpop.f32.mrf.mxu1 }
 0x86f   : > { %v1577_v56 = vmul.f32 0.35355338, %v1572_v55 }
 0x871   : > { %v1579_v57 = vsel %vm1018_vm11, %v1577_v56, -inf }
 0x872   : > { %1580 = vmax.xlane.f32.xlu1 %v1579_v57  ;;  %v1818_v57 = vsel %vm860_vm1, %v1814_v51, 0.0 }
 0x876   : > { %v1574_v58 = vpop.f32.mrf.mxu1 }
 0x877   : > { %v1578_v59 = vmul.f32 0.35355338, %v1574_v58 }
 0x879   : > { %v1582_v60 = vsel %vm1018_vm11, %v1578_v59, -inf }
 0x87a   : > { %1583 = vmax.xlane.f32.xlu2 %v1582_v60 }
 0x8e5   : > { %v1581_v61 = vpop.xlane.xlu1 %1580 }
 0x8e6   : > { %v1585_v62 = vsub.f32 %v1577_v56, %v1581_v61 }
 0x8e8   : > { %v1587_v32 = vmul.f32 1.442695, %v1585_v62 }
 0x8ea   : > { %3175 = vpow2.f32 %v1587_v32 }
 0x8ed   : > { %v1584_v33 = vpop.xlane.xlu2 %1583 }
 0x8ee   : > { %v1586_v0 = vsub.f32 %v1578_v59, %v1584_v33 }
 0x8f0   : > { %v3176_v1 = vpop.eup %3175  ;;  %v1589_v2 = vmul.f32 1.442695, %v1586_v0 }
 0x8f1   : > { %v1591_v36 = vsel %vm1018_vm11, %v3176_v1, 0.0 }
 0x8f2   : > { %3177 = vpow2.f32 %v1589_v2  ;;  %1592 = vadd.xlane.f32.xlu0 %v1591_v36 }
 0x8f8   : > { %v3178_v3 = vpop.eup %3177 }
 0x8f9   : > { %v1594_v4 = vsel %vm1018_vm11, %v3178_v3, 0.0 }
 0x8fa   : > { %1595 = vadd.xlane.f32.xlu1 %v1594_v4 }
 0x902   : > { %1816 = vadd.xlane.f32.xlu1 %v1815_v37 }
 0x965   : > { %v1593_v5 = vpop.xlane.xlu0 %1592 }
 0x966   : > { %3179 = vrcp.f32 %v1593_v5  ;;  %v1608_v15 = vand.u32 2147483648, %v1593_v5  ;;  %vm1602_vm15 = vweird.f32 %v1593_v5  ;;  %v1606_v16 = vand.u32 2147483647, %v1593_v5 }
 0x968   : > { %v1609_v22 = vor.u32 1.1754944e-38, %v1608_v15  ;;  %vm1607_vm4 = vcmp.eq.f32.partialorder %v1606_v16, 8.507059e+37 }
 0x96c   : > { %v3180_v6 = vpop.eup %3179 }
 0x96d   : > { %v1598_v7 = vmul.f32 %v3180_v6, %v1593_v5  ;;  %v1596_v8 = vpop.xlane.xlu1 %1595  ;;  %vm1603_vm14 = vweird.f32 %v3180_v6 }
 0x96e   : > { %3181 = vrcp.f32 %v1596_v8  ;;  %vm1604_vm0 = vmor %vm1602_vm15, %vm1603_vm14  ;;  %v1623_v18 = vand.u32 2147483648, %v1596_v8  ;;  %v1621_v21 = vand.u32 2147483647, %v1596_v8  ;;  %vm1617_vm5 = vweird.f32 %v1596_v8 }
 0x96f   : > { %v1599_v9 = vsub.f32 1.0, %v1598_v7 }
 0x970   : > { %v1624_v25 = vor.u32 1.1754944e-38, %v1623_v18  ;;  %vm1622_vm8 = vcmp.eq.f32.partialorder %v1621_v21, 8.507059e+37  ;;  %v1864_v18 = vld [vmem:[%s3963_s6] sm:$0xf] }
 0x971   : > { %v1600_v10 = vmul.f32 %v3180_v6, %v1599_v9  ;;  %v1873_v21 = vsel %vm931_vm3, %v1864_v18, 0 }
 0x972   : > { %1882 = vmatpush.bf16.msra.mxu2 %v1873_v21 }
 0x973   : > { %v1601_v12 = vadd.f32 %v3180_v6, %v1600_v10 }
 0x974   : > { %v3182_v11 = vpop.eup %3181 }
 0x975   : > { %v1613_v13 = vmul.f32 %v3182_v11, %v1596_v8  ;;  %v1605_v19 = vsel %vm1604_vm0, %v3180_v6, %v1601_v12  ;;  %vm1618_vm2 = vweird.f32 %v3182_v11  ;;  %v1817_v47 = vpop.xlane.xlu1 %1816 }
 0x976   : > { %v1610_v24 = vsel %vm1607_vm4, %v1609_v22, %v1605_v19  ;;  %vm1619_vm7 = vmor %vm1617_vm5, %vm1618_vm2  ;;  %v1821_v63 = vmul.f32 %v1817_v47, %v3506_v14  ;;  %v1889_v22 = vld [vmem:[%s3433_s19] sm:$0xf] }
 0x977   : > { %v1614_v17 = vsub.f32 1.0, %v1613_v13  ;;  %v1611_v28 = vmul.f32 %v3176_v1, %v1610_v24 }
 0x979   : > { %v1615_v20 = vmul.f32 %v3182_v11, %v1614_v17  ;;  %v853_v17 = vld [vmem:[%s820_s4] sm:$0xf] }
 0x97b   : > { %v1616_v23 = vadd.f32 %v3182_v11, %v1615_v20  ;;  %v3679_v20 = vsel %vm931_vm3, %v853_v17, 0 }
 0x97c   : > { %1749 = vmatpush.bf16.msra.mxu0 %v3679_v20 }
 0x97d   : > { %v1620_v26 = vsel %vm1619_vm7, %v3182_v11, %v1616_v23  ;;  %v1895_v23 = vsel %vm931_vm3, %v1889_v22, 0  ;;  %v3733_v22 = vld [vmem:[%s3485_s10] sm:$0xff] }
 0x97e   : > { %v1625_v27 = vsel %vm1622_vm8, %v1624_v25, %v1620_v26  ;;  %1904 = vmatpush.bf16.msra.mxu3 %v1895_v23  ;;  %v3741_v23 = vld [vmem:[%s823_s24] ss:$0 sm:$0xff] }
 0x97f   : > { %v1626_v29 = vmul.f32 %v3178_v3, %v1625_v27  ;;  %v1911_v27 = vld [vmem:[%s3444_s21] sm:$0xf] }
 0x980   : > { %v1917_v31 = vsel %vm931_vm3, %v1911_v27, 0 }
 0x981   : > { %v1627_v30 = vpack.c.bf16 %v1626_v29, %v1611_v28  ;;  %v3040_v28 = vld [vmem:[%s3963_s6 + $0x4] sm:$0xf]  ;;  %1926 = vmatpush.bf16.msrb.mxu0 %v1917_v31 }
 0x982   : > { %v2032_v34 = vsel %vm931_vm3, %v3040_v28, 0 }
 0x983   : > { %3022 = vmatmul.msk.bf16.vlgmr.msrb.gmra.mxu2 %vm1018_vm11, %v1627_v30 }
 0xa06   : > { %v1641_v38 = vpop.f32.mrf.mxu2 }
 0xa0e   : > { %v1643_v39 = vpop.f32.mrf.mxu2 }
 0xa0f   : > { %v1646_v40 = vpack.c.bf16 %v1643_v39, %v1641_v38 }
 0xa11   : > { %3024 = vmatmul.msk.bf16.vlgmr.msrb.gmra.mxu3 %vm995_vm10, %v1646_v40 }
 0xa12   : > { %2041 = vmatpush.bf16.msrb.mxu3 %v2032_v34 }
 0xa94   : > { %v1664_v41 = vpop.f32.mrf.mxu3 }
 0xa95   : > { %v1669_v42 = vadd.f32 %v1664_v41, %v3618_v52  ;;  %v3642_v52 = vsub.f32 %v1813_v35, %v1821_v63 }
 0xa97   : > { %v1671_v45 = vadd.f32 %v3235_v44, %v1669_v42  ;;  %v1825_v59 = vmul.f32 %v3642_v52, %v3642_v52 }
 0xa99   : > { %v3634_v46 = vadd.f32 %v3128_v43, %v1671_v45 }
 0xa9b   : > { %v1678_v48 = vsel %vm860_vm1, %v3634_v46, 0.0 }
 0xa9c   : > { %v1666_v49 = vpop.f32.mrf.mxu3  ;;  %1679 = vadd.xlane.f32.xlu2 %v1678_v48 }
 0xa9d   : > { %v1670_v50 = vadd.f32 %v1666_v49, %v3621_v54  ;;  %v1827_v54 = vsel %vm860_vm1, %v1825_v59, 0.0 }
 0xa9f   : > { %v1672_v55 = vadd.f32 %v3236_v53, %v1670_v50 }
 0xaa1   : > { %v3640_v56 = vadd.f32 %v3128_v43, %v1672_v55 }
 0xaa3   : > { %v1681_v58 = vsel %vm860_vm1, %v3640_v56, 0.0 }
 0xaa4   : > { %1682 = vadd.xlane.f32.xlu0 %v1681_v58  ;;  %1819 = vadd.xlane.f32.xlu2 %v1818_v57 }
 0xaac   : > { %1828 = vadd.xlane.f32.xlu2 %v1827_v54 }
 0xb0f   : > { %v1680_v60 = vpop.xlane.xlu2 %1679 }
 0xb10   : > { %v1684_v61 = vmul.f32 %v1680_v60, %v3506_v14 }
 0xb12   : > { %v3652_v62 = vsub.f32 %v3634_v46, %v1684_v61  ;;  %v3129_v61 = vld [vmem:[%s3468_s3] ss:$0 sm:$0xff] }
 0xb14   : > { %v1688_v32 = vmul.f32 %v3652_v62, %v3652_v62 }
 0xb16   : > { %v1690_v33 = vsel %vm860_vm1, %v1688_v32, 0.0 }
 0xb17   : > { %v1683_v0 = vpop.xlane.xlu0 %1682  ;;  %1691 = vadd.xlane.f32.xlu0 %v1690_v33  ;;  %v1820_v1 = vpop.xlane.xlu2 %1819 }
 0xb18   : > { %v1685_v2 = vmul.f32 %v1683_v0, %v3506_v14  ;;  %v1822_v36 = vmul.f32 %v1820_v1, %v3506_v14 }
 0xb1a   : > { %v3660_v3 = vsub.f32 %v3640_v56, %v1685_v2  ;;  %v3662_v4 = vsub.f32 %v1814_v51, %v1822_v36 }
 0xb1c   : > { %v1689_v5 = vmul.f32 %v3660_v3, %v3660_v3  ;;  %v1826_v6 = vmul.f32 %v3662_v4, %v3662_v4 }
 0xb1e   : > { %v1693_v7 = vsel %vm860_vm1, %v1689_v5, 0.0  ;;  %v1830_v8 = vsel %vm860_vm1, %v1826_v6, 0.0  ;;  %v3705_v5 = vld [vmem:[%s816_s2] ss:$0 sm:$0xff] }
 0xb1f   : > { %1694 = vadd.xlane.f32.xlu1 %v1693_v7  ;;  %1831 = vadd.xlane.f32.xlu0 %v1830_v8  ;;  %v1829_v9 = vpop.xlane.xlu2 %1828  ;;  %v3237_v8 = vld [vmem:[%s3964_s18] ss:$0 sm:$0xff] }
 0xb20   : > { %v1833_v10 = vmul.f32 %v1829_v9, %v3506_v14 }
 0xb22   : > { %v1835_v11 = vadd.f32 1e-05, %v1833_v10 }
 0xb24   : > { %3183 = vrsqrt.f32 %v1835_v11  ;;  %vm1843_vm9 = vweird.f32 %v1835_v11 }
 0xb2a   : > { %v3184_v13 = vpop.eup %3183 }
 0xb2b   : > { %v1838_v19 = vmul.f32 %v3184_v13, %v1835_v11  ;;  %vm1844_vm12 = vweird.f32 %v3184_v13 }
 0xb2c   : > { %vm3691_vm14 = vmor %vm1843_vm9, %vm1844_vm12  ;;  %vm1790_vm12 = vcmask 261120  }
 0xb2d   : > { %v1839_v24 = vmul.f32 %v3184_v13, %v1838_v19 }
 0xb2f   : > { %v1840_v40 = vmul.f32 0.5, %v1839_v24 }
 0xb31   : > { %v1841_v43 = vsub.f32 1.5, %v1840_v40 }
 0xb33   : > { %v1842_v50 = vmul.f32 %v3184_v13, %v1841_v43 }
 0xb35   : > { %v1846_v59 = vsel %vm3691_vm14, %v3184_v13, %v1842_v50 }
 0xb36   : > { %v1857_v0 = vmul.f32 %v1846_v59, %v3642_v52 }
 0xb38   : > { %v1859_v52 = vmul.f32 %v3237_v8, %v1857_v0 }
 0xb8a   : > { %v1692_v12 = vpop.xlane.xlu0 %1691 }
 0xb8b   : > { %v1696_v15 = vmul.f32 %v1692_v12, %v3506_v14 }
 0xb8d   : > { %v1698_v16 = vadd.f32 1e-05, %v1696_v15  ;;  %v3043_v15 = vld [vmem:[%s3433_s19 + $0x4] sm:$0xf] }
 0xb8e   : > { %v2054_v21 = vsel %vm931_vm3, %v3043_v15, 0 }
 0xb8f   : > { %3185 = vrsqrt.f32 %v1698_v16  ;;  %vm1706_vm15 = vweird.f32 %v1698_v16 }
 0xb92   : > { %v1695_v25 = vpop.xlane.xlu1 %1694  ;;  %v1832_v26 = vpop.xlane.xlu0 %1831 }
 0xb93   : > { %v1697_v29 = vmul.f32 %v1695_v25, %v3506_v14  ;;  %v1834_v30 = vmul.f32 %v1832_v26, %v3506_v14 }
 0xb95   : > { %v3186_v35 = vpop.eup %3185  ;;  %v1699_v37 = vadd.f32 1e-05, %v1697_v29  ;;  %v1836_v38 = vadd.f32 1e-05, %v1834_v30 }
 0xb96   : > { %v1701_v39 = vmul.f32 %v3186_v35, %v1698_v16  ;;  %vm1707_vm13 = vweird.f32 %v3186_v35  ;;  %v3238_v16 = vld [vmem:[%s3965_s7] ss:$0 sm:$0xff] }
 0xb97   : > { %3187 = vrsqrt.f32 %v1699_v37  ;;  %vm1708_vm0 = vmor %vm1706_vm15, %vm1707_vm13  ;;  %vm1853_vm2 = vweird.f32 %v1836_v38  ;;  %vm1716_vm7 = vweird.f32 %v1699_v37  ;;  %v1861_v17 = vadd.f32 %v3238_v16, %v1859_v52 }
 0xb98   : > { %v1702_v41 = vmul.f32 %v3186_v35, %v1701_v39  ;;  %3189 = vrsqrt.f32 %v1836_v38 }
 0xb9a   : > { %v1703_v42 = vmul.f32 0.5, %v1702_v41 }
 0xb9c   : > { %v1704_v44 = vsub.f32 1.5, %v1703_v42 }
 0xb9d   : > { %v3188_v45 = vpop.eup %3187 }
 0xb9e   : > { %v3190_v47 = vpop.eup %3189  ;;  %v1705_v48 = vmul.f32 %v3186_v35, %v1704_v44  ;;  %v1711_v49 = vmul.f32 %v3188_v45, %v1699_v37  ;;  %vm1717_vm5 = vweird.f32 %v3188_v45 }
 0xb9f   : > { %v1848_v63 = vmul.f32 %v3190_v47, %v1836_v38  ;;  %vm1854_vm4 = vweird.f32 %v3190_v47  ;;  %vm1718_vm9 = vmor %vm1716_vm7, %vm1717_vm5  ;;  %v3133_v38 = vld [vmem:[%s3439_s28] ss:$0 sm:$0xff] }
 0xba0   : > { %v1712_v53 = vmul.f32 %v3188_v45, %v1711_v49  ;;  %v1709_v57 = vsel %vm1708_vm0, %v3186_v35, %v1705_v48  ;;  %vm1855_vm8 = vmor %vm1853_vm2, %vm1854_vm4 }
 0xba1   : > { %v1849_v55 = vmul.f32 %v3190_v47, %v1848_v63  ;;  %v1720_v32 = vmul.f32 %v1709_v57, %v3652_v62  ;;  %v3134_v63 = vld [vmem:[%s3450_s0] ss:$0 sm:$0xff] }
 0xba2   : > { %v1713_v58 = vmul.f32 0.5, %v1712_v53 }
 0xba3   : > { %v1850_v54 = vmul.f32 0.5, %v1849_v55  ;;  %v1725_v6 = vmul.f32 %v3129_v61, %v1720_v32  ;;  %v3046_v32 = vld [vmem:[%s3444_s21 + $0x4] sm:$0xf] }
 0xba4   : > { %v1714_v60 = vsub.f32 1.5, %v1713_v58 }
 0xba5   : > { %v1851_v33 = vsub.f32 1.5, %v1850_v54  ;;  %v1730_v12 = vadd.f32 %v3705_v5, %v1725_v6  ;;  %v2076_v6 = vsel %vm931_vm3, %v3046_v32, 0 }
 0xba6   : > { %v1715_v1 = vmul.f32 %v3188_v45, %v1714_v60 }
 0xba7   : > { %v1852_v2 = vmul.f32 %v3190_v47, %v1851_v33 }
 0xba8   : > { %v1719_v36 = vsel %vm1718_vm9, %v3188_v45, %v1715_v1 }
 0xba9   : > { %v1721_v62 = vmul.f32 %v1719_v36, %v3660_v3  ;;  %v1856_v7 = vsel %vm1855_vm8, %v3190_v47, %v1852_v2 }
 0xbaa   : > { %v1858_v9 = vmul.f32 %v1856_v7, %v3662_v4  ;;  %v3729_v4 = vld [vmem:[%s3485_s10 + $0x8] sm:$0xff] }
 0xbab   : > { %v1726_v10 = vmul.f32 %v3129_v61, %v1721_v62  ;;  %1800 = vmatpush.bf16.msra.mxu1 %v3729_v4  ;;  %v3136_v62 = vld [vmem:[%s3439_s28 + $0x1] ss:$0 sm:$0xff] }
 0xbac   : > { %v1860_v11 = vmul.f32 %v3237_v8, %v1858_v9 }
 0xbad   : > { %v1731_v13 = vadd.f32 %v3705_v5, %v1726_v10 }
 0xbae   : > { %v1862_v18 = vadd.f32 %v3238_v16, %v1860_v11  ;;  %v3132_v11 = vld [vmem:[%s3428_s23] ss:$0 sm:$0xff] }
 0xbaf   : > { %v1732_v19 = vpack.c.bf16 %v1731_v13, %v1730_v12  ;;  %1801 = vmatpush.bf16.msra.mxu1 %v3733_v22 }
 0xbb0   : > { %v3714_v3 = vpack.c.bf16 %v1862_v18, %v1861_v17  ;;  %v3762_v17 = vld [vmem:[%s831_s11] ss:$0 sm:$0xff] }
 0xbb1   : > { %3025 = vmatmul.msk.bf16.vlgmr.msra.gmra.mxu0 %vm860_vm1, %v1732_v19 }
 0xbb2   : > { %3035 = vmatmul.msk.bf16.vlgmr.msra.gmra.mxu2 %vm860_vm1, %v3714_v3  ;;  %3036 = vmatmul.msk.bf16.vlgmr.msra.gmra.mxu3 %vm860_vm1, %v3714_v3 }
 0xbb3   : > { %2063 = vmatpush.bf16.msra.mxu0 %v2054_v21 }
 0xbc1   : > { %3037 = vmatmul.msk.bf16.vlgmr.msrb.gmra.mxu0 %vm860_vm1, %v3714_v3 }
 0xbc2   : > { %3042 = vmatmul.msk.bf16.vlgmr.msrb.gmra.mxu3 %vm860_vm1, %v3714_v3 }
 0xbd1   : > { %3045 = vmatmul.msk.bf16.vlgmr.msra.gmra.mxu0 %vm860_vm1, %v3714_v3 }
 0xc2e   : > { %v1751_v24 = vpop.f32.mrf.mxu0 }
 0xc2f   : > { %v1752_v25 = vadd.f32 %v3741_v23, %v1751_v24 }
 0xc31   : > { %v1756_v26 = vmul.f32 %v1752_v25, %v1752_v25 }
 0xc33   : > { %v1758_v27 = vmul.f32 %v1756_v26, %v1752_v25 }
 0xc35   : > { %v1760_v28 = vmul.f32 0.044715, %v1758_v27  ;;  %v1906_v29 = vpop.f32.mrf.mxu3  ;;  %v1884_v2 = vpop.f32.mrf.mxu2 }
 0xc36   : > { %v1753_v30 = vpop.f32.mrf.mxu0  ;;  %v1907_v42 = vadd.f32 %v3133_v38, %v1906_v29  ;;  %v1885_v15 = vadd.f32 %v3132_v11, %v1884_v2 }
 0xc37   : > { %v1762_v31 = vadd.f32 %v1760_v28, %v1752_v25  ;;  %v1754_v34 = vadd.f32 %v3741_v23, %v1753_v30 }
 0xc39   : > { %v1764_v35 = vmul.f32 0.7978846, %v1762_v31  ;;  %v1757_v37 = vmul.f32 %v1754_v34, %v1754_v34 }
 0xc3b   : > { %v1759_v39 = vmul.f32 %v1757_v37, %v1754_v34  ;;  %3191 = vtanh.f32 %v1764_v35  ;;  %v3138_v35 = vld [vmem:[%s3450_s0 + $0x1] ss:$0 sm:$0xff] }
 0xc3d   : > { %v1761_v40 = vmul.f32 0.044715, %v1759_v39  ;;  %v1908_v41 = vpop.f32.mrf.mxu3  ;;  %v1886_v9 = vpop.f32.mrf.mxu2 }
 0xc3e   : > { %v1909_v43 = vadd.f32 %v3133_v38, %v1908_v41  ;;  %v1928_v44 = vpop.f32.mrf.mxu0  ;;  %v1887_v13 = vadd.f32 %v3132_v11, %v1886_v9 }
 0xc3f   : > { %v1763_v45 = vadd.f32 %v1761_v40, %v1754_v34  ;;  %v1929_v55 = vadd.f32 %v3134_v63, %v1928_v44 }
 0xc40   : > { %v1934_v47 = vpack.c.bf16 %v1909_v43, %v1907_v42  ;;  %v1933_v16 = vpack.c.bf16 %v1887_v13, %v1885_v15 }
 0xc41   : > { %v1765_v48 = vmul.f32 0.7978846, %v1763_v45  ;;  %v3192_v50 = vpop.eup %3191 }
 0xc42   : > { %v1939_v49 = vsel %vm995_vm10, %v1934_v47, 0  ;;  %v1768_v51 = vadd.f32 1.0, %v3192_v50 }
 0xc43   : > { %3193 = vtanh.f32 %v1765_v48  ;;  %1948 = vmatpush.bf16.xpose.msrb.mxu1 %v1939_v49 }
 0xc44   : > { %v1770_v54 = vmul.f32 0.5, %v1768_v51 }
 0xc45   : > { %v2043_v13 = vpop.f32.mrf.mxu3 }
 0xc46   : > { %v1930_v53 = vpop.f32.mrf.mxu0  ;;  %v1772_v33 = vmul.f32 %v1770_v54, %v1752_v25 }
 0xc47   : > { %v1931_v57 = vadd.f32 %v3134_v63, %v1930_v53 }
 0xc49   : > { %v3194_v58 = vpop.eup %3193  ;;  %v2006_v59 = vpack.c.bf16 %v1931_v57, %v1929_v55 }
 0xc4a   : > { %v1769_v60 = vadd.f32 1.0, %v3194_v58 }
 0xc4b   : > { %2017 = vmatpush.bf16.msrb.mxu2 %v2006_v59 }
 0xc4c   : > { %v1771_v61 = vmul.f32 0.5, %v1769_v60 }
 0xc4e   : > { %v1773_v0 = vmul.f32 %v1771_v61, %v1754_v34  ;;  %v2065_v1 = vpop.f32.mrf.mxu0 }
 0xc4f   : > { %v2066_v8 = vadd.f32 %v3136_v62, %v2065_v1 }
 0xc50   : > { %v1774_v36 = vpack.c.bf16 %v1773_v0, %v1772_v33 }
 0xc52   : > { %3034 = vmatmul.msk.bf16.vlgmr.msra.gmra.mxu1 %vm1790_vm12, %v1774_v36 }
 0xc53   : > { %2085 = vmatpush.bf16.msra.mxu1 %v2076_v6 }
 0xc56   : > { %v2067_v7 = vpop.f32.mrf.mxu0 }
 0xc57   : > { %v2068_v52 = vadd.f32 %v3136_v62, %v2067_v7 }
 0xc59   : > { %v2093_v10 = vpack.c.bf16 %v2068_v52, %v2066_v8 }
 0xc5b   : > { %v2098_v12 = vsel %vm995_vm10, %v2093_v10, 0  ;;  %v3054_v10 = vld [vmem:[%s3963_s6 + $0x8] sm:$0xf] }
 0xc5c   : > { %2107 = vmatpush.bf16.xpose.msra.mxu2 %v2098_v12 }
 0xc62   : > { %3038 = vmatmul.msk.bf16.vlgmr.msrb.gmra.mxu1 %vm995_vm10, %v1933_v16  ;;  %v2231_v16 = vsel %vm931_vm3, %v3054_v10, 0 }
 0xc72   : > { %3048 = vmatmul.msk.bf16.vlgmr.msra.gmra.mxu1 %vm860_vm1, %v3714_v3 }
 0xccf   : > { %v1803_v18 = vpop.f32.mrf.mxu1 }
 0xcd0   : > { %v1804_v19 = vadd.f32 %v3762_v17, %v1803_v18  ;;  %v2045_v18 = vpop.f32.mrf.mxu3 }
 0xcd2   : > { %v1808_v21 = vadd.f32 %v1804_v19, %v3634_v46  ;;  %v3135_v19 = vld [vmem:[%s3428_s23 + $0x1] ss:$0 sm:$0xff] }
 0xcd4   : > { %1810 = vst.msk [vmem:[#allocation2] sm:$0xff] %vm860_vm1, %v1808_v21  ;;  %v2046_v21 = vadd.f32 %v3135_v19, %v2045_v18 }
 0xcd7   : > { %v1805_v24 = vpop.f32.mrf.mxu1 }
 0xcd8   : > { %v1806_v25 = vadd.f32 %v3762_v17, %v1805_v24  ;;  %v2044_v24 = vadd.f32 %v3135_v19, %v2043_v13  ;;  %v3051_v13 = vld [vmem:[%s3966_s29 + $0x1] sm:$0x1] }
 0xcda   : > { %v1809_v26 = vadd.f32 %v1806_v25, %v3640_v56  ;;  %v2092_v25 = vpack.c.bf16 %v2046_v21, %v2044_v24  ;;  %v3067_v21 = vld [vmem:[%s3963_s6 + $0xc] sm:$0xf] }
 0xcdc   : > { %1811 = vst.msk [vmem:[#allocation2 + $0x8] sm:$0xff] %vm860_vm1, %v1809_v26  ;;  %v2025_v26 = vld [vmem:[%s3966_s29] sm:$0x1] }
 0xcdf   : > { %v1950_v27 = vpop.f32.mrf.mxu1 }
 0xce0   : > { %v1955_v28 = vmul.f32 0.35355338, %v1950_v27  ;;  %v2209_v27 = vsel %vm1257_vm6, %v2025_v26, 0  ;;  %v2412_v26 = vsel %vm931_vm3, %v3067_v21, 0 }
 0xce1   : > { %2218 = vmatpush.bf16.msrb.mxu1 %v2209_v27 }
 0xce2   : > { %v1957_v29 = vsel %vm1018_vm11, %v1955_v28, -inf }
 0xce3   : > { %1958 = vmax.xlane.f32.xlu1 %v1957_v29 }
 0xce7   : > { %v1952_v30 = vpop.f32.mrf.mxu1 }
 0xce8   : > { %v1956_v31 = vmul.f32 0.35355338, %v1952_v30 }
 0xcea   : > { %v1960_v34 = vsel %vm1018_vm11, %v1956_v31, -inf }
 0xceb   : > { %1961 = vmax.xlane.f32.xlu2 %v1960_v34 }
 0xcef   : > { %v2087_v46 = vpop.f32.mrf.mxu1 }
 0xcf0   : > { %v2088_v38 = vadd.f32 %v3138_v35, %v2087_v46 }
 0xcf7   : > { %v2089_v37 = vpop.f32.mrf.mxu1 }
 0xcf8   : > { %v2090_v39 = vadd.f32 %v3138_v35, %v2089_v37 }
 0xcfa   : > { %v2165_v40 = vpack.c.bf16 %v2090_v39, %v2088_v38 }
 0xcfc   : > { %2176 = vmatpush.bf16.msra.mxu3 %v2165_v40 }
 0xd56   : > { %v1959_v56 = vpop.xlane.xlu1 %1958 }
 0xd57   : > { %v1963_v41 = vsub.f32 %v1955_v28, %v1959_v56 }
 0xd59   : > { %v1965_v42 = vmul.f32 1.442695, %v1963_v41 }
 0xd5b   : > { %3195 = vpow2.f32 %v1965_v42 }
 0xd5e   : > { %v1962_v43 = vpop.xlane.xlu2 %1961 }
 0xd5f   : > { %v1964_v44 = vsub.f32 %v1956_v31, %v1962_v43 }
 0xd61   : > { %v3196_v45 = vpop.eup %3195  ;;  %v1967_v47 = vmul.f32 1.442695, %v1964_v44 }
 0xd62   : > { %v1969_v48 = vsel %vm1018_vm11, %v3196_v45, 0.0 }
 0xd63   : > { %3197 = vpow2.f32 %v1967_v47  ;;  %1970 = vadd.xlane.f32.xlu0 %v1969_v48 }
 0xd69   : > { %v3198_v49 = vpop.eup %3197 }
 0xd6a   : > { %v1972_v50 = vsel %vm1018_vm11, %v3198_v49, 0.0 }
 0xd6b   : > { %1973 = vadd.xlane.f32.xlu1 %v1972_v50 }
 0xdd6   : > { %v1971_v63 = vpop.xlane.xlu0 %1970 }
 0xdd7   : > { %3199 = vrcp.f32 %v1971_v63  ;;  %v1986_v61 = vand.u32 2147483648, %v1971_v63  ;;  %vm1980_vm14 = vweird.f32 %v1971_v63  ;;  %v1984_v32 = vand.u32 2147483647, %v1971_v63 }
 0xdd9   : > { %v1987_v6 = vor.u32 1.1754944e-38, %v1986_v61  ;;  %vm1985_vm2 = vcmp.eq.f32.partialorder %v1984_v32, 8.507059e+37 }
 0xddd   : > { %v3200_v51 = vpop.eup %3199 }
 0xdde   : > { %v1976_v53 = vmul.f32 %v3200_v51, %v1971_v63  ;;  %v1974_v55 = vpop.xlane.xlu1 %1973  ;;  %vm1981_vm13 = vweird.f32 %v3200_v51 }
 0xddf   : > { %3201 = vrcp.f32 %v1974_v55  ;;  %vm1982_vm15 = vmor %vm1980_vm14, %vm1981_vm13  ;;  %v2001_v0 = vand.u32 2147483648, %v1974_v55  ;;  %v1999_v36 = vand.u32 2147483647, %v1974_v55  ;;  %vm1995_vm4 = vweird.f32 %v1974_v55 }
 0xde0   : > { %v1977_v57 = vsub.f32 1.0, %v1976_v53 }
 0xde1   : > { %v2002_v8 = vor.u32 1.1754944e-38, %v2001_v0  ;;  %vm2000_vm7 = vcmp.eq.f32.partialorder %v1999_v36, 8.507059e+37 }
 0xde2   : > { %v1978_v58 = vmul.f32 %v3200_v51, %v1977_v57 }
 0xde4   : > { %v1979_v54 = vadd.f32 %v3200_v51, %v1978_v58 }
 0xde5   : > { %v3202_v59 = vpop.eup %3201 }
 0xde6   : > { %v1991_v60 = vmul.f32 %v3202_v59, %v1974_v55  ;;  %v1983_v1 = vsel %vm1982_vm15, %v3200_v51, %v1979_v54  ;;  %vm1996_vm0 = vweird.f32 %v3202_v59 }
 0xde7   : > { %v1988_v7 = vsel %vm1985_vm2, %v1987_v6, %v1983_v1  ;;  %vm1997_vm5 = vmor %vm1995_vm4, %vm1996_vm0 }
 0xde8   : > { %v1992_v33 = vsub.f32 1.0, %v1991_v60  ;;  %v1989_v11 = vmul.f32 %v3196_v45, %v1988_v7 }
 0xdea   : > { %v1993_v2 = vmul.f32 %v3202_v59, %v1992_v33 }
 0xdec   : > { %v1994_v62 = vadd.f32 %v3202_v59, %v1993_v2 }
 0xdee   : > { %v1998_v52 = vsel %vm1997_vm5, %v3202_v59, %v1994_v62 }
 0xdef   : > { %v2003_v9 = vsel %vm2000_vm7, %v2002_v8, %v1998_v52 }
 0xdf0   : > { %v2004_v12 = vmul.f32 %v3198_v49, %v2003_v9  ;;  %v3057_v49 = vld [vmem:[%s3433_s19 + $0x8] sm:$0xf] }
 0xdf1   : > { %v2253_v50 = vsel %vm931_vm3, %v3057_v49, 0 }
 0xdf2   : > { %v2005_v15 = vpack.c.bf16 %v2004_v12, %v1989_v11  ;;  %2262 = vmatpush.bf16.msrb.mxu3 %v2253_v50  ;;  %v3141_v50 = vld [vmem:[%s3450_s0 + $0x2] ss:$0 sm:$0xff] }
 0xdf4   : > { %3039 = vmatmul.msk.bf16.vlgmr.msrb.gmra.mxu2 %vm1018_vm11, %v2005_v15  ;;  %v2189_v15 = vsel %vm1257_vm6, %v3051_v13, 0 }
 0xdf5   : > { %2240 = vmatpush.bf16.msrb.mxu2 %v2231_v16  ;;  %2198 = vmatpush.bf16.msrb.mxu0 %v2189_v15  ;;  %v3060_v16 = vld [vmem:[%s3444_s21 + $0x8] sm:$0xf] }
 0xdf6   : > { %v2275_v18 = vsel %vm931_vm3, %v3060_v16, 0 }
 0xdf9   : > { %2284 = vmatpush.bf16.msra.mxu0 %v2275_v18 }
 0xe04   : > { %3049 = vmatmul.msk.bf16.vlgmr.msra.gmra.mxu2 %vm995_vm10, %v2092_v25 }
 0xe14   : > { %3056 = vmatmul.msk.bf16.vlgmr.msrb.gmra.mxu2 %vm860_vm1, %v3714_v3 }
 0xe77   : > { %v2019_v28 = vpop.f32.mrf.mxu2 }
 0xe7f   : > { %v2021_v29 = vpop.f32.mrf.mxu2 }
 0xe80   : > { %v2024_v30 = vpack.c.bf16 %v2021_v29, %v2019_v28  ;;  %v3140_v29 = vld [vmem:[%s3439_s28 + $0x2] ss:$0 sm:$0xff] }
 0xe82   : > { %3053 = vmatmul.msk.bf16.vlgmr.msrb.gmra.mxu1 %vm995_vm10, %v2024_v30 }
 0xe87   : > { %v2109_v31 = vpop.f32.mrf.mxu2 }
 0xe88   : > { %v2114_v34 = vmul.f32 0.35355338, %v2109_v31 }
 0xe8a   : > { %v2116_v46 = vsel %vm1018_vm11, %v2114_v34, -inf }
 0xe8b   : > { %2117 = vmax.xlane.f32.xlu2 %v2116_v46  ;;  %v3070_v46 = vld [vmem:[%s3433_s19 + $0xc] sm:$0xf] }
 0xe8f   : > { %v2111_v35 = vpop.f32.mrf.mxu2 }
 0xe90   : > { %v2115_v37 = vmul.f32 0.35355338, %v2111_v35 }
 0xe92   : > { %v2119_v38 = vsel %vm1018_vm11, %v2115_v37, -inf }
 0xe93   : > { %2120 = vmax.xlane.f32.xlu0 %v2119_v38  ;;  %v2434_v38 = vsel %vm931_vm3, %v3070_v46, 0 }
 0xe97   : > { %v2242_v28 = vpop.f32.mrf.mxu2 }
 0xefe   : > { %v2118_v39 = vpop.xlane.xlu2 %2117 }
 0xeff   : > { %v2122_v40 = vsub.f32 %v2114_v34, %v2118_v39  ;;  %v3139_v39 = vld [vmem:[%s3428_s23 + $0x2] ss:$0 sm:$0xff] }
 0xf01   : > { %v2124_v56 = vmul.f32 1.442695, %v2122_v40 }
 0xf03   : > { %3203 = vpow2.f32 %v2124_v56 }
 0xf06   : > { %v2121_v41 = vpop.xlane.xlu0 %2120 }
 0xf07   : > { %v2123_v42 = vsub.f32 %v2115_v37, %v2121_v41  ;;  %v2244_v37 = vpop.f32.mrf.mxu2  ;;  %v2243_v41 = vadd.f32 %v3139_v39, %v2242_v28 }
 0xf08   : > { %v2245_v56 = vadd.f32 %v3139_v39, %v2244_v37 }
 0xf09   : > { %v3204_v43 = vpop.eup %3203  ;;  %v2126_v44 = vmul.f32 1.442695, %v2123_v42 }
 0xf0a   : > { %v2128_v45 = vsel %vm1018_vm11, %v3204_v43, 0.0  ;;  %v2291_v42 = vpack.c.bf16 %v2245_v56, %v2243_v41 }
 0xf0b   : > { %3205 = vpow2.f32 %v2126_v44  ;;  %2129 = vadd.xlane.f32.xlu1 %v2128_v45 }
 0xf11   : > { %v3206_v47 = vpop.eup %3205 }
 0xf12   : > { %v2131_v48 = vsel %vm1018_vm11, %v3206_v47, 0.0 }
 0xf13   : > { %2132 = vadd.xlane.f32.xlu2 %v2131_v48 }
 0xf7e   : > { %v2130_v63 = vpop.xlane.xlu1 %2129 }
 0xf7f   : > { %3207 = vrcp.f32 %v2130_v63  ;;  %v2145_v61 = vand.u32 2147483648, %v2130_v63  ;;  %vm2139_vm9 = vweird.f32 %v2130_v63  ;;  %v2143_v32 = vand.u32 2147483647, %v2130_v63 }
 0xf81   : > { %v2146_v6 = vor.u32 1.1754944e-38, %v2145_v61  ;;  %vm2144_vm15 = vcmp.eq.f32.partialorder %v2143_v32, 8.507059e+37 }
 0xf85   : > { %v3208_v51 = vpop.eup %3207 }
 0xf86   : > { %v2135_v53 = vmul.f32 %v3208_v51, %v2130_v63  ;;  %v2133_v55 = vpop.xlane.xlu2 %2132  ;;  %vm2140_vm8 = vweird.f32 %v3208_v51  ;;  %v3065_v63 = vld [vmem:[%s3966_s29 + $0x2] sm:$0x1] }
 0xf87   : > { %3209 = vrcp.f32 %v2133_v55  ;;  %vm2141_vm13 = vmor %vm2139_vm9, %vm2140_vm8  ;;  %v2160_v0 = vand.u32 2147483648, %v2133_v55  ;;  %v2158_v36 = vand.u32 2147483647, %v2133_v55  ;;  %vm2154_vm0 = vweird.f32 %v2133_v55 }
 0xf88   : > { %v2136_v57 = vsub.f32 1.0, %v2135_v53 }
 0xf89   : > { %v2161_v8 = vor.u32 1.1754944e-38, %v2160_v0  ;;  %vm2159_vm4 = vcmp.eq.f32.partialorder %v2158_v36, 8.507059e+37 }
 0xf8a   : > { %v2137_v58 = vmul.f32 %v3208_v51, %v2136_v57 }
 0xf8c   : > { %v2138_v54 = vadd.f32 %v3208_v51, %v2137_v58 }
 0xf8d   : > { %v3210_v59 = vpop.eup %3209 }
 0xf8e   : > { %v2150_v60 = vmul.f32 %v3210_v59, %v2133_v55  ;;  %v2142_v1 = vsel %vm2141_vm13, %v3208_v51, %v2138_v54  ;;  %vm2155_vm14 = vweird.f32 %v3210_v59  ;;  %v2388_v51 = vsel %vm1257_vm6, %v3065_v63, 0 }
 0xf8f   : > { %v2147_v7 = vsel %vm2144_vm15, %v2146_v6, %v2142_v1  ;;  %vm2156_vm2 = vmor %vm2154_vm0, %vm2155_vm14  ;;  %v3143_v1 = vld [vmem:[%s3439_s28 + $0x3] ss:$0 sm:$0xff] }
 0xf90   : > { %v2151_v33 = vsub.f32 1.0, %v2150_v60  ;;  %v2148_v10 = vmul.f32 %v3204_v43, %v2147_v7  ;;  %v3813_v43 = vpop.f32.mrf.mxu1 }
 0xf92   : > { %v2152_v2 = vmul.f32 %v3210_v59, %v2151_v33 }
 0xf94   : > { %v2153_v62 = vadd.f32 %v3210_v59, %v2152_v2 }
 0xf96   : > { %v2157_v52 = vsel %vm2156_vm2, %v3210_v59, %v2153_v62 }
 0xf97   : > { %v2162_v9 = vsel %vm2159_vm4, %v2161_v8, %v2157_v52 }
 0xf98   : > { %v2163_v11 = vmul.f32 %v3206_v47, %v2162_v9  ;;  %v2222_v45 = vpop.f32.mrf.mxu1 }
 0xf9a   : > { %v2164_v12 = vpack.c.bf16 %v2163_v11, %v2148_v10 }
 0xf9c   : > { %3050 = vmatmul.msk.bf16.vlgmr.msra.gmra.mxu3 %vm1018_vm11, %v2164_v12 }
 0xf9d   : > { %2397 = vmatpush.bf16.msra.mxu3 %v2388_v51 }
 0xfac   : > { %3059 = vmatmul.msk.bf16.vlgmr.msrb.gmra.mxu3 %vm860_vm1, %v3714_v3 }
0x101f   : > { %v2178_v19 = vpop.f32.mrf.mxu3 }
0x1027   : > { %v2180_v24 = vpop.f32.mrf.mxu3 }
0x1028   : > { %v2183_v25 = vpack.c.bf16 %v2180_v24, %v2178_v19  ;;  %v3073_v19 = vld [vmem:[%s3444_s21 + $0xc] sm:$0xf]  ;;  %s3970_s21 = sld [smem:[#allocation23_spill]] (!%p3082_p5) }
0x1029   : > { %v2456_v21 = vsel %vm931_vm3, %v3073_v19, 0 }
0x102a   : > { %3052 = vmatmul.msk.bf16.vlgmr.msrb.gmra.mxu0 %vm995_vm10, %v2183_v25 }
0x102b   : > { %2421 = vmatpush.bf16.msrb.mxu0 %v2412_v26 }
0x102f   : > { %v2264_v27 = vpop.f32.mrf.mxu3 }
0x1030   : > { %v2265_v31 = vadd.f32 %v3140_v29, %v2264_v27 }
0x1037   : > { %v2266_v30 = vpop.f32.mrf.mxu3 }
0x1038   : > { %v2267_v34 = vadd.f32 %v3140_v29, %v2266_v30 }
0x103a   : > { %v2292_v35 = vpack.c.bf16 %v2267_v34, %v2265_v31  ;;  %3062 = vmatmul.msk.bf16.vlgmr.msra.gmra.mxu0 %vm860_vm1, %v3714_v3 }
0x103c   : > { %v2297_v40 = vsel %vm995_vm10, %v2292_v35, 0 }
0x103d   : > { %2306 = vmatpush.bf16.xpose.msra.mxu1 %v2297_v40 }
0x1044   : > { %3063 = vmatmul.msk.bf16.vlgmr.msra.gmra.mxu1 %vm995_vm10, %v2291_v42 }
0x1045   : > { %2443 = vmatpush.bf16.msrb.mxu1 %v2434_v38 }
0x104a   : > { %3069 = vmatmul.msk.bf16.vlgmr.msrb.gmra.mxu0 %vm860_vm1, %v3714_v3 }
0x1054   : > { %3072 = vmatmul.msk.bf16.vlgmr.msrb.gmra.mxu1 %vm860_vm1, %v3714_v3 }
0x10a7   : > { %v3815_v44 = vpop.f32.mrf.mxu0 }
0x10af   : > { %v2202_v47 = vpop.f32.mrf.mxu0 }
0x10b0   : > { %v3817_v48 = vadd.f32 %v2222_v45, %v2202_v47 }
0x10b7   : > { %v2286_v49 = vpop.f32.mrf.mxu0 }
0x10b8   : > { %v2287_v55 = vadd.f32 %v3141_v50, %v2286_v49 }
0x10bf   : > { %v2288_v53 = vpop.f32.mrf.mxu0 }
0x10c0   : > { %v2289_v57 = vadd.f32 %v3141_v50, %v2288_v53 }
0x10c1   : > { %v2308_v58 = vpop.f32.mrf.mxu1 }
0x10c2   : > { %v2364_v59 = vpack.c.bf16 %v2289_v57, %v2287_v55  ;;  %v2313_v54 = vmul.f32 0.35355338, %v2308_v58 }
0x10c4   : > { %2375 = vmatpush.bf16.msra.mxu2 %v2364_v59  ;;  %v2315_v60 = vsel %vm1018_vm11, %v2313_v54, -inf }
0x10c5   : > { %2316 = vmax.xlane.f32.xlu0 %v2315_v60 }
0x10c7   : > { %v2423_v57 = vpop.f32.mrf.mxu0 }
0x10c8   : > { %2465 = vmatpush.bf16.msrb.mxu2 %v2456_v21 }
0x10c9   : > { %v2310_v61 = vpop.f32.mrf.mxu1 }
0x10ca   : > { %v2314_v32 = vmul.f32 0.35355338, %v2310_v61  ;;  %v3142_v61 = vld [vmem:[%s3428_s23 + $0x3] ss:$0 sm:$0xff] }
0x10cc   : > { %v2318_v33 = vsel %vm1018_vm11, %v2314_v32, -inf }
0x10cd   : > { %2319 = vmax.xlane.f32.xlu1 %v2318_v33  ;;  %v3144_v33 = vld [vmem:[%s3450_s0 + $0x3] ss:$0 sm:$0xff] }
0x10cf   : > { %v2425_v60 = vpop.f32.mrf.mxu0 }
0x10d1   : > { %v2445_v0 = vpop.f32.mrf.mxu1 }
0x10d2   : > { %v2446_v36 = vadd.f32 %v3143_v1, %v2445_v0  ;;  %v2424_v0 = vadd.f32 %v3142_v61, %v2423_v57  ;;  %v3078_v57 = vld [vmem:[%s3966_s29 + $0x3] sm:$0x1] }
0x10d9   : > { %v2447_v2 = vpop.f32.mrf.mxu1 }
0x10da   : > { %v2448_v6 = vadd.f32 %v3143_v1, %v2447_v2 }
0x10dc   : > { %v2473_v62 = vpack.c.bf16 %v2448_v6, %v2446_v36  ;;  %v2221_v6 = vadd.f32 %v3813_v43, %v3815_v44 }
0x10de   : > { %v2478_v7 = vsel %vm995_vm10, %v2473_v62, 0 }
0x10df   : > { %2487 = vmatpush.bf16.xpose.msrb.mxu3 %v2478_v7 }
0x1138   : > { %v2317_v8 = vpop.xlane.xlu0 %2316 }
0x1139   : > { %v2321_v52 = vsub.f32 %v2313_v54, %v2317_v8 }
0x113b   : > { %v2323_v9 = vmul.f32 1.442695, %v2321_v52 }
0x113d   : > { %3211 = vpow2.f32 %v2323_v9 }
0x1140   : > { %v2320_v10 = vpop.xlane.xlu1 %2319 }
0x1141   : > { %v2322_v11 = vsub.f32 %v2314_v32, %v2320_v10  ;;  %v2426_v32 = vadd.f32 %v3142_v61, %v2425_v60 }
0x1143   : > { %v3212_v12 = vpop.eup %3211  ;;  %v2325_v13 = vmul.f32 1.442695, %v2322_v11  ;;  %v2472_v1 = vpack.c.bf16 %v2426_v32, %v2424_v0 }
0x1144   : > { %v2327_v15 = vsel %vm1018_vm11, %v3212_v12, 0.0 }
0x1145   : > { %3213 = vpow2.f32 %v2325_v13  ;;  %2328 = vadd.xlane.f32.xlu2 %v2327_v15 }
0x114b   : > { %v3214_v16 = vpop.eup %3213 }
0x114c   : > { %v2330_v18 = vsel %vm1018_vm11, %v3214_v16, 0.0 }
0x114d   : > { %2331 = vadd.xlane.f32.xlu0 %v2330_v18 }
0x11b8   : > { %v2329_v24 = vpop.xlane.xlu2 %2328 }
0x11b9   : > { %3215 = vrcp.f32 %v2329_v24  ;;  %v2344_v46 = vand.u32 2147483648, %v2329_v24  ;;  %vm2338_vm7 = vweird.f32 %v2329_v24  ;;  %v2342_v35 = vand.u32 2147483647, %v2329_v24 }
0x11bb   : > { %v2345_v41 = vor.u32 1.1754944e-38, %v2344_v46  ;;  %vm2343_vm9 = vcmp.eq.f32.partialorder %v2342_v35, 8.507059e+37 }
0x11bf   : > { %v3216_v25 = vpop.eup %3215 }
0x11c0   : > { %v2334_v26 = vmul.f32 %v3216_v25, %v2329_v24  ;;  %v2332_v27 = vpop.xlane.xlu0 %2331  ;;  %vm2339_vm5 = vweird.f32 %v3216_v25 }
0x11c1   : > { %3217 = vrcp.f32 %v2332_v27  ;;  %vm2340_vm8 = vmor %vm2338_vm7, %vm2339_vm5  ;;  %v2359_v38 = vand.u32 2147483648, %v2332_v27  ;;  %v2357_v56 = vand.u32 2147483647, %v2332_v27  ;;  %vm2353_vm13 = vweird.f32 %v2332_v27 }
0x11c2   : > { %v2335_v28 = vsub.f32 1.0, %v2334_v26 }
0x11c3   : > { %v2360_v47 = vor.u32 1.1754944e-38, %v2359_v38  ;;  %vm2358_vm15 = vcmp.eq.f32.partialorder %v2357_v56, 8.507059e+37 }
0x11c4   : > { %v2336_v29 = vmul.f32 %v3216_v25, %v2335_v28 }
0x11c6   : > { %v2337_v31 = vadd.f32 %v3216_v25, %v2336_v29 }
0x11c7   : > { %v3218_v30 = vpop.eup %3217 }
0x11c8   : > { %v2349_v34 = vmul.f32 %v3218_v30, %v2332_v27  ;;  %v2341_v39 = vsel %vm2340_vm8, %v3216_v25, %v2337_v31  ;;  %vm2354_vm3 = vweird.f32 %v3218_v30 }
0x11c9   : > { %v2346_v45 = vsel %vm2343_vm9, %v2345_v41, %v2341_v39  ;;  %vm2355_vm14 = vmor %vm2353_vm13, %vm2354_vm3 }
0x11ca   : > { %v2350_v37 = vsub.f32 1.0, %v2349_v34  ;;  %v2347_v63 = vmul.f32 %v3212_v12, %v2346_v45 }
0x11cc   : > { %v2351_v40 = vmul.f32 %v3218_v30, %v2350_v37 }
0x11ce   : > { %v2352_v42 = vadd.f32 %v3218_v30, %v2351_v40 }
0x11d0   : > { %v2356_v49 = vsel %vm2355_vm14, %v3218_v30, %v2352_v42 }
0x11d1   : > { %v2361_v50 = vsel %vm2358_vm15, %v2360_v47, %v2356_v49 }
0x11d2   : > { %v2362_v51 = vmul.f32 %v3214_v16, %v2361_v50 }
0x11d4   : > { %v2363_v53 = vpack.c.bf16 %v2362_v51, %v2347_v63 }
0x11d6   : > { %3064 = vmatmul.msk.bf16.vlgmr.msra.gmra.mxu2 %vm1018_vm11, %v2363_v53 }
0x11d7   : > { %2650 = vmatpush.bf16.msra.mxu2 %v3679_v20 }
0x11e6   : > { %3075 = vmatmul.msk.bf16.vlgmr.msrb.gmra.mxu2 %vm860_vm1, %v3714_v3 }
0x1259   : > { %v2377_v55 = vpop.f32.mrf.mxu2 }
0x1261   : > { %v2379_v58 = vpop.f32.mrf.mxu2 }
0x1262   : > { %v2382_v59 = vpack.c.bf16 %v2379_v58, %v2377_v55  ;;  %v2569_v58 = vsel %vm1257_vm6, %v3078_v57, 0 }
0x1263   : > { %2578 = vmatpush.bf16.msra.mxu1 %v2569_v58 }
0x1264   : > { %3066 = vmatmul.msk.bf16.vlgmr.msra.gmra.mxu3 %vm995_vm10, %v2382_v59 }
0x1265   : > { %2685 = vmatpush.bf16.msra.mxu3 %v3729_v4 }
0x1269   : > { %v2467_v54 = vpop.f32.mrf.mxu2  ;;  %2686 = vmatpush.bf16.msra.mxu3 %v3733_v22 }
0x126a   : > { %v2468_v2 = vadd.f32 %v3144_v33, %v2467_v54 }
0x1271   : > { %v2469_v20 = vpop.f32.mrf.mxu2 }
0x1272   : > { %v2470_v3 = vadd.f32 %v3144_v33, %v2469_v20  ;;  %v3239_v33 = vld [vmem:[#allocation2 + $0x10] sm:$0xff] }
0x1273   : > { %v3240_v20 = vld [vmem:[%s3462_s17] ss:$0 sm:$0xff] }
0x1274   : > { %v2545_v36 = vpack.c.bf16 %v2470_v3, %v2468_v2  ;;  %3076 = vmatmul.msk.bf16.vlgmr.msrb.gmra.mxu3 %vm995_vm10, %v2472_v1 }
0x1276   : > { %2556 = vmatpush.bf16.msra.mxu0 %v2545_v36 }
0x12e7   : > { %v2399_v4 = vpop.f32.mrf.mxu3 }
0x12e8   : > { %v3842_v62 = vadd.f32 %v2399_v4, %v2221_v6  ;;  %v3241_v6 = vld [vmem:[#allocation2 + $0x18] sm:$0xff] }
0x12ef   : > { %v2401_v22 = vpop.f32.mrf.mxu3 }
0x12f0   : > { %v3845_v7 = vadd.f32 %v2401_v22, %v3817_v48 }
0x12f7   : > { %v2489_v8 = vpop.f32.mrf.mxu3 }
0x12f8   : > { %v2494_v52 = vmul.f32 0.35355338, %v2489_v8 }
0x12fa   : > { %v2496_v9 = vsel %vm1018_vm11, %v2494_v52, -inf }
0x12fb   : > { %2497 = vmax.xlane.f32.xlu1 %v2496_v9 }
0x12ff   : > { %v2491_v10 = vpop.f32.mrf.mxu3 }
0x1300   : > { %v2495_v11 = vmul.f32 0.35355338, %v2491_v10 }
0x1302   : > { %v2499_v12 = vsel %vm1018_vm11, %v2495_v11, -inf }
0x1303   : > { %2500 = vmax.xlane.f32.xlu2 %v2499_v12 }
0x136e   : > { %v2498_v13 = vpop.xlane.xlu1 %2497 }
0x136f   : > { %v2502_v15 = vsub.f32 %v2494_v52, %v2498_v13 }
0x1371   : > { %v2504_v43 = vmul.f32 1.442695, %v2502_v15 }
0x1373   : > { %3219 = vpow2.f32 %v2504_v43 }
0x1376   : > { %v2501_v44 = vpop.xlane.xlu2 %2500 }
0x1377   : > { %v2503_v16 = vsub.f32 %v2495_v11, %v2501_v44 }
0x1379   : > { %v3220_v18 = vpop.eup %3219  ;;  %v2506_v19 = vmul.f32 1.442695, %v2503_v16 }
0x137a   : > { %v2508_v48 = vsel %vm1018_vm11, %v3220_v18, 0.0 }
0x137b   : > { %3221 = vpow2.f32 %v2506_v19  ;;  %2509 = vadd.xlane.f32.xlu0 %v2508_v48 }
0x1381   : > { %v3222_v21 = vpop.eup %3221 }
0x1382   : > { %v2511_v24 = vsel %vm1018_vm11, %v3222_v21, 0.0 }
0x1383   : > { %2512 = vadd.xlane.f32.xlu1 %v2511_v24 }
0x13ee   : > { %v2510_v25 = vpop.xlane.xlu0 %2509 }
0x13ef   : > { %3223 = vrcp.f32 %v2510_v25  ;;  %v2525_v35 = vand.u32 2147483648, %v2510_v25  ;;  %vm2519_vm2 = vweird.f32 %v2510_v25  ;;  %v2523_v37 = vand.u32 2147483647, %v2510_v25 }
0x13f1   : > { %v2526_v42 = vor.u32 1.1754944e-38, %v2525_v35  ;;  %vm2524_vm7 = vcmp.eq.f32.partialorder %v2523_v37, 8.507059e+37 }
0x13f5   : > { %v3224_v26 = vpop.eup %3223 }
0x13f6   : > { %v2515_v27 = vmul.f32 %v3224_v26, %v2510_v25  ;;  %v2513_v28 = vpop.xlane.xlu1 %2512  ;;  %vm2520_vm0 = vweird.f32 %v3224_v26 }
0x13f7   : > { %3225 = vrcp.f32 %v2513_v28  ;;  %vm2521_vm4 = vmor %vm2519_vm2, %vm2520_vm0  ;;  %v2540_v39 = vand.u32 2147483648, %v2513_v28  ;;  %v2538_v41 = vand.u32 2147483647, %v2513_v28  ;;  %vm2534_vm8 = vweird.f32 %v2513_v28 }
0x13f8   : > { %v2516_v29 = vsub.f32 1.0, %v2515_v27 }
0x13f9   : > { %v2541_v49 = vor.u32 1.1754944e-38, %v2540_v39  ;;  %vm2539_vm9 = vcmp.eq.f32.partialorder %v2538_v41, 8.507059e+37 }
0x13fa   : > { %v2517_v30 = vmul.f32 %v3224_v26, %v2516_v29 }
0x13fc   : > { %v2518_v34 = vadd.f32 %v3224_v26, %v2517_v30 }
0x13fd   : > { %v3226_v31 = vpop.eup %3225 }
0x13fe   : > { %v2530_v46 = vmul.f32 %v3226_v31, %v2513_v28  ;;  %v2522_v40 = vsel %vm2521_vm4, %v3224_v26, %v2518_v34  ;;  %vm2535_vm5 = vweird.f32 %v3226_v31 }
0x13ff   : > { %v2527_v47 = vsel %vm2524_vm7, %v2526_v42, %v2522_v40  ;;  %vm2536_vm3 = vmor %vm2534_vm8, %vm2535_vm5  ;;  %v3242_v40 = vld [vmem:[%s3468_s3] ss:$0 sm:$0xff] }
0x1400   : > { %v2531_v38 = vsub.f32 1.0, %v2530_v46  ;;  %v2528_v51 = vmul.f32 %v3220_v18, %v2527_v47 }
0x1402   : > { %v2532_v56 = vmul.f32 %v3226_v31, %v2531_v38 }
0x1404   : > { %v2533_v45 = vadd.f32 %v3226_v31, %v2532_v56 }
0x1406   : > { %v2537_v50 = vsel %vm2536_vm3, %v3226_v31, %v2533_v45 }
0x1407   : > { %v2542_v63 = vsel %vm2539_vm9, %v2541_v49, %v2537_v50 }
0x1408   : > { %v2543_v53 = vmul.f32 %v3222_v21, %v2542_v63 }
0x140a   : > { %v2544_v55 = vpack.c.bf16 %v2543_v53, %v2528_v51 }
0x140c   : > { %3077 = vmatmul.msk.bf16.vlgmr.msra.gmra.mxu0 %vm1018_vm11, %v2544_v55 }
0x1489   : > { %v2558_v59 = vpop.f32.mrf.mxu0 }
0x1491   : > { %v2560_v54 = vpop.f32.mrf.mxu0 }
0x1492   : > { %v2563_v60 = vpack.c.bf16 %v2560_v54, %v2558_v59 }
0x1494   : > { %3079 = vmatmul.msk.bf16.vlgmr.msra.gmra.mxu1 %vm995_vm10, %v2563_v60 }
0x1511   : > { %v2580_v61 = vpop.f32.mrf.mxu1 }
0x1512   : > { %v2585_v32 = vadd.f32 %v2580_v61, %v3842_v62 }
0x1514   : > { %v2587_v0 = vadd.f32 %v3239_v33, %v2585_v32 }
0x1516   : > { %v3857_v1 = vadd.f32 %v3240_v20, %v2587_v0 }
0x1518   : > { %v2591_v2 = vsel %vm860_vm1, %v3857_v1, 0.0 }
0x1519   : > { %v2582_v3 = vpop.f32.mrf.mxu1  ;;  %2592 = vadd.xlane.f32.xlu2 %v2591_v2 }
0x151a   : > { %v2586_v36 = vadd.f32 %v2582_v3, %v3845_v7 }
0x151c   : > { %v2588_v4 = vadd.f32 %v3241_v6, %v2586_v36 }
0x151e   : > { %v3862_v22 = vadd.f32 %v3240_v20, %v2588_v4 }
0x1520   : > { %v2594_v8 = vsel %vm860_vm1, %v3862_v22, 0.0 }
0x1521   : > { %2595 = vadd.xlane.f32.xlu0 %v2594_v8 }
0x158c   : > { %v2593_v62 = vpop.xlane.xlu2 %2592 }
0x158d   : > { %v2597_v52 = vmul.f32 %v2593_v62, %v3506_v14 }
0x158f   : > { %v2599_v9 = vsub.f32 %v3857_v1, %v2597_v52 }
0x1591   : > { %v2601_v10 = vmul.f32 %v2599_v9, %v2599_v9 }
0x1593   : > { %v2603_v11 = vsel %vm860_vm1, %v2601_v10, 0.0 }
0x1594   : > { %v2596_v12 = vpop.xlane.xlu0 %2595  ;;  %2604 = vadd.xlane.f32.xlu1 %v2603_v11 }
0x1595   : > { %v2598_v7 = vmul.f32 %v2596_v12, %v3506_v14 }
0x1597   : > { %v2600_v13 = vsub.f32 %v3862_v22, %v2598_v7 }
0x1599   : > { %v2602_v15 = vmul.f32 %v2600_v13, %v2600_v13 }
0x159b   : > { %v2606_v43 = vsel %vm860_vm1, %v2602_v15, 0.0 }
0x159c   : > { %2607 = vadd.xlane.f32.xlu2 %v2606_v43 }
0x1607   : > { %v2605_v44 = vpop.xlane.xlu1 %2604 }
0x1608   : > { %v2609_v16 = vmul.f32 %v2605_v44, %v3506_v14 }
0x160a   : > { %v2611_v18 = vadd.f32 1e-05, %v2609_v16 }
0x160c   : > { %3227 = vrsqrt.f32 %v2611_v18  ;;  %vm2619_vm11 = vweird.f32 %v2611_v18 }
0x160f   : > { %v2608_v19 = vpop.xlane.xlu2 %2607 }
0x1610   : > { %v2610_v48 = vmul.f32 %v2608_v19, %v3506_v14 }
0x1612   : > { %v3228_v21 = vpop.eup %3227  ;;  %v2612_v24 = vadd.f32 1e-05, %v2610_v48 }
0x1613   : > { %v2614_v25 = vmul.f32 %v3228_v21, %v2611_v18  ;;  %vm2620_vm10 = vweird.f32 %v3228_v21 }
0x1614   : > { %3229 = vrsqrt.f32 %v2612_v24  ;;  %vm2621_vm6 = vmor %vm2619_vm11, %vm2620_vm10  ;;  %vm2629_vm14 = vweird.f32 %v2612_v24 }
0x1615   : > { %v2615_v26 = vmul.f32 %v3228_v21, %v2614_v25 }
0x1617   : > { %v2616_v27 = vmul.f32 0.5, %v2615_v26 }
0x1619   : > { %v2617_v28 = vsub.f32 1.5, %v2616_v27 }
0x161a   : > { %v3230_v29 = vpop.eup %3229 }
0x161b   : > { %v2618_v30 = vmul.f32 %v3228_v21, %v2617_v28  ;;  %v2624_v31 = vmul.f32 %v3230_v29, %v2612_v24  ;;  %vm2630_vm13 = vweird.f32 %v3230_v29 }
0x161c   : > { %vm2631_vm15 = vmor %vm2629_vm14, %vm2630_vm13 }
0x161d   : > { %v2625_v34 = vmul.f32 %v3230_v29, %v2624_v31  ;;  %v2622_v46 = vsel %vm2621_vm6, %v3228_v21, %v2618_v30 }
0x161e   : > { %v2633_v14 = vmul.f32 %v2622_v46, %v2599_v9 }
0x161f   : > { %v2626_v35 = vmul.f32 0.5, %v2625_v34 }
0x1620   : > { %v2635_v56 = vmul.f32 %v3242_v40, %v2633_v14 }
0x1621   : > { %v2627_v37 = vsub.f32 1.5, %v2626_v35 }
0x1622   : > { %v2637_v45 = vadd.f32 %v3705_v5, %v2635_v56 }
0x1623   : > { %v2628_v38 = vmul.f32 %v3230_v29, %v2627_v37 }
0x1625   : > { %v2632_v39 = vsel %vm2631_vm15, %v3230_v29, %v2628_v38 }
0x1626   : > { %v2634_v41 = vmul.f32 %v2632_v39, %v2600_v13 }
0x1628   : > { %v2636_v42 = vmul.f32 %v3242_v40, %v2634_v41 }
0x162a   : > { %v2638_v47 = vadd.f32 %v3705_v5, %v2636_v42 }
0x162c   : > { %v2639_v49 = vpack.c.bf16 %v2638_v47, %v2637_v45 }
0x162e   : > { %3080 = vmatmul.msk.bf16.vlgmr.msra.gmra.mxu2 %vm860_vm1, %v2639_v49 }
0x16b1   : > { %v2652_v50 = vpop.f32.mrf.mxu2 }
0x16b2   : > { %v2653_v63 = vadd.f32 %v3741_v23, %v2652_v50 }
0x16b4   : > { %v2657_v51 = vmul.f32 %v2653_v63, %v2653_v63 }
0x16b6   : > { %v2659_v53 = vmul.f32 %v2657_v51, %v2653_v63 }
0x16b8   : > { %v2661_v55 = vmul.f32 0.044715, %v2659_v53 }
0x16b9   : > { %v2654_v57 = vpop.f32.mrf.mxu2 }
0x16ba   : > { %v2663_v58 = vadd.f32 %v2661_v55, %v2653_v63  ;;  %v2655_v59 = vadd.f32 %v3741_v23, %v2654_v57 }
0x16bc   : > { %v2665_v54 = vmul.f32 0.7978846, %v2663_v58  ;;  %v2658_v60 = vmul.f32 %v2655_v59, %v2655_v59 }
0x16be   : > { %v2660_v61 = vmul.f32 %v2658_v60, %v2655_v59  ;;  %3231 = vtanh.f32 %v2665_v54 }
0x16c0   : > { %v2662_v32 = vmul.f32 0.044715, %v2660_v61 }
0x16c2   : > { %v2664_v33 = vadd.f32 %v2662_v32, %v2655_v59 }
0x16c4   : > { %v2666_v5 = vmul.f32 0.7978846, %v2664_v33  ;;  %v3232_v0 = vpop.eup %3231 }
0x16c5   : > { %v2669_v20 = vadd.f32 1.0, %v3232_v0 }
0x16c6   : > { %3233 = vtanh.f32 %v2666_v5 }
0x16c7   : > { %v2671_v3 = vmul.f32 0.5, %v2669_v20 }
0x16c9   : > { %v2673_v4 = vmul.f32 %v2671_v3, %v2653_v63 }
0x16cc   : > { %v3234_v2 = vpop.eup %3233 }
0x16cd   : > { %v2670_v36 = vadd.f32 1.0, %v3234_v2 }
0x16cf   : > { %v2672_v6 = vmul.f32 0.5, %v2670_v36 }
0x16d1   : > { %v2674_v8 = vmul.f32 %v2672_v6, %v2655_v59 }
0x16d3   : > { %v2675_v62 = vpack.c.bf16 %v2674_v8, %v2673_v4 }
0x16d5   : > { %3081 = vmatmul.msk.bf16.vlgmr.msra.gmra.mxu3 %vm1790_vm12, %v2675_v62 }
0x1758   : > { %v2688_v23 = vpop.f32.mrf.mxu3 }
0x1759   : > { %v2689_v52 = vadd.f32 %v3762_v17, %v2688_v23 }
0x175b   : > { %v2693_v9 = vadd.f32 %v2689_v52, %v3857_v1 }
0x175d   : > { %2695 = vst.msk [vmem:[#allocation2 + $0x10] sm:$0xff] %vm860_vm1, %v2693_v9 }
0x1760   : > { %v2690_v10 = vpop.f32.mrf.mxu3 }
0x1761   : > { %v2691_v11 = vadd.f32 %v3762_v17, %v2690_v10  ;;  %2700 = sbr.rel (%p3082_p5) target bundleno = 6141 (0x17fd), region = 104 }
0x1763   : > { %v2694_v12 = vadd.f32 %v2691_v11, %v3862_v22 }
0x1765   : > { %2696 = vst.msk [vmem:[#allocation2 + $0x18] sm:$0xff] %vm860_vm1, %v2694_v12 }
0x1766   : > { %v2703_v7 = vld [vmem:[#allocation2] sm:$0xff]  ;;  %v2704_v13 = vld [vmem:[#allocation2 + $0x8] sm:$0xff]  ;;  %v2732_v15 = vld [vmem:[#allocation2 + $0x10] sm:$0xff]  ;;  %v3285_v16 = vmov 0   ;;  %vm2730_vm12 = vcmask 125952  }
0x1767   : > { %v2705_v43 = vpack.c.bf16 %v2704_v13, %v2703_v7  ;;  %3243 = vset.pattern.permute.xlu0 %v3285_v16  ;;  %v2702_v1 = vld [vmem:[%s3969_s20] sm:$0xf] }
0x1768   : > { %2708 = vperm.xlu0 %3243, %v2702_v1   ;;  %v2701_v19 = vld [vmem:[%s3970_s21] sm:$0x3] }
0x1769   : > { %v2715_v17 = vsel %vm860_vm1, %v2705_v43, 0 }
0x176a   : > { %2724 = vmatpush.bf16.xpose.msra.mxu0 %v2715_v17 }
0x176c   : > { %v2733_v44 = vld [vmem:[#allocation2 + $0x18] sm:$0xff] }
0x176d   : > { %v2734_v18 = vpack.c.bf16 %v2733_v44, %v2732_v15 }
0x176f   : > { %v2736_v22 = vsel %vm860_vm1, %v2734_v18, 0 }
0x1770   : > { %2745 = vmatpush.bf16.xpose.msra.mxu1 %v2736_v22 }
0x1771   : > { %3083 = vmatmul.msk.bf16.vlgmr.msra.gmra.mxu0 %vm860_vm1, %v2701_v19 }
0x1777   : > { %3084 = vmatmul.msk.bf16.vlgmr.msra.gmra.mxu1 %vm860_vm1, %v2701_v19 }
0x17da   : > { %v2709_v48 = vpop.permute.xlu0 %2708 }
0x17ee   : > { %v2726_v21 = vpop.f32.mrf.mxu0 }
0x17ef   : > { %v2727_v24 = vadd.f32 %v2726_v21, %v2709_v48 }
0x17f1   : > { %2731 = vst.msk [vmem:[#allocation3] sm:$0xf] %vm2730_vm12, %v2727_v24 }
0x17f4   : > { %v2747_v25 = vpop.f32.mrf.mxu1 }
0x17f5   : > { %v2748_v26 = vadd.f32 %v2747_v25, %v2709_v48 }
0x17f6   : > { %v2728_v27 = vpop.f32.mrf.mxu0 }
0x17f7   : > { %2752 = vst.msk [vmem:[#allocation3 + $0x4] sm:$0xf] %vm2730_vm12, %v2748_v26 }
0x17fc   : > { %v2749_v28 = vpop.f32.mrf.mxu1 }
0x17fd PF: > { %p3099_p6 = scmp.eq.s32.totalorder %s3395_s30, 1  ;;  %s3286_s0 = smov [#allocation3]  }
0x17fe   : > { %s2758_s17 = sshll.u32 %s3286_s0, 4  ;;  %s3971_s26 = sld [smem:[#allocation25_spill]]  ;;  %s2759_s17 = int_to_ptr.vmem [resolvable:$true] %s2758_s17 }
0x17ff   : > { %s3287_s6 = smov 64   ;;  %s3288_s18 = smov 4  }
0x1804   : > { %s2760_s25 = sshll.u32 %s3971_s26, 4  ;;  %s2761_s25 = int_to_ptr.hbm [resolvable:$true] %s2760_s25 }
0x1805   : > { %3096 = dma.vmem_to_hbm [thread:$0]  (%p3099_p6), %s2759_s17, 128, %s2761_s25, [#allocation4], %s3287_s6, %s3287_s6, %s3288_s18  }
0x1806   : > { %3277 = dma.done.wait (%p3099_p6), [#allocation4], 128  }
0x1807   : > { %3279 = vsyncadd (%p3099_p6), [#allocation4], 4294967168 }
0x1808 PF: > { %s3972_s7 = sld [smem:[#allocation6_spill]] }
0x180e   : > { %s30_s0 = sadd.s32 1, %s3972_s7  }
0x180f   : > { %p27_p7 = scmp.ge.s32.totalorder %s30_s0, 4  }
0x1811   :  { %29 = sbr.rel (!%p27_p7) target bundleno = 17 (0x11), region = 199 }
0x1816   :  { %2777 = vsyncpa [#allocation4], 1 }
0x1817   :  { %2779 = vsyncpa [#allocation4 + $0x1], 1 }

</bundles_post_ra>
